<compile_context>
chip_gen: v6e
topology: v6e:2x2x1
jax: 0.10.0
libtpu: 0.0.40
codegen_flags: <defaults>
</compile_context>

<pallas_src>
import functools

import jax
import jax.numpy as jnp
import numpy as np
from jax.experimental import pallas as pl
from jax.experimental.pallas import tpu as pltpu


def _round_up(x: int, m: int) -> int:
    return ((x + m - 1) // m) * m


# --------------------------------------------------------------------------
# Parameter init (mirrors nn.Linear(1, E, bias=False) and nn.Linear(E, E)).
# --------------------------------------------------------------------------
def init_params(key, emb_dim):
    k1, k2, k3 = jax.random.split(key, 3)
    w1 = jax.random.uniform(k1, (emb_dim, 1), jnp.float32, -1.0, 1.0)            # lin1.weight
    bound = 1.0 / float(np.sqrt(emb_dim))
    w2 = jax.random.uniform(k2, (emb_dim, emb_dim), jnp.float32, -bound, bound)  # lin2.weight
    b2 = jax.random.uniform(k3, (emb_dim,), jnp.float32, -bound, bound)          # lin2.bias
    return {"w1": w1, "w2": w2, "b2": b2}


# --------------------------------------------------------------------------
# Pallas kernel: one grid step processes `bn` rows of the flattened batch.
# --------------------------------------------------------------------------
def _time_siren_kernel(x_ref, w1_ref, w2t_ref, b2_ref, o_ref, *, mxu_dtype):
    # lin1 (K=1) as an outer product: (bn, 1) * (1, E) -> (bn, E) on the VPU,
    # followed by sin on the EUP (separate bundle slot, essentially free).
    h = jnp.sin(x_ref[...] * w1_ref[...])
    # lin2: single MXU matmul with f32 accumulation, bias add fused on VPU.
    out = jnp.dot(h.astype(mxu_dtype), w2t_ref[...],
                  preferred_element_type=jnp.float32) + b2_ref[...]
    o_ref[...] = out.astype(o_ref.dtype)


def time_siren_forward(x, params, *, block_n=2048, mxu_bf16=False,
                       out_dtype=jnp.float32, core_parallel=False):
    """x: any shape (viewed as (-1, 1), like the PyTorch module) -> (N, E).

    block_n       : rows per grid step (clamped to the 8-aligned batch size).
    mxu_bf16      : feed the MXU bf16 operands (faster on v6e/v7x, ~1e-2 acc).
    out_dtype     : output dtype (bf16 halves the dominant HBM writeback).
    core_parallel : shard the batch grid axis across TensorCores (v7x).
    """
    emb_dim = params["w2"].shape[0]
    x2 = x.reshape(-1, 1).astype(jnp.float32)             # x.view(-1, 1)
    n = x2.shape[0]

    # Effective row tile: whole problem in one tile when small (no padding,
    # no post-kernel slice), otherwise `block_n` rows per grid step.
    bn = min(_round_up(max(block_n, 8), 8), _round_up(max(n, 8), 8))
    n_pad = _round_up(n, bn)
    padded = n_pad != n
    if padded:
        x2 = jnp.pad(x2, ((0, n_pad - n), (0, 0)))

    mxu_dtype = jnp.bfloat16 if mxu_bf16 else jnp.float32
    w1_row = params["w1"][:, 0][None, :]                   # (1, E)
    w2t = params["w2"].T.astype(mxu_dtype)                 # (E, E): out = h @ W2^T
    b2_row = params["b2"][None, :]                         # (1, E)

    itemsize_out = jnp.dtype(out_dtype).itemsize
    cost = pl.CostEstimate(
        flops=2 * n_pad * emb_dim * emb_dim + 2 * n_pad * emb_dim,
        transcendentals=n_pad * emb_dim,
        bytes_accessed=(n_pad * 4                           # x read
                        + emb_dim * emb_dim * jnp.dtype(mxu_dtype).itemsize
                        + 2 * emb_dim * 4                   # w1 + b2
                        + n_pad * emb_dim * itemsize_out),  # output write
    )

    dim_sem = (pltpu.CORE_PARALLEL if core_parallel else pltpu.PARALLEL,)

    grid = (n_pad // bn,)
    out = pl.pallas_call(
        functools.partial(_time_siren_kernel, mxu_dtype=mxu_dtype),
        out_shape=jax.ShapeDtypeStruct((n_pad, emb_dim), out_dtype),
        grid=grid,
        in_specs=[
            pl.BlockSpec((bn, 1), lambda i: (i, 0)),             # x rows
            pl.BlockSpec((1, emb_dim), lambda i: (0, 0)),        # w1 row
            pl.BlockSpec((emb_dim, emb_dim), lambda i: (0, 0)),  # W2^T
            pl.BlockSpec((1, emb_dim), lambda i: (0, 0)),        # b2 row
        ],
        out_specs=pl.BlockSpec((bn, emb_dim), lambda i: (i, 0)),
        compiler_params=pltpu.CompilerParams(dimension_semantics=dim_sem),
        cost_estimate=cost,
    )(x2, w1_row, w2t, b2_row)

    # Only materialize the (HBM-traffic-doubling) slice if we actually padded.
    return out[:n] if padded else out


# --------------------------------------------------------------------------
# Pure-JAX reference (mirrors the PyTorch module exactly).
# --------------------------------------------------------------------------
def time_siren_reference(x, p):
    x2 = x.reshape(-1, 1).astype(jnp.float32)
    h = jnp.sin(x2 @ p["w1"].T)
    return h @ p["w2"].T + p["b2"]


if __name__ == "__main__":
    N, EMB = 256, 128   # small batch, lane-dense embedding width
    key = jax.random.PRNGKey(0)
    kx, kp = jax.random.split(key)
    x = jax.random.normal(kx, (N,), jnp.float32)
    params = init_params(kp, EMB)

    # Defaults: f32 MXU operands, f32 output, single-TC grid parallelism.
    # On v7x pass core_parallel=True; on v6e/v7x mxu_bf16=True /
    # out_dtype=jnp.bfloat16 are further mem/MXU wins at ~1e-2 accuracy.
    out = time_siren_forward(x, params)
    out = jax.block_until_ready(out)
    assert out.shape == (N, EMB), out.shape

    ref = time_siren_reference(x, params)
    np.testing.assert_allclose(np.asarray(out), np.asarray(ref),
                               rtol=1e-4, atol=1e-4)
    print("KERNEL_OK")
</pallas_src>

<mosaic_0001>
module attributes {stable_mosaic.version = 11 : i64} {
  func.func @_time_siren_kernel(%arg0: i32, %arg1: memref<256x1xf32, #tpu.memory_space<vmem>>, %arg2: memref<1x128xf32, #tpu.memory_space<vmem>>, %arg3: memref<128x128xf32, #tpu.memory_space<vmem>>, %arg4: memref<1x128xf32, #tpu.memory_space<vmem>>, %arg5: memref<256x128xf32, #tpu.memory_space<vmem>>) attributes {dimension_semantics = [#tpu.dimension_semantics<parallel>], iteration_bounds = array<i64: 1>, scalar_prefetch = 0 : i64, scratch_operands = 0 : i64, tpu.core_type = #tpu.core_type<tc>, window_params = [{transform_indices = @transform_0, window_bounds = array<i64: 256, 1>}, {pipeline_mode = #tpu.pipeline_mode<synchronous>, transform_indices = @transform_1, window_bounds = array<i64: 1, 128>}, {pipeline_mode = #tpu.pipeline_mode<synchronous>, transform_indices = @transform_2, window_bounds = array<i64: 128, 128>}, {pipeline_mode = #tpu.pipeline_mode<synchronous>, transform_indices = @transform_3, window_bounds = array<i64: 1, 128>}, {transform_indices = @transform_4, window_bounds = array<i64: 256, 128>}]} {
    %c0 = arith.constant 0 : index
    %c0_0 = arith.constant 0 : index
    %0 = vector.load %arg1[%c0, %c0_0] : memref<256x1xf32, #tpu.memory_space<vmem>>, vector<256x1xf32>
    %c0_1 = arith.constant 0 : index
    %c0_2 = arith.constant 0 : index
    %1 = vector.load %arg2[%c0_1, %c0_2] : memref<1x128xf32, #tpu.memory_space<vmem>>, vector<1x128xf32>
    %2 = vector.broadcast %0 : vector<256x1xf32> to vector<256x128xf32>
    %3 = vector.broadcast %1 : vector<1x128xf32> to vector<256x128xf32>
    %4 = arith.mulf %2, %3 : vector<256x128xf32>
    %5 = math.sin %4 : vector<256x128xf32>
    %c0_3 = arith.constant 0 : index
    %c0_4 = arith.constant 0 : index
    %6 = vector.load %arg3[%c0_3, %c0_4] : memref<128x128xf32, #tpu.memory_space<vmem>>, vector<128x128xf32>
    %cst = arith.constant dense<0.000000e+00> : vector<256x128xf32>
    %7 = tpu.matmul %5, %6, %cst {dimension_numbers = #tpu.dot_dimension_numbers<[1], [0], [0], [1], [0, 0, 1, 1], [], []>} : vector<256x128xf32>, vector<128x128xf32>, vector<256x128xf32> -> vector<256x128xf32>
    %c0_5 = arith.constant 0 : index
    %c0_6 = arith.constant 0 : index
    %8 = vector.load %arg4[%c0_5, %c0_6] : memref<1x128xf32, #tpu.memory_space<vmem>>, vector<1x128xf32>
    %9 = vector.broadcast %8 : vector<1x128xf32> to vector<256x128xf32>
    %10 = arith.addf %7, %9 : vector<256x128xf32>
    %c0_7 = arith.constant 0 : index
    %c0_8 = arith.constant 0 : index
    %11 = vector.load %arg5[%c0_7, %c0_8] : memref<256x128xf32, #tpu.memory_space<vmem>>, vector<256x128xf32>
    tpu.vector_store %arg5[%c0_7, %c0_8], %10 {strides = array<i32>} : memref<256x128xf32, #tpu.memory_space<vmem>>, vector<256x128xf32>,
    return
  }
  func.func @transform_0(%arg0: i32) -> (i32, i32) {
    %c0_i32 = arith.constant 0 : i32
    %c0_i32_0 = arith.constant 0 : i32
    return %arg0, %c0_i32 : i32, i32
  }
  func.func @transform_1(%arg0: i32) -> (i32, i32) {
    %c0_i32 = arith.constant 0 : i32
    %c0_i32_0 = arith.constant 0 : i32
    %c0_i32_1 = arith.constant 0 : i32
    return %c0_i32, %c0_i32_0 : i32, i32
  }
  func.func @transform_2(%arg0: i32) -> (i32, i32) {
    %c0_i32 = arith.constant 0 : i32
    %c0_i32_0 = arith.constant 0 : i32
    %c0_i32_1 = arith.constant 0 : i32
    return %c0_i32, %c0_i32_0 : i32, i32
  }
  func.func @transform_3(%arg0: i32) -> (i32, i32) {
    %c0_i32 = arith.constant 0 : i32
    %c0_i32_0 = arith.constant 0 : i32
    %c0_i32_1 = arith.constant 0 : i32
    return %c0_i32, %c0_i32_0 : i32, i32
  }
  func.func @transform_4(%arg0: i32) -> (i32, i32) {
    %c0_i32 = arith.constant 0 : i32
    %c0_i32_0 = arith.constant 0 : i32
    return %arg0, %c0_i32 : i32, i32
  }
}

</mosaic_0001>

<bundles_post_ra>
// kernel: tpu_custom_call.1
= control target key start
LH: loop header
LB: loop body
LE: loop exit
PB: predicated region body
PF: predicated region fallthrough
CT: control target
= control target key end

     0   :  { %v4457_v2 = vmov 0   ;;  %s8049_s0 = inlined_call_operand.vmem [shape: f32[256,1], index: 0, kind: input, shape index: {}]   ;;  %s8050_s1 = inlined_call_operand.vmem [shape: f32[1,128], index: 1, kind: input, shape index: {}]   ;;  %s8051_s2 = inlined_call_operand.vmem [shape: f32[128,128], index: 2, kind: input, shape index: {}]   ;;  %s8052_s3 = inlined_call_operand.vmem [shape: f32[1,128], index: 3, kind: input, shape index: {}]   ;;  %s8053_s4 = inlined_call_operand.hbm [shape: f32[256,128], index: 4, kind: output, shape index: {}]  }
   0x1   :  { %v19_v0 = vld [vmem:[%s8049_s0 + $0x8] sm:$0xff]  ;;  %v18_v1 = vld [vmem:[%s8049_s0] sm:$0xff]  ;;  %4302 = vset.pattern.permute.xlu1 %v4457_v2  ;;  %4301 = vset.pattern.permute.xlu0 %v4457_v2  ;;  %v36_v5 = vld [vmem:[%s8049_s0 + $0x90] sm:$0xff] }
   0x2   :  { %58 = vperm.xlu1 %4302, %v19_v0   ;;  %53 = vperm.xlu0 %4301, %v18_v1   ;;  %v35_v3 = vld [vmem:[%s8049_s0 + $0x88] sm:$0xff]  ;;  %v34_v4 = vld [vmem:[%s8049_s0 + $0x80] sm:$0xff]  ;;  %v20_v6 = vld [vmem:[%s8049_s0 + $0x10] sm:$0xff] }
   0x3   :  { %v37_v7 = vld [vmem:[%s8049_s0 + $0x98] sm:$0xff] }
   0x4   :  { %v21_v8 = vld [vmem:[%s8049_s0 + $0x18] sm:$0xff] }
   0x6   :  { %138 = vperm.xlu1 %4302, %v35_v3   ;;  %133 = vperm.xlu0 %4301, %v34_v4  }
   0xa   :  { %143 = vperm.xlu1 %4302, %v36_v5   ;;  %63 = vperm.xlu0 %4301, %v20_v6  }
   0xb   :  { %9 = vsyncpa [#allocation3], 0  ;;  %v38_v9 = vld [vmem:[%s8049_s0 + $0xa0] sm:$0xff]  ;;  %v39_v11 = vld [vmem:[%s8049_s0 + $0xa8] sm:$0xff]  ;;  %v8070_v50 = vmov 683565275  }
   0xc   :  { %v22_v10 = vld [vmem:[%s8049_s0 + $0x20] sm:$0xff]  ;;  %v23_v12 = vld [vmem:[%s8049_s0 + $0x28] sm:$0xff]  ;;  %v40_v13 = vld [vmem:[%s8049_s0 + $0xb0] sm:$0xff]  ;;  %v8059_v52 = vmov 2475754826  }
   0xd   :  { %v24_v14 = vld [vmem:[%s8049_s0 + $0x30] sm:$0xff]  ;;  %v41_v15 = vld [vmem:[%s8049_s0 + $0xb8] sm:$0xff]  ;;  %v42_v17 = vld [vmem:[%s8049_s0 + $0xc0] sm:$0xff]  ;;  %v8080_v56 = vmov 2131351028  }
   0xe   :  { %148 = vperm.xlu1 %4302, %v37_v7   ;;  %68 = vperm.xlu0 %4301, %v21_v8   ;;  %v25_v16 = vld [vmem:[%s8049_s0 + $0x38] sm:$0xff]  ;;  %v26_v18 = vld [vmem:[%s8049_s0 + $0x40] sm:$0xff]  ;;  %v43_v19 = vld [vmem:[%s8049_s0 + $0xc8] sm:$0xff]  ;;  %v8061_v59 = vmov 2102212464  }
   0xf   :  { %v27_v20 = vld [vmem:[%s8049_s0 + $0x48] sm:$0xff]  ;;  %v44_v21 = vld [vmem:[%s8049_s0 + $0xd0] sm:$0xff]  ;;  %v45_v23 = vld [vmem:[%s8049_s0 + $0xd8] sm:$0xff]  ;;  %v8091_v62 = vmov 920167782  }
  0x10   :  { %v28_v22 = vld [vmem:[%s8049_s0 + $0x50] sm:$0xff]  ;;  %v29_v24 = vld [vmem:[%s8049_s0 + $0x58] sm:$0xff]  ;;  %v46_v25 = vld [vmem:[%s8049_s0 + $0xe0] sm:$0xff]  ;;  %v8064_v1 = vmov 1326507024  }
  0x11   :  { %v30_v26 = vld [vmem:[%s8049_s0 + $0x60] sm:$0xff]  ;;  %v47_v27 = vld [vmem:[%s8049_s0 + $0xe8] sm:$0xff]  ;;  %v48_v29 = vld [vmem:[%s8049_s0 + $0xf0] sm:$0xff] }
  0x12   :  { %153 = vperm.xlu1 %4302, %v38_v9   ;;  %73 = vperm.xlu0 %4301, %v22_v10   ;;  %v31_v28 = vld [vmem:[%s8049_s0 + $0x68] sm:$0xff]  ;;  %v32_v30 = vld [vmem:[%s8049_s0 + $0x70] sm:$0xff]  ;;  %v49_v31 = vld [vmem:[%s8049_s0 + $0xf8] sm:$0xff] }
  0x13   :  { %v33_v32 = vld [vmem:[%s8049_s0 + $0x78] sm:$0xff]  ;;  %v4591_v33 = vld [vmem:[%s8050_s1] ss:$0 sm:$0xff] }
  0x16   :  { %158 = vperm.xlu1 %4302, %v39_v11   ;;  %78 = vperm.xlu0 %4301, %v23_v12  }
  0x1a   :  { %163 = vperm.xlu1 %4302, %v40_v13   ;;  %83 = vperm.xlu0 %4301, %v24_v14  }
  0x1e   :  { %168 = vperm.xlu1 %4302, %v41_v15   ;;  %88 = vperm.xlu0 %4301, %v25_v16  }
  0x22   :  { %173 = vperm.xlu1 %4302, %v42_v17   ;;  %93 = vperm.xlu0 %4301, %v26_v18  }
  0x26   :  { %178 = vperm.xlu1 %4302, %v43_v19   ;;  %98 = vperm.xlu0 %4301, %v27_v20  }
  0x2a   :  { %183 = vperm.xlu1 %4302, %v44_v21   ;;  %103 = vperm.xlu0 %4301, %v28_v22  }
  0x2e   :  { %188 = vperm.xlu1 %4302, %v45_v23   ;;  %108 = vperm.xlu0 %4301, %v29_v24  }
  0x32   :  { %193 = vperm.xlu1 %4302, %v46_v25   ;;  %113 = vperm.xlu0 %4301, %v30_v26  }
  0x36   :  { %198 = vperm.xlu1 %4302, %v47_v27   ;;  %118 = vperm.xlu0 %4301, %v31_v28  }
  0x3a   :  { %203 = vperm.xlu1 %4302, %v48_v29   ;;  %123 = vperm.xlu0 %4301, %v32_v30  }
  0x3e   :  { %208 = vperm.xlu1 %4302, %v49_v31   ;;  %128 = vperm.xlu0 %4301, %v33_v32  }
  0x7d   :  { %v59_v34 = vpop.permute.xlu1 %58  ;;  %v54_v3 = vpop.permute.xlu0 %53 }
  0x7e   :  { %v4594_v35 = vmul.f32 %v4591_v33, %v59_v34  ;;  %v4623_v12 = vmul.f32 %v4591_v33, %v54_v3 }
  0x80   :  { %8235 = vst [vmem:[#allocation5_spill] sm:$0xff] %v4594_v35  ;;  %v356_v36 = vand.u32 2139095040, %v4594_v35  ;;  %v8058_v43 = vand.u32 2147483647, %v4594_v35  ;;  %8237 = vst [vmem:[#allocation7_spill] sm:$0xff] %v4623_v12  ;;  %v252_v23 = vand.u32 2139095040, %v4623_v12 }
  0x81   :  { %v139_v37 = vpop.permute.xlu1 %138 }
  0x82   :  { %v357_v38 = vshrl.u32 %v356_v36, 23  ;;  %v4598_v39 = vmul.f32 %v4591_v33, %v139_v37  ;;  %v360_v47 = vand.u32 8388607, %v8058_v43  ;;  %v253_v30 = vshrl.u32 %v252_v23, 23 }
  0x84   :  { %8236 = vst [vmem:[#allocation6_spill] sm:$0xff] %v4598_v39  ;;  %v3878_v40 = vadd.s32 4294967169, %v357_v38  ;;  %v2020_v41 = vand.u32 2139095040, %v4598_v39  ;;  %v361_v4 = vor.u32 8388608, %v360_v47  ;;  %v8057_v34 = vand.u32 2147483647, %v4598_v39 }
  0x86   :  { %v363_v42 = vadd.s32 1, %v3878_v40  ;;  %v2021_v45 = vshrl.u32 %v2020_v41, 23  ;;  %v401_v18 = vshll.u32 %v361_v4, 8  ;;  %v3874_v4 = vadd.s32 4294967169, %v253_v30 }
  0x88   :  { %vm364_vm0 = vcmp.gt.s32.totalorder %v363_v42, 0  ;;  %v3942_v54 = vadd.s32 4294967169, %v2021_v45 }
  0x89   :  { %v365_v44 = vsel %vm364_vm0, %v363_v42, 0 }
  0x8a   :  { %v367_v46 = vand.u32 31, %v365_v44  ;;  %v4604_v49 = vshrl.u32 %v365_v44, 5  ;;  %v2027_v15 = vadd.s32 1, %v3942_v54 }
  0x8c   :  { %v368_v48 = vsub.s32 32, %v367_v46  ;;  %v370_v51 = vshll.u32 %v8070_v50, %v367_v46  ;;  %v373_v53 = vshll.u32 %v8059_v52, %v367_v46  ;;  %v376_v58 = vshll.u32 %v8080_v56, %v367_v46 }
  0x8d   :  { %v379_v61 = vshll.u32 %v8061_v59, %v367_v46  ;;  %v382_v0 = vshll.u32 %v8091_v62, %v367_v46  ;;  %vm385_vm1 = vcmp.lt.s32.totalorder %v4604_v49, 1  ;;  %vm388_vm2 = vcmp.lt.s32.totalorder %v4604_v49, 4 }
  0x8e   :  { %v371_v55 = vshrl.u32 %v8059_v52, %v368_v48  ;;  %v374_v57 = vshrl.u32 %v8080_v56, %v368_v48  ;;  %v377_v60 = vshrl.u32 %v8061_v59, %v368_v48  ;;  %v380_v63 = vshrl.u32 %v8091_v62, %v368_v48 }
  0x8f   :  { %v383_v2 = vshrl.u32 %v8064_v1, %v368_v48  ;;  %vm387_vm3 = vcmp.lt.s32.totalorder %v4604_v49, 3  ;;  %vm386_vm4 = vcmp.lt.s32.totalorder %v4604_v49, 2  ;;  %vm2028_vm5 = vcmp.gt.s32.totalorder %v2027_v15, 0 }
  0x90   :  { %v372_v5 = vor.u32 %v371_v55, %v370_v51  ;;  %v375_v6 = vor.u32 %v374_v57, %v373_v53  ;;  %v378_v7 = vor.u32 %v377_v60, %v376_v58  ;;  %v381_v8 = vor.u32 %v380_v63, %v379_v61 }
  0x91   :  { %v384_v9 = vor.u32 %v383_v2, %v382_v0  ;;  %v2029_v27 = vsel %vm2028_vm5, %v2027_v15, 0  ;;  %v369_v28 = vshrl.u32 %v8070_v50, %v368_v48  ;;  %v2024_v55 = vand.u32 8388607, %v8057_v34  ;;  %v144_v0 = vpop.permute.xlu1 %143  ;;  %v134_v2 = vpop.permute.xlu0 %133 }
  0x92   :  { %v393_v10 = vsel %vm385_vm1, %v372_v5, %v375_v6  ;;  %v397_v11 = vsel %vm385_vm1, %v375_v6, %v378_v7  ;;  %v394_v13 = vsel %vm388_vm2, %v381_v8, 920167782  ;;  %v390_v26 = vsel %vm388_vm2, %v378_v7, 2102212464 }
  0x93   :  { %v398_v14 = vsel %vm388_vm2, %v384_v9, 1326507024  ;;  %v395_v16 = vsel %vm387_vm3, %v378_v7, %v394_v13  ;;  %v2031_v29 = vand.u32 31, %v2029_v27  ;;  %v389_v31 = vsel %vm385_vm1, %v369_v28, %v372_v5 }
  0x94   :  { %v399_v17 = vsel %vm387_vm3, %v381_v8, %v398_v14  ;;  %v396_v19 = vsel %vm386_vm4, %v393_v10, %v395_v16  ;;  %v391_v32 = vsel %vm387_vm3, %v375_v6, %v390_v26  ;;  %v4656_v38 = vshrl.u32 %v2029_v27, 5 }
  0x95   :  { %v400_v20 = vsel %vm386_vm4, %v397_v11, %v399_v17  ;;  %v4639_v21 = vmul.u32.u64.low %v401_v18, %v396_v19  ;;  %v4640_v22 = vmul.u32.u64.high %v401_v18, %v396_v19, %v4639_v21  ;;  %v2032_v36 = vsub.s32 32, %v2031_v29  ;;  %v64_v23 = vpop.permute.xlu0 %63 }
  0x96   :  { %v4644_v24 = vmul.u32.u64.low %v401_v18, %v400_v20  ;;  %v4645_v25 = vmul.u32.u64.high %v401_v18, %v400_v20, %v4644_v24  ;;  %v2034_v40 = vshll.u32 %v8070_v50, %v2031_v29  ;;  %v2037_v41 = vshll.u32 %v8059_v52, %v2031_v29 }
  0x97   :  { %v411_v37 = vadd.s32 1, %v4640_v22  ;;  %v2035_v42 = vshrl.u32 %v8059_v52, %v2032_v36  ;;  %v2038_v44 = vshrl.u32 %v8080_v56, %v2032_v36  ;;  %v2040_v45 = vshll.u32 %v8080_v56, %v2031_v29 }
  0x98   :  { %v2043_v46 = vshll.u32 %v8061_v59, %v2031_v29  ;;  %v2041_v47 = vshrl.u32 %v8061_v59, %v2032_v36  ;;  %v2044_v48 = vshrl.u32 %v8091_v62, %v2032_v36  ;;  %v2046_v51 = vshll.u32 %v8091_v62, %v2031_v29 }
  0x99   :  { %v2047_v53 = vshrl.u32 %v8064_v1, %v2032_v36  ;;  %v392_v54 = vsel %vm386_vm4, %v389_v31, %v391_v32  ;;  %vm410_vm6 = vc.u32 %v4645_v25, %v4639_v21  ;;  %v2036_v57 = vor.u32 %v2035_v42, %v2034_v40 }
  0x9a   :  { %v2039_v58 = vor.u32 %v2038_v44, %v2037_v41  ;;  %v2042_v60 = vor.u32 %v2041_v47, %v2040_v45  ;;  %v2045_v61 = vor.u32 %v2044_v48, %v2043_v46  ;;  %vm2052_vm7 = vcmp.lt.s32.totalorder %v4656_v38, 4  ;;  %v149_v47 = vpop.permute.xlu1 %148 }
  0x9b   :  { %v2048_v63 = vor.u32 %v2047_v53, %v2046_v51  ;;  %v412_v3 = vsel %vm410_vm6, %v411_v37, %v4640_v22  ;;  %v408_v6 = vmul.u32 %v401_v18, %v392_v54  ;;  %vm2049_vm8 = vcmp.lt.s32.totalorder %v4656_v38, 1 }
  0x9c   :  { %v2058_v49 = vsel %vm2052_vm7, %v2045_v61, 920167782  ;;  %vm2051_vm9 = vcmp.lt.s32.totalorder %v4656_v38, 3  ;;  %v4683_v7 = vmul.f32 %v4591_v33, %v144_v0  ;;  %v2025_v8 = vor.u32 8388608, %v2024_v55 }
  0x9d   :  { %v2062_v5 = vsel %vm2052_vm7, %v2048_v63, 1326507024  ;;  %v2057_v9 = vsel %vm2049_vm8, %v2036_v57, %v2039_v58  ;;  %v2059_v10 = vsel %vm2051_vm9, %v2042_v60, %v2058_v49  ;;  %v4690_v11 = vmul.f32 %v4591_v33, %v134_v2 }
  0x9e   :  { %8238 = vst [vmem:[#allocation8_spill] sm:$0xff] %v4683_v7  ;;  %v413_v13 = vadd.s32 %v412_v3, %v408_v6  ;;  %v2061_v14 = vsel %vm2049_vm8, %v2039_v58, %v2042_v60  ;;  %v2063_v15 = vsel %vm2051_vm9, %v2045_v61, %v2062_v5  ;;  %vm2050_vm10 = vcmp.lt.s32.totalorder %v4656_v38, 2 }
  0x9f   :  { %8239 = vst [vmem:[#allocation9_spill] sm:$0xff] %v4690_v11  ;;  %v259_v16 = vadd.s32 1, %v3874_v4  ;;  %v2060_v17 = vsel %vm2050_vm10, %v2057_v9, %v2059_v10  ;;  %v2124_v18 = vand.u32 2139095040, %v4683_v7  ;;  %v2064_v19 = vsel %vm2050_vm10, %v2061_v14, %v2063_v15 }
  0xa0   :  { %v2065_v20 = vshll.u32 %v2025_v8, 8  ;;  %v1916_v22 = vand.u32 2139095040, %v4690_v11  ;;  %v414_v24 = vadd.s32 536870912, %v413_v13  ;;  %v4711_v31 = vmul.f32 %v4591_v33, %v64_v23 }
  0xa1   :  { %v2125_v28 = vshrl.u32 %v2124_v18, 23  ;;  %vm260_vm11 = vcmp.gt.s32.totalorder %v259_v16, 0  ;;  %v2033_v44 = vshrl.u32 %v8070_v50, %v2032_v36  ;;  %v2054_v45 = vsel %vm2052_vm7, %v2042_v60, 2102212464 }
  0xa2   :  { %v4703_v26 = vmul.u32.u64.low %v2065_v20, %v2060_v17  ;;  %v4704_v27 = vmul.u32.u64.high %v2065_v20, %v2060_v17, %v4703_v26  ;;  %v4707_v29 = vmul.u32.u64.low %v2065_v20, %v2064_v19  ;;  %v4708_v30 = vmul.u32.u64.high %v2065_v20, %v2064_v19, %v4707_v29  ;;  %8240 = vst [vmem:[#allocation10_spill] sm:$0xff] %v4711_v31 }
  0xa3   :  { %v1917_v32 = vshrl.u32 %v1916_v22, 23  ;;  %v3946_v37 = vadd.s32 4294967169, %v2125_v28  ;;  %v4713_v40 = vshrl.u32 %v414_v24, 30  ;;  %v261_v41 = vsel %vm260_vm11, %v259_v16, 0 }
  0xa4   :  { %v460_v46 = vand.u32 2139095040, %v4711_v31  ;;  %v4720_v53 = vand.u32 31, %v261_v41  ;;  %v2053_v54 = vsel %vm2049_vm8, %v2033_v44, %v2036_v57  ;;  %v8055_v55 = vand.u32 2147483647, %v4683_v7 }
  0xa5   :  { %8241 = vst [vmem:[#allocation11_spill] sm:$0xff] %v4713_v40  ;;  %v2131_v42 = vadd.s32 1, %v3946_v37  ;;  %v3938_v48 = vadd.s32 4294967169, %v1917_v32  ;;  %v416_v51 = vshll.u32 %v4713_v40, 30  ;;  %v2055_v36 = vsel %vm2051_vm9, %v2039_v58, %v2054_v45 }
  0xa6   :  { %8242 = vst [vmem:[#allocation12_spill] sm:$0xff] %v4720_v53  ;;  %v2075_v61 = vadd.s32 1, %v4704_v27  ;;  %v4729_v63 = vmul.f32 %v4591_v33, %v149_v47  ;;  %vm2074_vm13 = vc.u32 %v4708_v30, %v4703_v26  ;;  %v461_v0 = vshrl.u32 %v460_v46, 23 }
  0xa7   :  { %vm2132_vm12 = vcmp.gt.s32.totalorder %v2131_v42, 0  ;;  %v4733_v2 = vshrl.u32 %v261_v41, 5  ;;  %v4735_v4 = vsub.s32 %v413_v13, %v416_v51  ;;  %v4738_v57 = vsub.s32 32, %v4720_v53 }
  0xa8   :  { %v2133_v60 = vsel %vm2132_vm12, %v2131_v42, 0  ;;  %8243 = vst [vmem:[#allocation13_spill] sm:$0xff] %v4729_v63  ;;  %v2056_v58 = vsel %vm2050_vm10, %v2053_v54, %v2055_v36  ;;  %v4742_v49 = vadd.s32 1, %v3938_v48  ;;  %v2076_v5 = vsel %vm2074_vm13, %v2075_v61, %v4704_v27 }
  0xa9   :  { %8244 = vst [vmem:[#allocation14_spill] sm:$0xff] %v4733_v2  ;;  %v2135_v3 = vand.u32 31, %v2133_v60  ;;  %8245 = vst [vmem:[#allocation15_spill] sm:$0xff] %v4738_v57  ;;  %v2128_v6 = vand.u32 8388607, %v8055_v55  ;;  %v2228_v9 = vand.u32 2139095040, %v4729_v63  ;;  %v2072_v19 = vmul.u32 %v2065_v20, %v2056_v58 }
  0xaa   :  { %v4748_v10 = vshrl.u32 %v2133_v60, 5  ;;  %v3882_v15 = vadd.s32 4294967169, %v461_v0  ;;  %vm1924_vm14 = vcmp.gt.s32.totalorder %v4742_v49, 0  ;;  %v419_v46 = vsub.s32 0, %v4735_v4 }
  0xab   :  { %v2136_v8 = vsub.s32 32, %v2135_v3  ;;  %v2138_v13 = vshll.u32 %v8070_v50, %v2135_v3  ;;  %v2141_v14 = vshll.u32 %v8059_v52, %v2135_v3  ;;  %v2144_v17 = vshll.u32 %v8080_v56, %v2135_v3 }
  0xac   :  { %v2147_v22 = vshll.u32 %v8061_v59, %v2135_v3  ;;  %v2150_v24 = vshll.u32 %v8091_v62, %v2135_v3  ;;  %v4760_v37 = vadd.s32 %v2076_v5, %v2072_v19  ;;  %v2229_v42 = vshrl.u32 %v2228_v9, 23 }
  0xad   :  { %v2139_v38 = vshrl.u32 %v8059_v52, %v2136_v8  ;;  %v2142_v16 = vshrl.u32 %v8080_v56, %v2136_v8  ;;  %v2145_v18 = vshrl.u32 %v8061_v59, %v2136_v8  ;;  %v2148_v23 = vshrl.u32 %v8091_v62, %v2136_v8 }
  0xae   :  { %v2151_v32 = vshrl.u32 %v8064_v1, %v2136_v8  ;;  %v2129_v44 = vor.u32 8388608, %v2128_v6  ;;  %vm2153_vm15 = vcmp.lt.s32.totalorder %v4748_v10, 1  ;;  %v467_v20 = vadd.s32 1, %v3882_v15 }
  0xaf   :  { %v2140_v27 = vor.u32 %v2139_v38, %v2138_v13  ;;  %v2143_v28 = vor.u32 %v2142_v16, %v2141_v14  ;;  %v2146_v29 = vor.u32 %v2145_v18, %v2144_v17  ;;  %v2149_v41 = vor.u32 %v2148_v23, %v2147_v22 }
  0xb0   :  { %v2152_v45 = vor.u32 %v2151_v32, %v2150_v24  ;;  %vm2156_vm0 = vcmp.lt.s32.totalorder %v4748_v10, 4  ;;  %v8056_v48 = vand.u32 2147483647, %v4711_v31  ;;  %vm2155_vm1 = vcmp.lt.s32.totalorder %v4748_v10, 3 }
  0xb1   :  { %v2161_v47 = vsel %vm2153_vm15, %v2140_v27, %v2143_v28  ;;  %v2162_v51 = vsel %vm2156_vm0, %v2149_v41, 920167782  ;;  %v2165_v54 = vsel %vm2153_vm15, %v2143_v28, %v2146_v29  ;;  %v2078_v61 = vadd.s32 536870912, %v4760_v37 }
  0xb2   :  { %v2166_v36 = vsel %vm2156_vm0, %v2152_v45, 1326507024  ;;  %vm2154_vm2 = vcmp.lt.s32.totalorder %v4748_v10, 2  ;;  %v2163_v60 = vsel %vm2155_vm1, %v2146_v29, %v2162_v51  ;;  %v3950_v0 = vadd.s32 4294967169, %v2229_v42 }
  0xb3   :  { %v2164_v3 = vsel %vm2154_vm2, %v2161_v47, %v2163_v60  ;;  %v2167_v58 = vsel %vm2155_vm1, %v2149_v41, %v2166_v36  ;;  %v2169_v5 = vshll.u32 %v2129_v44, 8  ;;  %vm468_vm3 = vcmp.gt.s32.totalorder %v467_v20, 0 }
  0xb4   :  { %v3879_v6 = vmin.u32 %v419_v46, %v4735_v4  ;;  %v2137_v9 = vshrl.u32 %v8070_v50, %v2136_v8  ;;  %v2158_v13 = vsel %vm2156_vm0, %v2146_v29, 2102212464  ;;  %v2168_v14 = vsel %vm2154_vm2, %v2165_v54, %v2167_v58 }
  0xb5   :  { %v4790_v15 = vmul.u32.u64.low %v2169_v5, %v2168_v14  ;;  %v4791_v38 = vmul.u32.u64.high %v2169_v5, %v2168_v14, %v4790_v15  ;;  %v4793_v16 = vmul.u32.u64.low %v2169_v5, %v2164_v3  ;;  %v4794_v17 = vmul.u32.u64.high %v2169_v5, %v2164_v3, %v4793_v16 }
  0xb6   :  { %v4797_v18 = vshrl.u32 %v2078_v61, 30  ;;  %v464_v19 = vand.u32 8388607, %v8056_v48  ;;  %v469_v22 = vsel %vm468_vm3, %v467_v20, 0  ;;  %v2235_v8 = vadd.s32 1, %v3950_v0 }
  0xb7   :  { %v4803_v23 = vshll.u32 %v8061_v59, %v4720_v53  ;;  %v2157_v24 = vsel %vm2153_vm15, %v2137_v9, %v2140_v27  ;;  %v2159_v29 = vsel %vm2155_vm1, %v2143_v28, %v2158_v13  ;;  %v471_v32 = vand.u32 31, %v469_v22 }
  0xb8   :  { %8246 = vst [vmem:[#allocation16_spill] sm:$0xff] %v4797_v18  ;;  %v4811_v41 = vshrl.u32 %v8091_v62, %v4738_v57  ;;  %v4815_v42 = vshll.u32 %v8091_v62, %v4720_v53  ;;  %v4819_v44 = vshrl.u32 %v8064_v1, %v4738_v57  ;;  %v4824_v27 = vsel %vm1924_vm14, %v4742_v49, 0 }
  0xb9   :  { %v421_v45 = vclz %v3879_v6  ;;  %vm2178_vm4 = vc.u32 %v4791_v38, %v4793_v16  ;;  %v2179_v28 = vadd.s32 1, %v4794_v17  ;;  %v472_v20 = vsub.s32 32, %v471_v32 }
  0xba   :  { %v2080_v46 = vshll.u32 %v4797_v18, 30  ;;  %v2160_v47 = vsel %vm2154_vm2, %v2157_v24, %v2159_v29  ;;  %v465_v51 = vor.u32 8388608, %v464_v19  ;;  %vm2236_vm5 = vcmp.gt.s32.totalorder %v2235_v8, 0 }
  0xbb   :  { %v474_v54 = vshll.u32 %v8070_v50, %v471_v32  ;;  %v475_v36 = vshrl.u32 %v8059_v52, %v472_v20  ;;  %v477_v49 = vshll.u32 %v8059_v52, %v471_v32  ;;  %v478_v61 = vshrl.u32 %v8080_v56, %v472_v20 }
  0xbc   :  { %v2180_v60 = vsel %vm2178_vm4, %v2179_v28, %v4794_v17  ;;  %v4837_v0 = vshrl.u32 %v469_v22, 5  ;;  %v480_v3 = vshll.u32 %v8080_v56, %v471_v32  ;;  %v481_v58 = vshrl.u32 %v8061_v59, %v472_v20 }
  0xbd   :  { %v476_v10 = vor.u32 %v475_v36, %v474_v54  ;;  %v479_v6 = vor.u32 %v478_v61, %v477_v49  ;;  %v483_v9 = vshll.u32 %v8061_v59, %v471_v32  ;;  %v484_v13 = vshrl.u32 %v8091_v62, %v472_v20 }
  0xbe   :  { %v4844_v14 = vsub.s32 %v4760_v37, %v2080_v46  ;;  %v2176_v15 = vmul.u32 %v2169_v5, %v2160_v47  ;;  %v8054_v19 = vand.u32 2147483647, %v4729_v63  ;;  %v2237_v17 = vsel %vm2236_vm5, %v2235_v8, 0 }
  0xbf   :  { %v482_v22 = vor.u32 %v481_v58, %v480_v3  ;;  %v485_v24 = vor.u32 %v484_v13, %v483_v9  ;;  %v486_v29 = vshll.u32 %v8091_v62, %v471_v32  ;;  %v487_v28 = vshrl.u32 %v8064_v1, %v472_v20 }
  0xc0   :  { %v3880_v54 = vadd.s32 4294967294, %v421_v45  ;;  %v4850_v36 = vadd.s32 %v2180_v60, %v2176_v15  ;;  %vm489_vm6 = vcmp.lt.s32.totalorder %v4837_v0, 1  ;;  %v4853_v49 = vshll.u32 %v465_v51, 8 }
  0xc1   :  { %v488_v37 = vor.u32 %v487_v28, %v486_v29  ;;  %vm492_vm7 = vcmp.lt.s32.totalorder %v4837_v0, 4  ;;  %v497_v5 = vsel %vm489_vm6, %v476_v10, %v479_v6  ;;  %v2239_v8 = vand.u32 31, %v2237_v17 }
  0xc2   :  { %v2083_v46 = vsub.s32 0, %v4844_v14  ;;  %vm491_vm8 = vcmp.lt.s32.totalorder %v4837_v0, 3  ;;  %v498_v32 = vsel %vm492_vm7, %v485_v24, 920167782  ;;  %v2232_v45 = vand.u32 8388607, %v8054_v19 }
  0xc3   :  { %vm490_vm9 = vcmp.lt.s32.totalorder %v4837_v0, 2  ;;  %v499_v47 = vsel %vm491_vm8, %v482_v22, %v498_v32  ;;  %v501_v51 = vsel %vm489_vm6, %v479_v6, %v482_v22  ;;  %v502_v61 = vsel %vm492_vm7, %v488_v37, 1326507024 }
  0xc4   :  { %vm3881_vm10 = vcmp.lt.s32.totalorder %v3880_v54, 0  ;;  %v2182_v60 = vadd.s32 536870912, %v4850_v36  ;;  %v500_v3 = vsel %vm490_vm9, %v497_v5, %v499_v47  ;;  %v503_v58 = vsel %vm491_vm8, %v485_v24, %v502_v61 }
  0xc5   :  { %v504_v9 = vsel %vm490_vm9, %v501_v51, %v503_v58  ;;  %v4879_v13 = vmul.u32.u64.low %v4853_v49, %v500_v3  ;;  %v4880_v15 = vmul.u32.u64.high %v4853_v49, %v500_v3, %v4879_v13  ;;  %v2240_v29 = vsub.s32 32, %v2239_v8 }
  0xc6   :  { %v3943_v28 = vmin.u32 %v2083_v46, %v4844_v14  ;;  %v4885_v37 = vmul.u32.u64.low %v4853_v49, %v504_v9  ;;  %v4886_v32 = vmul.u32.u64.high %v4853_v49, %v504_v9, %v4885_v37  ;;  %v2233_v19 = vor.u32 8388608, %v2232_v45 }
  0xc7   :  { %v473_v5 = vshrl.u32 %v8070_v50, %v472_v20  ;;  %v494_v24 = vsel %vm492_vm7, %v482_v22, 2102212464  ;;  %v2243_v47 = vshrl.u32 %v8059_v52, %v2240_v29  ;;  %v2246_v51 = vshrl.u32 %v8080_v56, %v2240_v29 }
  0xc8   :  { %v4893_v61 = vshrl.u32 %v2182_v60, 30  ;;  %v2238_v3 = vshrl.u32 %v2237_v17, 5  ;;  %v2242_v58 = vshll.u32 %v8070_v50, %v2239_v8  ;;  %v2249_v46 = vshrl.u32 %v8061_v59, %v2240_v29 }
  0xc9   :  { %v493_v9 = vsel %vm489_vm6, %v473_v5, %v476_v10  ;;  %v2245_v45 = vshll.u32 %v8059_v52, %v2239_v8  ;;  %v2251_v20 = vshll.u32 %v8061_v59, %v2239_v8  ;;  %v2252_v22 = vshrl.u32 %v8091_v62, %v2240_v29  ;;  %v69_v5 = vpop.permute.xlu0 %68 }
  0xca   :  { %8247 = vst [vmem:[#allocation17_spill] sm:$0xff] %v4893_v61  ;;  %v495_v37 = vsel %vm491_vm8, %v479_v6, %v494_v24  ;;  %v515_v60 = vadd.s32 1, %v4880_v15  ;;  %v2244_v55 = vor.u32 %v2243_v47, %v2242_v58  ;;  %v2248_v17 = vshll.u32 %v8080_v56, %v2239_v8 }
  0xcb   :  { %v2247_v48 = vor.u32 %v2246_v51, %v2245_v45  ;;  %v2253_v34 = vor.u32 %v2252_v22, %v2251_v20  ;;  %v2254_v43 = vshll.u32 %v8091_v62, %v2239_v8  ;;  %v2255_v10 = vshrl.u32 %v8064_v1, %v2240_v29 }
  0xcc   :  { %v4910_v52 = vor.u32 %v4811_v41, %v4803_v23  ;;  %v4913_v59 = vand.u32 31, %v4824_v27  ;;  %vm514_vm11 = vc.u32 %v4886_v32, %v4879_v13  ;;  %v2250_v6 = vor.u32 %v2249_v46, %v2248_v17 }
  0xcd   :  { %v424_v24 = vsel %vm3881_vm10, 0, %v3880_v54  ;;  %v496_v47 = vsel %vm490_vm9, %v493_v9, %v495_v37  ;;  %v2256_v8 = vor.u32 %v2255_v10, %v2254_v43  ;;  %v2273_v51 = vshll.u32 %v2233_v19, 8 }
  0xce   :  { %8248 = vst [vmem:[#allocation18_spill] sm:$0xff] %v4910_v52  ;;  %8249 = vst [vmem:[#allocation19_spill] sm:$0xff] %v4913_v59  ;;  %v2085_v58 = vclz %v3943_v28  ;;  %vm2257_vm12 = vcmp.lt.s32.totalorder %v2238_v3, 1  ;;  %vm2260_vm13 = vcmp.lt.s32.totalorder %v2238_v3, 4  ;;  %v4921_v23 = vmul.f32 %v4591_v33, %v69_v5 }
  0xcf   :  { %v2184_v41 = vshll.u32 %v4893_v61, 30  ;;  %v516_v45 = vsel %vm514_vm11, %v515_v60, %v4880_v15  ;;  %v2265_v20 = vsel %vm2257_vm12, %v2244_v55, %v2247_v48  ;;  %v2266_v46 = vsel %vm2260_vm13, %v2253_v34, 920167782 }
  0xd0   :  { %8250 = vst [vmem:[#allocation20_spill] sm:$0xff] %v4921_v23  ;;  %v512_v54 = vmul.u32 %v4853_v49, %v496_v47  ;;  %v2241_v0 = vshrl.u32 %v8070_v50, %v2240_v29  ;;  %vm2259_vm14 = vcmp.lt.s32.totalorder %v2238_v3, 3  ;;  %v2262_v43 = vsel %vm2260_vm13, %v2250_v6, 2102212464 }
  0xd1   :  { %vm2258_vm15 = vcmp.lt.s32.totalorder %v2238_v3, 2  ;;  %v2267_v19 = vsel %vm2259_vm14, %v2250_v6, %v2266_v46  ;;  %v2269_v28 = vsel %vm2257_vm12, %v2247_v48, %v2250_v6  ;;  %v2270_v9 = vsel %vm2260_vm13, %v2256_v8, 1326507024 }
  0xd2   :  { %v3944_v22 = vadd.s32 4294967294, %v2085_v58  ;;  %v4929_v37 = vadd.s32 %v516_v45, %v512_v54  ;;  %v2261_v17 = vsel %vm2257_vm12, %v2241_v0, %v2244_v55  ;;  %v2268_v15 = vsel %vm2258_vm15, %v2265_v20, %v2267_v19 }
  0xd3   :  { %v2263_v60 = vsel %vm2259_vm14, %v2247_v48, %v2262_v43  ;;  %v2271_v10 = vsel %vm2259_vm14, %v2253_v34, %v2270_v9  ;;  %v4933_v5 = vmul.u32.u64.low %v2273_v51, %v2268_v15  ;;  %v4934_v49 = vmul.u32.u64.high %v2273_v51, %v2268_v15, %v4933_v5 }
  0xd4   :  { %v425_v29 = vsub.s32 32, %v424_v24  ;;  %v429_v47 = vsub.s32 4294967266, %v424_v24  ;;  %v280_v46 = vor.u32 %v4819_v44, %v4815_v42  ;;  %v2272_v6 = vsel %vm2258_vm15, %v2269_v28, %v2271_v10  ;;  %v154_v10 = vpop.permute.xlu1 %153 }
  0xd5   :  { %v4941_v8 = vsub.s32 %v4850_v36, %v2184_v41  ;;  %v4943_v58 = vmul.u32.u64.low %v2273_v51, %v2272_v6  ;;  %v4944_v55 = vmul.u32.u64.high %v2273_v51, %v2272_v6, %v4943_v58  ;;  %v564_v48 = vand.u32 2139095040, %v4921_v23 }
  0xd6   :  { %v409_v34 = vadd.s32 %v4639_v21, %v4645_v25  ;;  %vm284_vm0 = vcmp.lt.s32.totalorder %v4733_v2, 4  ;;  %v518_v45 = vadd.s32 536870912, %v4929_v37  ;;  %v2264_v20 = vsel %vm2258_vm15, %v2261_v17, %v2263_v60 }
  0xd7   :  { %vm3945_vm1 = vcmp.lt.s32.totalorder %v3944_v22, 0  ;;  %v4953_v42 = vsub.s32 32, %v4913_v59  ;;  %v2283_v44 = vadd.s32 1, %v4934_v49  ;;  %v565_v36 = vshrl.u32 %v564_v48, 23 }
  0xd8   :  { %v427_v41 = vshrl.u32 %v409_v34, %v425_v29  ;;  %v430_v54 = vadd.s32 127, %v429_v47  ;;  %v4959_v0 = vsel %vm284_vm0, %v4910_v52, 920167782  ;;  %v2187_v21 = vsub.s32 0, %v4941_v8 }
  0xd9   :  { %8251 = vst [vmem:[#allocation21_spill] sm:$0xff] %v4953_v42  ;;  %8252 = vst [vmem:[#allocation22_spill] sm:$0xff] %v4959_v0  ;;  %v2280_v25 = vmul.u32 %v2273_v51, %v2264_v20  ;;  %vm2282_vm2 = vc.u32 %v4944_v55, %v4933_v5  ;;  %v3886_v3 = vadd.s32 4294967169, %v565_v36  ;;  %v426_v43 = vshll.u32 %v4735_v4, %v424_v24 }
  0xda   :  { %v4965_v19 = vsel %vm3945_vm1, 0, %v3944_v22  ;;  %v4967_v28 = vshrl.u32 %v518_v45, 30  ;;  %v2284_v9 = vsel %vm2282_vm2, %v2283_v44, %v4934_v49  ;;  %v4972_v17 = vsel %vm284_vm0, %v280_v46, 1326507024 }
  0xdb   :  { %8254 = vst [vmem:[#allocation24_spill] sm:$0xff] %v4972_v17  ;;  %v1940_v15 = vshrl.u32 %v8091_v62, %v4953_v42  ;;  %v2285_v51 = vadd.s32 %v2284_v9, %v2280_v25  ;;  %v571_v60 = vadd.s32 1, %v3886_v3  ;;  %v4976_v29 = vor.u32 %v427_v41, %v426_v43 }
  0xdc   :  { %8253 = vst [vmem:[#allocation23_spill] sm:$0xff] %v4967_v28  ;;  %v431_v47 = vshll.u32 %v430_v54, 23  ;;  %v4979_v4 = vshrl.u32 %v4824_v27, 5  ;;  %v8256_v24 = vmov 2102212464   ;;  %v2093_v49 = vsub.s32 4294967266, %v4965_v19 }
  0xdd   :  { %v1939_v22 = vshll.u32 %v8256_v24, %v4913_v59  ;;  %v3947_v46 = vmin.u32 %v2187_v21, %v4941_v8  ;;  %v8063_v6 = vand.u32 2147483647, %v4921_v23  ;;  %vm572_vm3 = vcmp.gt.s32.totalorder %v571_v60, 0 }
  0xde   :  { %8255 = vst [vmem:[#allocation25_spill] sm:$0xff] %v4979_v4  ;;  %v520_v58 = vshll.u32 %v4967_v28, 30  ;;  %v2286_v48 = vadd.s32 536870912, %v2285_v51  ;;  %v573_v34 = vsel %vm572_vm3, %v571_v60, 0  ;;  %v4988_v45 = vmul.f32 %v4591_v33, %v154_v10 }
  0xdf   :  { %v4990_v20 = vor.u32 %v1940_v15, %v1939_v22  ;;  %v4994_v27 = vshll.u32 %v8091_v62, %v4913_v59  ;;  %v4998_v44 = vshrl.u32 %v8064_v1, %v4953_v42  ;;  %v575_v36 = vand.u32 31, %v573_v34 }
  0xe0   :  { %8257 = vst [vmem:[#allocation26_spill] sm:$0xff] %v4988_v45  ;;  %v432_v41 = vor.u32 4788187, %v431_v47  ;;  %v435_v54 = vcvt.s32.f32 %v4976_v29  ;;  %v2073_v21 = vadd.s32 %v4703_v26, %v4708_v30  ;;  %v2089_v25 = vsub.s32 32, %v4965_v19 }
  0xe1   :  { %8258 = vst [vmem:[#allocation27_spill] sm:$0xff] %v4990_v20  ;;  %v2094_v3 = vadd.s32 127, %v2093_v49  ;;  %v2189_v43 = vclz %v3947_v46  ;;  %v568_v9 = vand.u32 8388607, %v8063_v6  ;;  %v576_v15 = vsub.s32 32, %v575_v36 }
  0xe2   :  { %v5007_v60 = vsub.s32 %v4929_v37, %v520_v58  ;;  %v5009_v10 = vshrl.u32 %v2286_v48, 30  ;;  %v5011_v22 = vshrl.u32 %v573_v34, 5  ;;  %v2332_v29 = vand.u32 2139095040, %v4988_v45 }
  0xe3   :  { %v578_v47 = vshll.u32 %v8070_v50, %v575_v36  ;;  %v8260_v26 = vmov 2475754826   ;;  %v582_v46 = vshrl.u32 %v8080_v56, %v576_v15  ;;  %v584_v6 = vshll.u32 %v8080_v56, %v575_v36 }
  0xe4   :  { %8259 = vst [vmem:[#allocation28_spill] sm:$0xff] %v5009_v10  ;;  %v579_v30 = vshrl.u32 %v8260_v26, %v576_v15  ;;  %v581_v49 = vshll.u32 %v8260_v26, %v575_v36  ;;  %v585_v1 = vshrl.u32 %v8256_v24, %v576_v15  ;;  %v587_v37 = vshll.u32 %v8256_v24, %v575_v36 }
  0xe5   :  { %v588_v58 = vshrl.u32 %v8091_v62, %v576_v15  ;;  %v433_v48 = vand.u32 2147483647, %v432_v41  ;;  %v569_v34 = vor.u32 8388608, %v568_v9  ;;  %v2090_v50 = vshll.u32 %v4844_v14, %v4965_v19  ;;  %v74_v19 = vpop.permute.xlu0 %73 }
  0xe6   :  { %v580_v61 = vor.u32 %v579_v30, %v578_v47  ;;  %v583_v28 = vor.u32 %v582_v46, %v581_v49  ;;  %v2288_v18 = vshll.u32 %v5009_v10, 30  ;;  %v586_v59 = vor.u32 %v585_v1, %v584_v6 }
  0xe7   :  { %v589_v42 = vor.u32 %v588_v58, %v587_v37  ;;  %v2091_v11 = vshrl.u32 %v2073_v21, %v2089_v25  ;;  %v590_v56 = vshll.u32 %v8091_v62, %v575_v36  ;;  %v8261_v40 = vmov 1326507024  }
  0xe8   :  { %v591_v52 = vshrl.u32 %v8261_v40, %v576_v15  ;;  %v2333_v17 = vshrl.u32 %v2332_v29, 23  ;;  %v2095_v0 = vshll.u32 %v2094_v3, 23  ;;  %vm1948_vm4 = vcmp.lt.s32.totalorder %v4979_v4, 4 }
  0xe9   :  { %v3948_v41 = vadd.s32 4294967294, %v2189_v43  ;;  %v523_v9 = vsub.s32 0, %v5007_v60  ;;  %vm593_vm5 = vcmp.lt.s32.totalorder %v5011_v22, 1  ;;  %vm596_vm6 = vcmp.lt.s32.totalorder %v5011_v22, 4 }
  0xea   :  { %v592_v47 = vor.u32 %v591_v52, %v590_v56  ;;  %v601_v1 = vsel %vm593_vm5, %v580_v61, %v583_v28  ;;  %v5033_v14 = vshll.u32 %v569_v34, 8  ;;  %v5035_v6 = vsub.s32 %v2285_v51, %v2288_v18 }
  0xeb   :  { %vm595_vm7 = vcmp.lt.s32.totalorder %v5011_v22, 3  ;;  %v602_v36 = vsel %vm596_vm6, %v589_v42, 920167782  ;;  %v605_v21 = vsel %vm593_vm5, %v583_v28, %v586_v59  ;;  %vm594_vm8 = vcmp.lt.s32.totalorder %v5011_v22, 2 }
  0xec   :  { %v603_v52 = vsel %vm595_vm7, %v586_v59, %v602_v36  ;;  %v606_v56 = vsel %vm596_vm6, %v592_v47, 1326507024  ;;  %v3954_v25 = vadd.s32 4294967169, %v2333_v17  ;;  %v8085_v3 = vand.u32 2147483647, %v4988_v45 }
  0xed   :  { %v604_v18 = vsel %vm594_vm8, %v601_v1, %v603_v52  ;;  %v607_v51 = vsel %vm595_vm7, %v589_v42, %v606_v56  ;;  %v5053_v43 = vmul.f32 %v4591_v33, %v74_v19  ;;  %v598_v29 = vsel %vm596_vm6, %v586_v59, 2102212464 }
  0xee   :  { %v608_v30 = vsel %vm594_vm8, %v605_v21, %v607_v51  ;;  %v5060_v49 = vmul.u32.u64.low %v5033_v14, %v604_v18  ;;  %v5061_v17 = vmul.u32.u64.high %v5033_v14, %v604_v18, %v5060_v49  ;;  %v2291_v46 = vsub.s32 0, %v5035_v6 }
  0xef   :  { %8262 = vst [vmem:[#allocation29_spill] sm:$0xff] %v5053_v43  ;;  %v8263_v37 = vmov 683565275   ;;  %v5067_v58 = vmul.u32.u64.low %v5033_v14, %v608_v30  ;;  %v5068_v34 = vmul.u32.u64.high %v5033_v14, %v608_v30, %v5067_v58  ;;  %v5070_v33 = vmul.f32 %v435_v54, %v433_v48 }
  0xf0   :  { %v577_v42 = vshrl.u32 %v8263_v37, %v576_v15  ;;  %v1944_v59 = vor.u32 %v4998_v44, %v4994_v27  ;;  %vm3949_vm9 = vcmp.lt.s32.totalorder %v3948_v41, 0  ;;  %v2339_v47 = vadd.s32 1, %v3954_v25 }
  0xf1   :  { %v5074_v1 = vor.u32 %v2091_v11, %v2090_v50  ;;  %v5076_v19 = vor.u32 4788187, %v2095_v0  ;;  %v599_v15 = vsel %vm595_vm7, %v583_v28, %v598_v29  ;;  %v5085_v54 = vsel %vm1948_vm4, %v4990_v20, 920167782 }
  0xf2   :  { %v597_v36 = vsel %vm593_vm5, %v577_v42, %v580_v61  ;;  %8264 = vst [vmem:[#allocation30_spill] sm:$0xff] %v5085_v54  ;;  %v3883_v48 = vmin.u32 %v523_v9, %v5007_v60  ;;  %v2336_v27 = vand.u32 8388607, %v8085_v3  ;;  %vm2340_vm10 = vcmp.gt.s32.totalorder %v2339_v47, 0 }
  0xf3   :  { %v5090_v50 = vsel %vm3949_vm9, 0, %v3948_v41  ;;  %v3951_v11 = vmin.u32 %v2291_v46, %v5035_v6  ;;  %v2341_v0 = vsel %vm2340_vm10, %v2339_v47, 0  ;;  %v668_v61 = vand.u32 2139095040, %v5053_v43 }
  0xf4   :  { %v5097_v44 = vsel %vm1948_vm4, %v1944_v59, 1326507024  ;;  %v600_v9 = vsel %vm594_vm8, %v597_v36, %v599_v15  ;;  %v619_v21 = vadd.s32 1, %v5061_v17  ;;  %v2097_v52 = vand.u32 2147483647, %v5076_v19 }
  0xf5   :  { %8265 = vst [vmem:[#allocation31_spill] sm:$0xff] %v5097_v44  ;;  %v2099_v41 = vcvt.s32.f32 %v5074_v1  ;;  %vm618_vm11 = vc.u32 %v5068_v34, %v5060_v49  ;;  %v2343_v56 = vand.u32 31, %v2341_v0  ;;  %v2197_v18 = vsub.s32 4294967266, %v5090_v50 }
  0xf6   :  { %v525_v51 = vclz %v3883_v48  ;;  %v2337_v29 = vor.u32 8388608, %v2336_v27  ;;  %v2293_v30 = vclz %v3951_v11  ;;  %v616_v22 = vmul.u32 %v5033_v14, %v600_v9 }
  0xf7   :  { %v2344_v46 = vsub.s32 32, %v2343_v56  ;;  %v669_v42 = vshrl.u32 %v668_v61, 23  ;;  %v620_v58 = vsel %vm618_vm11, %v619_v21, %v5061_v17  ;;  %v2342_v59 = vshrl.u32 %v2341_v0, 5 }
  0xf8   :  { %v2346_v47 = vshll.u32 %v8263_v37, %v2343_v56  ;;  %v2349_v1 = vshll.u32 %v8260_v26, %v2343_v56  ;;  %v8266_v36 = vmov 2131351028   ;;  %v2355_v48 = vshll.u32 %v8256_v24, %v2343_v56 }
  0xf9   :  { %v2347_v19 = vshrl.u32 %v8260_v26, %v2344_v46  ;;  %v2350_v15 = vshrl.u32 %v8266_v36, %v2344_v46  ;;  %v2352_v3 = vshll.u32 %v8266_v36, %v2343_v56  ;;  %v2353_v27 = vshrl.u32 %v8256_v24, %v2344_v46 }
  0xfa   :  { %v2356_v14 = vshrl.u32 %v8091_v62, %v2344_v46  ;;  %v2358_v11 = vshll.u32 %v8091_v62, %v2343_v56  ;;  %v2359_v17 = vshrl.u32 %v8261_v40, %v2344_v46  ;;  %v5120_v0 = vadd.s32 %v620_v58, %v616_v22 }
  0xfb   :  { %v2348_v61 = vor.u32 %v2347_v19, %v2346_v47  ;;  %v2351_v9 = vor.u32 %v2350_v15, %v2349_v1  ;;  %v3890_v21 = vadd.s32 4294967169, %v669_v42  ;;  %v2354_v28 = vor.u32 %v2353_v27, %v2352_v3 }
  0xfc   :  { %v2357_v25 = vor.u32 %v2356_v14, %v2355_v48  ;;  %v2360_v10 = vor.u32 %v2359_v17, %v2358_v11  ;;  %vm2361_vm12 = vcmp.lt.s32.totalorder %v2342_v59, 1  ;;  %v3884_v54 = vadd.s32 4294967294, %v525_v51  ;;  %v159_v17 = vpop.permute.xlu1 %158 }
  0xfd   :  { %v3952_v20 = vadd.s32 4294967294, %v2293_v30  ;;  %vm2364_vm13 = vcmp.lt.s32.totalorder %v2342_v59, 4  ;;  %v2369_v44 = vsel %vm2361_vm12, %v2348_v61, %v2351_v9  ;;  %vm2363_vm14 = vcmp.lt.s32.totalorder %v2342_v59, 3 }
  0xfe   :  { %v2370_v4 = vsel %vm2364_vm13, %v2357_v25, 920167782  ;;  %v2373_v56 = vsel %vm2361_vm12, %v2351_v9, %v2354_v28  ;;  %v2377_v62 = vshll.u32 %v2337_v29, 8  ;;  %v622_v22 = vadd.s32 536870912, %v5120_v0 }
  0xff   :  { %vm2362_vm15 = vcmp.lt.s32.totalorder %v2342_v59, 2  ;;  %v2371_v58 = vsel %vm2363_vm14, %v2354_v28, %v2370_v4  ;;  %v2374_v42 = vsel %vm2364_vm13, %v2360_v10, 1326507024  ;;  %v2366_v3 = vsel %vm2364_vm13, %v2354_v28, 2102212464 }
 0x100   :  { %v2372_v47 = vsel %vm2362_vm15, %v2369_v44, %v2371_v58  ;;  %v2375_v51 = vsel %vm2363_vm14, %v2357_v25, %v2374_v42  ;;  %v675_v30 = vadd.s32 1, %v3890_v21  ;;  %v2345_v1 = vshrl.u32 %v8263_v37, %v2344_v46 }
 0x101   :  { %v2376_v19 = vsel %vm2362_vm15, %v2373_v56, %v2375_v51  ;;  %v5130_v15 = vmul.u32.u64.low %v2377_v62, %v2372_v47  ;;  %v5131_v48 = vmul.u32.u64.high %v2377_v62, %v2372_v47, %v5130_v15  ;;  %vm3885_vm1 = vcmp.lt.s32.totalorder %v3884_v54, 0 }
 0x102   :  { %v5134_v29 = vmul.u32.u64.low %v2377_v62, %v2376_v19  ;;  %v5135_v27 = vmul.u32.u64.high %v2377_v62, %v2376_v19, %v5134_v29  ;;  %vm676_vm2 = vcmp.gt.s32.totalorder %v675_v30, 0  ;;  %v2198_v4 = vadd.s32 127, %v2197_v18 }
 0x103   :  { %v2365_v10 = vsel %vm2361_vm12, %v2345_v1, %v2348_v61  ;;  %v2367_v28 = vsel %vm2363_vm14, %v2351_v9, %v2366_v3  ;;  %v677_v44 = vsel %vm676_vm2, %v675_v30, 0  ;;  %v5139_v25 = vmul.f32 %v2099_v41, %v2097_v52 }
 0x104   :  { %v2177_v46 = vadd.s32 %v4793_v16, %v4791_v38  ;;  %v8093_v14 = vand.u32 2147483647, %v5053_v43  ;;  %v679_v11 = vand.u32 31, %v677_v44  ;;  %v5144_v21 = vsel %vm3885_vm1, 0, %v3884_v54 }
 0x105   :  { %vm3953_vm3 = vcmp.lt.s32.totalorder %v3952_v20, 0  ;;  %v5146_v56 = vshrl.u32 %v622_v22, 30  ;;  %v2387_v18 = vadd.s32 1, %v5131_v48  ;;  %v5151_v61 = vadd.s32 %v4879_v13, %v4886_v32  ;;  %v5165_v22 = vld [vmem:[%s8050_s1] ss:$0 sm:$0xff] }
 0x106   :  { %v2368_v52 = vsel %vm2362_vm15, %v2365_v10, %v2367_v28  ;;  %vm2386_vm5 = vc.u32 %v5135_v27, %v5130_v15  ;;  %v5156_v38 = vsub.s32 32, %v679_v11  ;;  %v2194_v16 = vshll.u32 %v4941_v8, %v5090_v50 }
 0x107   :  { %8267 = vst [vmem:[#allocation32_spill] sm:$0xff] %v5146_v56  ;;  %v8268_v54 = vsub.s32 32, %v5090_v50  ;;  %v2199_v9 = vshll.u32 %v2198_v4, 23  ;;  %v5168_v13 = vmul.f32 %v5165_v22, %v159_v17  ;;  %v533_v32 = vsub.s32 4294967266, %v5144_v21 }
 0x108   :  { %v5171_v59 = vsel %vm3953_vm3, 0, %v3952_v20  ;;  %v2388_v58 = vsel %vm2386_vm5, %v2387_v18, %v5131_v48  ;;  %v683_v8 = vshrl.u32 %v8260_v26, %v5156_v38  ;;  %v624_v50 = vshll.u32 %v5146_v56, 30 }
 0x109   :  { %v2195_v41 = vshrl.u32 %v2177_v46, %v8268_v54  ;;  %8269 = vst [vmem:[#allocation33_spill] sm:$0xff] %v5168_v13  ;;  %v2384_v42 = vmul.u32 %v2377_v62, %v2368_v52  ;;  %v672_v3 = vand.u32 8388607, %v8093_v14  ;;  %v686_v47 = vshrl.u32 %v8266_v36, %v5156_v38 }
 0x10a   :  { %v5181_v51 = vshrl.u32 %v677_v44, 5  ;;  %v682_v30 = vshll.u32 %v8263_v37, %v679_v11  ;;  %v685_v20 = vshll.u32 %v8260_v26, %v679_v11  ;;  %v689_v1 = vshrl.u32 %v8256_v24, %v5156_v38 }
 0x10b   :  { %v5187_v19 = vadd.s32 %v2388_v58, %v2384_v42  ;;  %v688_v48 = vshll.u32 %v8266_v36, %v679_v11  ;;  %v691_v62 = vshll.u32 %v8256_v24, %v679_v11  ;;  %v8270_v29 = vmov 920167782  }
 0x10c   :  { %v692_v4 = vshrl.u32 %v8270_v29, %v5156_v38  ;;  %v684_v10 = vor.u32 %v683_v8, %v682_v30  ;;  %v687_v28 = vor.u32 %v686_v47, %v685_v20  ;;  %v694_v44 = vshll.u32 %v8270_v29, %v679_v11 }
 0x10d   :  { %v695_v46 = vshrl.u32 %v8261_v40, %v5156_v38  ;;  %v5196_v17 = vor.u32 %v2195_v41, %v2194_v16  ;;  %v673_v18 = vor.u32 8388608, %v672_v3  ;;  %v690_v52 = vor.u32 %v689_v1, %v688_v48 }
 0x10e   :  { %v693_v54 = vor.u32 %v692_v4, %v691_v62  ;;  %v5198_v58 = vor.u32 4788187, %v2199_v9  ;;  %v2301_v42 = vsub.s32 4294967266, %v5171_v59  ;;  %v5202_v14 = vsub.s32 %v5120_v0, %v624_v50  ;;  %v79_v50 = vpop.permute.xlu0 %78 }
 0x10f   :  { %v696_v56 = vor.u32 %v695_v46, %v694_v44  ;;  %v534_v8 = vadd.s32 127, %v533_v32  ;;  %v2390_v47 = vadd.s32 536870912, %v5187_v19  ;;  %vm697_vm6 = vcmp.lt.s32.totalorder %v5181_v51, 1 }
 0x110   :  { %vm700_vm7 = vcmp.lt.s32.totalorder %v5181_v51, 4  ;;  %vm699_vm8 = vcmp.lt.s32.totalorder %v5181_v51, 3  ;;  %v705_v11 = vsel %vm697_vm6, %v684_v10, %v687_v28  ;;  %v2436_v41 = vand.u32 2139095040, %v5168_v13 }
 0x111   :  { %v706_v16 = vsel %vm700_vm7, %v693_v54, 920167782  ;;  %vm698_vm9 = vcmp.lt.s32.totalorder %v5181_v51, 2  ;;  %v709_v9 = vsel %vm697_vm6, %v687_v28, %v690_v52  ;;  %v713_v32 = vshll.u32 %v673_v18, 8 }
 0x112   :  { %v707_v0 = vsel %vm699_vm8, %v690_v52, %v706_v16  ;;  %v2302_v3 = vadd.s32 127, %v2301_v42  ;;  %v627_v30 = vsub.s32 0, %v5202_v14  ;;  %v710_v1 = vsel %vm700_vm7, %v696_v56, 1326507024 }
 0x113   :  { %v708_v20 = vsel %vm698_vm9, %v705_v11, %v707_v0  ;;  %v5223_v48 = vshrl.u32 %v2390_v47, 30  ;;  %v711_v62 = vsel %vm699_vm8, %v693_v54, %v710_v1  ;;  %v529_v46 = vsub.s32 32, %v5144_v21 }
 0x114   :  { %v5227_v4 = vmul.u32.u64.low %v713_v32, %v708_v20  ;;  %v5228_v44 = vmul.u32.u64.high %v713_v32, %v708_v20, %v5227_v4  ;;  %v712_v18 = vsel %vm698_vm9, %v709_v9, %v711_v62  ;;  %v2437_v42 = vshrl.u32 %v2436_v41, 23 }
 0x115   :  { %8271 = vst [vmem:[#allocation34_spill] sm:$0xff] %v5223_v48  ;;  %v5235_v11 = vmul.f32 %v5165_v22, %v79_v50  ;;  %v535_v16 = vshll.u32 %v534_v8, 23  ;;  %v702_v56 = vsel %vm700_vm7, %v690_v52, 2102212464  ;;  %v2203_v54 = vcvt.s32.f32 %v5196_v17 }
 0x116   :  { %v5239_v47 = vmul.u32.u64.low %v713_v32, %v712_v18  ;;  %v5240_v0 = vmul.u32.u64.high %v713_v32, %v712_v18, %v5239_v47  ;;  %v2297_v20 = vsub.s32 32, %v5171_v59  ;;  %v681_v1 = vshrl.u32 %v8263_v37, %v5156_v38 }
 0x117   :  { %8272 = vst [vmem:[#allocation35_spill] sm:$0xff] %v5235_v11  ;;  %v3958_v2 = vadd.s32 4294967169, %v2437_v42  ;;  %v2281_v41 = vadd.s32 %v4933_v5, %v4944_v55  ;;  %v2303_v9 = vshll.u32 %v2302_v3, 23  ;;  %v3887_v8 = vmin.u32 %v627_v30, %v5202_v14 }
 0x118   :  { %v2392_v50 = vshll.u32 %v5223_v48, 30  ;;  %v701_v52 = vsel %vm697_vm6, %v681_v1, %v684_v10  ;;  %v703_v17 = vsel %vm699_vm8, %v687_v28, %v702_v56  ;;  %v772_v18 = vand.u32 2139095040, %v5235_v11 }
 0x119   :  { %v2443_v62 = vadd.s32 1, %v3958_v2  ;;  %v2201_v38 = vand.u32 2147483647, %v5198_v58  ;;  %v531_v42 = vshrl.u32 %v5151_v61, %v529_v46  ;;  %v5257_v47 = vor.u32 4788187, %v535_v16 }
 0x11a   :  { %v723_v5 = vadd.s32 1, %v5228_v44  ;;  %v2299_v55 = vshrl.u32 %v2281_v41, %v2297_v20  ;;  %vm722_vm10 = vc.u32 %v5240_v0, %v5227_v4  ;;  %v8098_v10 = vand.u32 2147483647, %v5168_v13 }
 0x11b   :  { %vm2444_vm11 = vcmp.gt.s32.totalorder %v2443_v62, 0  ;;  %v5263_v3 = vor.u32 4788187, %v2303_v9  ;;  %v629_v2 = vclz %v3887_v8  ;;  %v704_v28 = vsel %vm698_vm9, %v701_v52, %v703_v17 }
 0x11c   :  { %v2445_v58 = vsel %vm2444_vm11, %v2443_v62, 0  ;;  %v530_v61 = vshll.u32 %v5007_v60, %v5144_v21  ;;  %v2298_v30 = vshll.u32 %v5035_v6, %v5171_v59  ;;  %v5272_v46 = vsub.s32 %v5187_v19, %v2392_v50 }
 0x11d   :  { %v773_v16 = vshrl.u32 %v772_v18, 23  ;;  %v2101_v56 = vxor.u32 2147483648, %v5139_v25  ;;  %v5275_v20 = vmul.f32 %v2203_v54, %v2201_v38  ;;  %v724_v1 = vsel %vm722_vm10, %v723_v5, %v5228_v44 }
 0x11e   :  { %v2447_v41 = vand.u32 31, %v2445_v58  ;;  %v5278_v51 = vor.u32 %v531_v42, %v530_v61  ;;  %v5281_v8 = vor.u32 %v2299_v55, %v2298_v30  ;;  %v720_v60 = vmul.u32 %v713_v32, %v704_v28 }
 0x11f   :  { %v5284_v21 = vadd.s32 4294967294, %v629_v2  ;;  %v2440_v59 = vand.u32 8388607, %v8098_v10  ;;  %v2395_v54 = vsub.s32 0, %v5272_v46  ;;  %v2446_v44 = vshrl.u32 %v2445_v58, 5 }
 0x120   :  { %v2448_v19 = vsub.s32 32, %v2447_v41  ;;  %v5289_v50 = vadd.s32 %v724_v1, %v720_v60  ;;  %v3894_v52 = vadd.s32 4294967169, %v773_v16  ;;  %v2450_v17 = vshll.u32 %v8263_v37, %v2447_v41 }
 0x121   :  { %v2453_v32 = vshll.u32 %v8260_v26, %v2447_v41  ;;  %v2456_v38 = vshll.u32 %v8266_v36, %v2447_v41  ;;  %v2459_v5 = vshll.u32 %v8256_v24, %v2447_v41  ;;  %vm355_vm12 = vcmp.lt.s32.totalorder %v4594_v35, 0 }
 0x122   :  { %v2451_v62 = vshrl.u32 %v8260_v26, %v2448_v19  ;;  %v2454_v18 = vshrl.u32 %v8266_v36, %v2448_v19  ;;  %v2457_v42 = vshrl.u32 %v8256_v24, %v2448_v19  ;;  %v2460_v55 = vshrl.u32 %v8270_v29, %v2448_v19 }
 0x123   :  { %vm2019_vm13 = vcmp.lt.s32.totalorder %v4598_v39, 0  ;;  %vm3889_vm14 = vcmp.lt.s32.totalorder %v5284_v21, 0  ;;  %v2441_v2 = vor.u32 8388608, %v2440_v59  ;;  %v2462_v16 = vshll.u32 %v8270_v29, %v2447_v41 }
 0x124   :  { %v2452_v28 = vor.u32 %v2451_v62, %v2450_v17  ;;  %v2455_v58 = vor.u32 %v2454_v18, %v2453_v32  ;;  %v2458_v61 = vor.u32 %v2457_v42, %v2456_v38  ;;  %v2461_v30 = vor.u32 %v2460_v55, %v2459_v5 }
 0x125   :  { %v2463_v1 = vshrl.u32 %v8261_v40, %v2448_v19  ;;  %v3955_v60 = vmin.u32 %v2395_v54, %v5272_v46  ;;  %v726_v10 = vadd.s32 536870912, %v5289_v50  ;;  %vm2465_vm15 = vcmp.lt.s32.totalorder %v2446_v44, 1 }
 0x126   :  { %v779_v6 = vadd.s32 1, %v3894_v52  ;;  %v2449_v9 = vshrl.u32 %v8263_v37, %v2448_v19  ;;  %vm2468_vm1 = vcmp.lt.s32.totalorder %v2446_v44, 4  ;;  %v2473_v57 = vsel %vm2465_vm15, %v2452_v28, %v2455_v58 }
 0x127   :  { %v2464_v48 = vor.u32 %v2463_v1, %v2462_v16  ;;  %vm2467_vm2 = vcmp.lt.s32.totalorder %v2446_v44, 3  ;;  %v2470_v59 = vsel %vm2468_vm1, %v2458_v61, 2102212464  ;;  %v2474_v17 = vsel %vm2468_vm1, %v2461_v30, 920167782 }
 0x128   :  { %v2477_v62 = vsel %vm2465_vm15, %v2455_v58, %v2458_v61  ;;  %vm2466_vm3 = vcmp.lt.s32.totalorder %v2446_v44, 2  ;;  %v2475_v32 = vsel %vm2467_vm2, %v2458_v61, %v2474_v17  ;;  %v2481_v18 = vshll.u32 %v2441_v2, 8 }
 0x129   :  { %v2478_v41 = vsel %vm2468_vm1, %v2464_v48, 1326507024  ;;  %v2469_v38 = vsel %vm2465_vm15, %v2449_v9, %v2452_v28  ;;  %v2476_v54 = vsel %vm2466_vm3, %v2473_v57, %v2475_v32  ;;  %v8108_v5 = vand.u32 2147483647, %v5235_v11 }
 0x12a   :  { %v2479_v42 = vsel %vm2467_vm2, %v2461_v30, %v2478_v41  ;;  %v2471_v52 = vsel %vm2467_vm2, %v2455_v58, %v2470_v59  ;;  %v5310_v55 = vmul.u32.u64.low %v2481_v18, %v2476_v54  ;;  %v5311_v16 = vmul.u32.u64.high %v2481_v18, %v2476_v54, %v5310_v55  ;;  %v164_v30 = vpop.permute.xlu1 %163 }
 0x12b   :  { %v2480_v19 = vsel %vm2466_vm3, %v2477_v62, %v2479_v42  ;;  %v5314_v1 = vshrl.u32 %v726_v10, 30  ;;  %vm780_vm5 = vcmp.gt.s32.totalorder %v779_v6, 0  ;;  %v8274_v48 = vxor.u32 2147483648, %v5070_v33 }
 0x12c   :  { %v5316_v53 = vmul.u32.u64.low %v2481_v18, %v2480_v19  ;;  %v5317_v12 = vmul.u32.u64.high %v2481_v18, %v2480_v19, %v5316_v53  ;;  %v5329_v9 = vsel %vm2019_vm13, %v2101_v56, %v5139_v25  ;;  %v539_v2 = vcvt.s32.f32 %v5278_v51 }
 0x12d   :  { %8273 = vst [vmem:[#allocation36_spill] sm:$0xff] %v5314_v1  ;;  %v5324_v57 = vsel %vm355_vm12, %v8274_v48, %v5070_v33  ;;  %8276 = vst [vmem:[#allocation38_spill] sm:$0xff] %v5329_v9  ;;  %v781_v10 = vsel %vm780_vm5, %v779_v6, 0  ;;  %v2307_v28 = vcvt.s32.f32 %v5281_v8  ;;  %v2397_v58 = vclz %v3955_v60 }
 0x12e   :  { %8275 = vst [vmem:[#allocation37_spill] sm:$0xff] %v5324_v57  ;;  %v2472_v53 = vsel %vm2466_vm3, %v2469_v38, %v2471_v52  ;;  %v783_v61 = vand.u32 31, %v781_v10  ;;  %v2205_v59 = vxor.u32 2147483648, %v5275_v20  ;;  %v5338_v33 = vsel %vm3889_vm14, 0, %v5284_v21 }
 0x12f   :  { %v2491_v25 = vadd.s32 1, %v5311_v16  ;;  %v776_v56 = vand.u32 8388607, %v8108_v5  ;;  %v8277_v51 = vand.u32 2147483647, %v5257_v47  ;;  %v617_v60 = vadd.s32 %v5060_v49, %v5068_v34 }
 0x130   :  { %v8278_v6 = vand.u32 2147483647, %v5263_v3  ;;  %v728_v17 = vshll.u32 %v5314_v1, 30  ;;  %v2488_v21 = vmul.u32 %v2481_v18, %v2472_v53  ;;  %vm2490_vm6 = vc.u32 %v5317_v12, %v5310_v55 }
 0x131   :  { %v5345_v8 = vmul.f32 %v539_v2, %v8277_v51  ;;  %v784_v62 = vsub.s32 32, %v783_v61  ;;  %v5357_v32 = vmul.f32 %v5165_v22, %v164_v30  ;;  %v633_v47 = vsub.s32 32, %v5338_v33 }
 0x132   :  { %v5349_v44 = vmul.f32 %v2307_v28, %v8278_v6  ;;  %v637_v41 = vsub.s32 4294967266, %v5338_v33  ;;  %v3956_v3 = vadd.s32 4294967294, %v2397_v58  ;;  %v2492_v38 = vsel %vm2490_vm6, %v2491_v25, %v5311_v16 }
 0x133   :  { %8279 = vst [vmem:[#allocation39_spill] sm:$0xff] %v5357_v32  ;;  %v5362_v54 = vadd.s32 %v2492_v38, %v2488_v21  ;;  %v777_v49 = vor.u32 8388608, %v776_v56  ;;  %v787_v34 = vshrl.u32 %v8260_v26, %v784_v62  ;;  %v790_v18 = vshrl.u32 %v8266_v36, %v784_v62 }
 0x134   :  { %v5367_v42 = vsub.s32 %v5289_v50, %v728_v17  ;;  %v786_v52 = vshll.u32 %v8263_v37, %v783_v61  ;;  %v789_v19 = vshll.u32 %v8260_v26, %v783_v61  ;;  %v793_v48 = vshrl.u32 %v8256_v24, %v784_v62 }
 0x135   :  { %v5372_v2 = vshrl.u32 %v781_v10, 5  ;;  %v792_v16 = vshll.u32 %v8266_v36, %v783_v61  ;;  %v795_v28 = vshll.u32 %v8256_v24, %v783_v61  ;;  %v796_v58 = vshrl.u32 %v8270_v29, %v784_v62 }
 0x136   :  { %v2494_v53 = vadd.s32 536870912, %v5362_v54  ;;  %v788_v30 = vor.u32 %v787_v34, %v786_v52  ;;  %v791_v25 = vor.u32 %v790_v18, %v789_v19  ;;  %v2540_v50 = vand.u32 2139095040, %v5357_v32 }
 0x137   :  { %vm2123_vm7 = vcmp.lt.s32.totalorder %v4683_v7, 0  ;;  %v794_v56 = vor.u32 %v793_v48, %v792_v16  ;;  %v797_v51 = vor.u32 %v796_v58, %v795_v28  ;;  %v798_v6 = vshll.u32 %v8270_v29, %v783_v61 }
 0x138   :  { %v799_v10 = vshrl.u32 %v8261_v40, %v784_v62  ;;  %v634_v17 = vshll.u32 %v5202_v14, %v5338_v33  ;;  %v638_v21 = vadd.s32 127, %v637_v41  ;;  %vm3957_vm8 = vcmp.lt.s32.totalorder %v3956_v3, 0 }
 0x139   :  { %v5384_v38 = vshll.u32 %v777_v49, 8  ;;  %v731_v34 = vsub.s32 0, %v5367_v42  ;;  %vm801_vm9 = vcmp.lt.s32.totalorder %v5372_v2, 1  ;;  %vm804_vm10 = vcmp.lt.s32.totalorder %v5372_v2, 4 }
 0x13a   :  { %v800_v18 = vor.u32 %v799_v10, %v798_v6  ;;  %vm803_vm11 = vcmp.lt.s32.totalorder %v5372_v2, 3  ;;  %v809_v61 = vsel %vm801_vm9, %v788_v30, %v791_v25  ;;  %v810_v52 = vsel %vm804_vm10, %v797_v51, 920167782  ;;  %v84_v10 = vpop.permute.xlu0 %83 }
 0x13b   :  { %v2541_v14 = vshrl.u32 %v2540_v50, 23  ;;  %v5394_v33 = vshrl.u32 %v2494_v53, 30  ;;  %vm802_vm14 = vcmp.lt.s32.totalorder %v5372_v2, 2  ;;  %v811_v41 = vsel %vm803_vm11, %v794_v56, %v810_v52 }
 0x13c   :  { %v813_v49 = vsel %vm801_vm9, %v791_v25, %v794_v56  ;;  %vm459_vm15 = vcmp.lt.s32.totalorder %v4711_v31, 0  ;;  %vm2227_vm1 = vcmp.lt.s32.totalorder %v4729_v63, 0  ;;  %v635_v19 = vshrl.u32 %v617_v60, %v633_v47 }
 0x13d   :  { %8280 = vst [vmem:[#allocation40_spill] sm:$0xff] %v5394_v33  ;;  %v639_v48 = vshll.u32 %v638_v21, 23  ;;  %v812_v16 = vsel %vm802_vm14, %v809_v61, %v811_v41  ;;  %v814_v28 = vsel %vm804_vm10, %v800_v18, 1326507024  ;;  %v5408_v58 = vsel %vm3957_vm8, 0, %v3956_v3 }
 0x13e   :  { %v815_v53 = vsel %vm803_vm11, %v797_v51, %v814_v28  ;;  %v5413_v50 = vmul.u32.u64.low %v5384_v38, %v812_v16  ;;  %v5414_v6 = vmul.u32.u64.high %v5384_v38, %v812_v16, %v5413_v50  ;;  %v3891_v60 = vmin.u32 %v731_v34, %v5367_v42 }
 0x13f   :  { %v806_v47 = vsel %vm804_vm10, %v794_v56, 2102212464  ;;  %v816_v21 = vsel %vm802_vm14, %v813_v49, %v815_v53  ;;  %v3962_v18 = vadd.s32 4294967169, %v2541_v14  ;;  %v2496_v3 = vshll.u32 %v5394_v33, 30 }
 0x140   :  { %v785_v61 = vshrl.u32 %v8263_v37, %v784_v62  ;;  %v5425_v51 = vmul.u32.u64.low %v5384_v38, %v816_v21  ;;  %v5426_v52 = vmul.u32.u64.high %v5384_v38, %v816_v21, %v5425_v51  ;;  %v5433_v34 = vsel %vm2123_vm7, %v2205_v59, %v5275_v20 }
 0x141   :  { %8281 = vst [vmem:[#allocation41_spill] sm:$0xff] %v5433_v34  ;;  %v541_v56 = vxor.u32 2147483648, %v5345_v8  ;;  %v2547_v41 = vadd.s32 1, %v3962_v18  ;;  %v5437_v14 = vmul.f32 %v5165_v22, %v84_v10  ;;  %v2309_v49 = vxor.u32 2147483648, %v5349_v44 }
 0x142   :  { %v636_v62 = vor.u32 %v635_v19, %v634_v17  ;;  %v805_v16 = vsel %vm801_vm9, %v785_v61, %v788_v30  ;;  %v807_v28 = vsel %vm803_vm11, %v791_v25, %v806_v47  ;;  %v640_v53 = vor.u32 4788187, %v639_v48 }
 0x143   :  { %8282 = vst [vmem:[#allocation42_spill] sm:$0xff] %v5437_v14  ;;  %v2405_v21 = vsub.s32 4294967266, %v5408_v58  ;;  %v827_v20 = vadd.s32 1, %v5414_v6  ;;  %vm2548_vm2 = vcmp.gt.s32.totalorder %v2547_v41, 0  ;;  %v733_v59 = vclz %v3891_v60 }
 0x144   :  { %v5447_v18 = vsub.s32 %v5362_v54, %v2496_v3  ;;  %vm826_vm3 = vc.u32 %v5426_v52, %v5413_v50  ;;  %v2549_v17 = vsel %vm2548_vm2, %v2547_v41, 0  ;;  %v808_v30 = vsel %vm802_vm14, %v805_v16, %v807_v28 }
 0x145   :  { %v8107_v19 = vand.u32 2147483647, %v5357_v32  ;;  %v2551_v25 = vand.u32 31, %v2549_v17  ;;  %v876_v48 = vand.u32 2139095040, %v5437_v14  ;;  %v5458_v10 = vsel %vm459_vm15, %v541_v56, %v5345_v8 }
 0x146   :  { %8283 = vst [vmem:[#allocation43_spill] sm:$0xff] %v5458_v10  ;;  %v5463_v54 = vsel %vm2227_vm1, %v2309_v49, %v5349_v44  ;;  %v643_v60 = vcvt.s32.f32 %v636_v62  ;;  %v2385_v2 = vadd.s32 %v5130_v15, %v5135_v27  ;;  %v641_v47 = vand.u32 2147483647, %v640_v53 }
 0x147   :  { %8284 = vst [vmem:[#allocation44_spill] sm:$0xff] %v5463_v54  ;;  %v2401_v3 = vsub.s32 32, %v5408_v58  ;;  %v828_v61 = vsel %vm826_vm3, %v827_v20, %v5414_v6  ;;  %v2552_v51 = vsub.s32 32, %v2551_v25  ;;  %v2406_v41 = vadd.s32 127, %v2405_v21  ;;  %v169_v54 = vpop.permute.xlu1 %168 }
 0x148   :  { %v3892_v16 = vadd.s32 4294967294, %v733_v59  ;;  %v2499_v8 = vsub.s32 0, %v5447_v18  ;;  %v824_v56 = vmul.u32 %v5384_v38, %v808_v30  ;;  %v2544_v44 = vand.u32 8388607, %v8107_v19 }
 0x149   :  { %v2555_v49 = vshrl.u32 %v8260_v26, %v2552_v51  ;;  %v2558_v62 = vshrl.u32 %v8266_v36, %v2552_v51  ;;  %v877_v15 = vshrl.u32 %v876_v48, 23  ;;  %v2554_v28 = vshll.u32 %v8263_v37, %v2551_v25 }
 0x14a   :  { %v5475_v27 = vadd.s32 %v828_v61, %v824_v56  ;;  %v2557_v6 = vshll.u32 %v8260_v26, %v2551_v25  ;;  %v2561_v53 = vshrl.u32 %v8256_v24, %v2552_v51  ;;  %v2550_v21 = vshrl.u32 %v2549_v17, 5 }
 0x14b   :  { %v2560_v20 = vshll.u32 %v8266_v36, %v2551_v25  ;;  %v2563_v38 = vshll.u32 %v8256_v24, %v2551_v25  ;;  %v2564_v59 = vshrl.u32 %v8270_v29, %v2552_v51  ;;  %v5483_v30 = vmul.f32 %v643_v60, %v641_v47 }
 0x14c   :  { %v3959_v19 = vmin.u32 %v2499_v8, %v5447_v18  ;;  %v2556_v48 = vor.u32 %v2555_v49, %v2554_v28  ;;  %v2559_v61 = vor.u32 %v2558_v62, %v2557_v6  ;;  %v2566_v33 = vshll.u32 %v8270_v29, %v2551_v25 }
 0x14d   :  { %v2562_v56 = vor.u32 %v2561_v53, %v2560_v20  ;;  %v2565_v5 = vor.u32 %v2564_v59, %v2563_v38  ;;  %v2567_v1 = vshrl.u32 %v8261_v40, %v2552_v51  ;;  %v2403_v17 = vshrl.u32 %v2385_v2, %v2401_v3 }
 0x14e   :  { %v2407_v63 = vshll.u32 %v2406_v41, 23  ;;  %v830_v34 = vadd.s32 536870912, %v5475_v27  ;;  %v2545_v7 = vor.u32 8388608, %v2544_v44  ;;  %vm3893_vm5 = vcmp.lt.s32.totalorder %v3892_v16, 0 }
 0x14f   :  { %v2568_v10 = vor.u32 %v2567_v1, %v2566_v33  ;;  %vm2569_vm6 = vcmp.lt.s32.totalorder %v2550_v21, 1  ;;  %v3898_v60 = vadd.s32 4294967169, %v877_v15  ;;  %v2501_v47 = vclz %v3959_v19 }
 0x150   :  { %vm2572_vm8 = vcmp.lt.s32.totalorder %v2550_v21, 4  ;;  %v2577_v8 = vsel %vm2569_vm6, %v2556_v48, %v2559_v61  ;;  %v5491_v49 = vmul.f32 %v5165_v22, %v169_v54  ;;  %vm2571_vm9 = vcmp.lt.s32.totalorder %v2550_v21, 3 }
 0x151   :  { %v2578_v25 = vsel %vm2572_vm8, %v2565_v5, 920167782  ;;  %v2581_v62 = vsel %vm2569_vm6, %v2559_v61, %v2562_v56  ;;  %v2582_v2 = vsel %vm2572_vm8, %v2568_v10, 1326507024  ;;  %v5494_v3 = vshrl.u32 %v830_v34, 30 }
 0x152   :  { %vm2570_vm10 = vcmp.lt.s32.totalorder %v2550_v21, 2  ;;  %v2579_v41 = vsel %vm2571_vm9, %v2562_v56, %v2578_v25  ;;  %v2585_v1 = vshll.u32 %v2545_v7, 8  ;;  %v2574_v33 = vsel %vm2572_vm8, %v2562_v56, 2102212464 }
 0x153   :  { %8285 = vst [vmem:[#allocation45_spill] sm:$0xff] %v5494_v3  ;;  %v2580_v19 = vsel %vm2570_vm10, %v2577_v8, %v2579_v41  ;;  %v2583_v44 = vsel %vm2571_vm9, %v2565_v5, %v2582_v2  ;;  %v883_v15 = vadd.s32 1, %v3898_v60  ;;  %v3960_v28 = vadd.s32 4294967294, %v2501_v47 }
 0x154   :  { %v2553_v54 = vshrl.u32 %v8263_v37, %v2552_v51  ;;  %v2584_v6 = vsel %vm2570_vm10, %v2581_v62, %v2583_v44  ;;  %v2644_v53 = vand.u32 2139095040, %v5491_v49  ;;  %v5509_v7 = vor.u32 4788187, %v2407_v63 }
 0x155   :  { %v5502_v10 = vmul.u32.u64.low %v2585_v1, %v2584_v6  ;;  %v5503_v34 = vmul.u32.u64.high %v2585_v1, %v2584_v6, %v5502_v10  ;;  %v5505_v20 = vmul.u32.u64.low %v2585_v1, %v2580_v19  ;;  %v5506_v38 = vmul.u32.u64.high %v2585_v1, %v2580_v19, %v5505_v20 }
 0x156   :  { %v2573_v59 = vsel %vm2569_vm6, %v2553_v54, %v2556_v48  ;;  %v2575_v5 = vsel %vm2571_vm9, %v2559_v61, %v2574_v33  ;;  %vm884_vm11 = vcmp.gt.s32.totalorder %v883_v15, 0  ;;  %v5514_v51 = vsel %vm3893_vm5, 0, %v3892_v16 }
 0x157   :  { %v832_v56 = vshll.u32 %v5494_v3, 30  ;;  %v8117_v60 = vand.u32 2147483647, %v5437_v14  ;;  %v885_v47 = vsel %vm884_vm11, %v883_v15, 0  ;;  %v2402_v8 = vshll.u32 %v5272_v46, %v5408_v58 }
 0x158   :  { %vm3961_vm14 = vcmp.lt.s32.totalorder %v3960_v28, 0  ;;  %v887_v25 = vand.u32 31, %v885_v47  ;;  %v2645_v63 = vshrl.u32 %v2644_v53, 23  ;;  %v721_v48 = vadd.s32 %v5227_v4, %v5240_v0 }
 0x159   :  { %v2576_v61 = vsel %vm2570_vm10, %v2573_v59, %v2575_v5  ;;  %vm2594_vm2 = vc.u32 %v5503_v34, %v5505_v20  ;;  %v2595_v16 = vadd.s32 1, %v5506_v38  ;;  %v5526_v62 = vor.u32 %v2403_v17, %v2402_v8 }
 0x15a   :  { %v2409_v2 = vand.u32 2147483647, %v5509_v7  ;;  %v741_v41 = vsub.s32 4294967266, %v5514_v51  ;;  %v888_v46 = vsub.s32 32, %v887_v25  ;;  %v5530_v58 = vsel %vm3961_vm14, 0, %v3960_v28 }
 0x15b   :  { %v5533_v33 = vsub.s32 %v5475_v27, %v832_v56  ;;  %v2596_v4 = vsel %vm2594_vm2, %v2595_v16, %v5506_v38  ;;  %v880_v0 = vand.u32 8388607, %v8117_v60  ;;  %v2592_v21 = vmul.u32 %v2585_v1, %v2576_v61 }
 0x15c   :  { %v890_v19 = vshll.u32 %v8263_v37, %v887_v25  ;;  %v893_v17 = vshll.u32 %v8260_v26, %v887_v25  ;;  %v3966_v44 = vadd.s32 4294967169, %v2645_v63  ;;  %v891_v15 = vshrl.u32 %v8260_v26, %v888_v46 }
 0x15d   :  { %v894_v54 = vshrl.u32 %v8266_v36, %v888_v46  ;;  %v896_v28 = vshll.u32 %v8266_v36, %v887_v25  ;;  %v897_v27 = vshrl.u32 %v8256_v24, %v888_v46  ;;  %v5544_v6 = vadd.s32 %v2596_v4, %v2592_v21 }
 0x15e   :  { %v886_v53 = vshrl.u32 %v885_v47, 5  ;;  %v899_v10 = vshll.u32 %v8256_v24, %v887_v25  ;;  %v900_v1 = vshrl.u32 %v8270_v29, %v888_v46  ;;  %v737_v38 = vsub.s32 32, %v5514_v51 }
 0x15f   :  { %v892_v7 = vor.u32 %v891_v15, %v890_v19  ;;  %v895_v59 = vor.u32 %v894_v54, %v893_v17  ;;  %v898_v5 = vor.u32 %v897_v27, %v896_v28  ;;  %v742_v56 = vadd.s32 127, %v741_v41 }
 0x160   :  { %v835_v8 = vsub.s32 0, %v5533_v33  ;;  %v881_v63 = vor.u32 8388608, %v880_v0  ;;  %v901_v61 = vor.u32 %v900_v1, %v899_v10  ;;  %v2509_v16 = vsub.s32 4294967266, %v5530_v58 }
 0x161   :  { %v902_v4 = vshll.u32 %v8270_v29, %v887_v25  ;;  %v903_v47 = vshrl.u32 %v8261_v40, %v888_v46  ;;  %v2651_v21 = vadd.s32 1, %v3966_v44  ;;  %v2598_v60 = vadd.s32 536870912, %v5544_v6 }
 0x162   :  { %vm905_vm3 = vcmp.lt.s32.totalorder %v886_v53, 1  ;;  %vm907_vm5 = vcmp.lt.s32.totalorder %v886_v53, 3  ;;  %vm908_vm6 = vcmp.lt.s32.totalorder %v886_v53, 4  ;;  %v3895_v0 = vmin.u32 %v835_v8, %v5533_v33 }
 0x163   :  { %v904_v19 = vor.u32 %v903_v47, %v902_v4  ;;  %v910_v17 = vsel %vm908_vm6, %v898_v5, 2102212464  ;;  %v913_v41 = vsel %vm905_vm3, %v892_v7, %v895_v59  ;;  %v914_v15 = vsel %vm908_vm6, %v901_v61, 920167782 }
 0x164   :  { %v889_v54 = vshrl.u32 %v8263_v37, %v888_v46  ;;  %vm906_vm8 = vcmp.lt.s32.totalorder %v886_v53, 2  ;;  %v915_v25 = vsel %vm907_vm5, %v898_v5, %v914_v15  ;;  %v917_v44 = vsel %vm905_vm3, %v895_v59, %v898_v5 }
 0x165   :  { %v916_v28 = vsel %vm906_vm8, %v913_v41, %v915_v25  ;;  %v918_v27 = vsel %vm908_vm6, %v904_v19, 1326507024  ;;  %v921_v10 = vshll.u32 %v881_v63, 8  ;;  %v5560_v1 = vshrl.u32 %v2598_v60, 30 }
 0x166   :  { %v909_v4 = vsel %vm905_vm3, %v889_v54, %v892_v7  ;;  %v911_v47 = vsel %vm907_vm5, %v895_v59, %v910_v17  ;;  %v919_v3 = vsel %vm907_vm5, %v901_v61, %v918_v27  ;;  %vm2652_vm9 = vcmp.gt.s32.totalorder %v2651_v21, 0 }
 0x167   :  { %8286 = vst [vmem:[#allocation46_spill] sm:$0xff] %v5560_v1  ;;  %v920_v8 = vsel %vm906_vm8, %v917_v44, %v919_v3  ;;  %v5566_v46 = vmul.u32.u64.low %v921_v10, %v916_v28  ;;  %v5567_v31 = vmul.u32.u64.high %v921_v10, %v916_v28, %v5566_v46  ;;  %v2411_v41 = vcvt.s32.f32 %v5526_v62 }
 0x168   :  { %v739_v5 = vshrl.u32 %v721_v48, %v737_v38  ;;  %v5571_v19 = vmul.u32.u64.low %v921_v10, %v920_v8  ;;  %v5572_v63 = vmul.u32.u64.high %v921_v10, %v920_v8, %v5571_v19  ;;  %v743_v60 = vshll.u32 %v742_v56, 23 }
 0x169   :  { %v912_v7 = vsel %vm906_vm8, %v909_v4, %v911_v47  ;;  %v8122_v59 = vand.u32 2147483647, %v5491_v49  ;;  %v2653_v17 = vsel %vm2652_vm9, %v2651_v21, 0  ;;  %v5576_v61 = vmul.f32 %v2411_v41, %v2409_v2 }
 0x16a   :  { %v2505_v3 = vsub.s32 32, %v5530_v58  ;;  %v2600_v15 = vshll.u32 %v5560_v1, 30  ;;  %v2655_v54 = vand.u32 31, %v2653_v17  ;;  %v738_v62 = vshll.u32 %v5367_v42, %v5514_v51  ;;  %v89_v51 = vpop.permute.xlu0 %88 }
 0x16b   :  { %v2510_v48 = vadd.s32 127, %v2509_v16  ;;  %v837_v38 = vclz %v3895_v0  ;;  %v931_v25 = vadd.s32 1, %v5567_v31  ;;  %v2489_v53 = vadd.s32 %v5310_v55, %v5317_v12 }
 0x16c   :  { %v928_v56 = vmul.u32 %v921_v10, %v912_v7  ;;  %vm930_vm10 = vc.u32 %v5572_v63, %v5566_v46  ;;  %v2656_v2 = vsub.s32 32, %v2655_v54  ;;  %v5587_v21 = vor.u32 %v739_v5, %v738_v62 }
 0x16d   :  { %v5589_v28 = vor.u32 4788187, %v743_v60  ;;  %v932_v44 = vsel %vm930_vm10, %v931_v25, %v5567_v31  ;;  %v2648_v42 = vand.u32 8388607, %v8122_v59  ;;  %v2507_v16 = vshrl.u32 %v2489_v53, %v2505_v3 }
 0x16e   :  { %v5595_v0 = vsub.s32 %v5544_v6, %v2600_v15  ;;  %v933_v12 = vadd.s32 %v932_v44, %v928_v56  ;;  %v2659_v55 = vshrl.u32 %v8260_v26, %v2656_v2  ;;  %v2511_v27 = vshll.u32 %v2510_v48, 23 }
 0x16f   :  { %v3896_v10 = vadd.s32 4294967294, %v837_v38  ;;  %v2662_v4 = vshrl.u32 %v8266_v36, %v2656_v2  ;;  %v2665_v47 = vshrl.u32 %v8256_v24, %v2656_v2  ;;  %v2654_v8 = vshrl.u32 %v2653_v17, 5 }
 0x170   :  { %v2658_v31 = vshll.u32 %v8263_v37, %v2655_v54  ;;  %v2661_v41 = vshll.u32 %v8260_v26, %v2655_v54  ;;  %v5603_v5 = vmul.f32 %v5165_v22, %v89_v51  ;;  %v934_v19 = vadd.s32 536870912, %v933_v12 }
 0x171   :  { %v2664_v6 = vshll.u32 %v8266_v36, %v2655_v54  ;;  %v2667_v60 = vshll.u32 %v8256_v24, %v2655_v54  ;;  %v2668_v7 = vshrl.u32 %v8270_v29, %v2656_v2  ;;  %v2506_v3 = vshll.u32 %v5447_v18, %v5530_v58 }
 0x172   :  { %v2603_v15 = vsub.s32 0, %v5595_v0  ;;  %v2660_v17 = vor.u32 %v2659_v55, %v2658_v31  ;;  %v2663_v62 = vor.u32 %v2662_v4, %v2661_v41  ;;  %v2670_v25 = vshll.u32 %v8270_v29, %v2655_v54 }
 0x173   :  { %v2666_v48 = vor.u32 %v2665_v47, %v2664_v6  ;;  %v2669_v38 = vor.u32 %v2668_v7, %v2667_v60  ;;  %v2671_v53 = vshrl.u32 %v8261_v40, %v2656_v2  ;;  %v5613_v56 = vor.u32 %v2507_v16, %v2506_v3  ;;  %v174_v47 = vpop.permute.xlu1 %173 }
 0x174   :  { %v5615_v44 = vor.u32 4788187, %v2511_v27  ;;  %vm3897_vm11 = vcmp.lt.s32.totalorder %v3896_v10, 0  ;;  %v2649_v51 = vor.u32 8388608, %v2648_v42  ;;  %v5617_v59 = vshrl.u32 %v934_v19, 30 }
 0x175   :  { %v2672_v1 = vor.u32 %v2671_v53, %v2670_v25  ;;  %vm2673_vm14 = vcmp.lt.s32.totalorder %v2654_v8, 1  ;;  %v980_v18 = vand.u32 2139095040, %v5603_v5  ;;  %v3963_v58 = vmin.u32 %v2603_v15, %v5595_v0 }
 0x176   :  { %8287 = vst [vmem:[#allocation47_spill] sm:$0xff] %v5617_v59  ;;  %vm2675_vm2 = vcmp.lt.s32.totalorder %v2654_v8, 3  ;;  %vm2676_vm3 = vcmp.lt.s32.totalorder %v2654_v8, 4  ;;  %v2681_v54 = vsel %vm2673_vm14, %v2660_v17, %v2663_v62  ;;  %v2685_v16 = vsel %vm2673_vm14, %v2663_v62, %v2666_v48 }
 0x177   :  { %v2678_v55 = vsel %vm2676_vm3, %v2666_v48, 2102212464  ;;  %v2682_v4 = vsel %vm2676_vm3, %v2669_v38, 920167782  ;;  %v2686_v27 = vsel %vm2676_vm3, %v2672_v1, 1326507024  ;;  %v2657_v42 = vshrl.u32 %v8263_v37, %v2656_v2 }
 0x178   :  { %vm2674_vm5 = vcmp.lt.s32.totalorder %v2654_v8, 2  ;;  %v2683_v31 = vsel %vm2675_vm2, %v2666_v48, %v2682_v4  ;;  %v2689_v41 = vshll.u32 %v2649_v51, 8  ;;  %vm563_vm6 = vcmp.lt.s32.totalorder %v4921_v23, 0 }
 0x179   :  { %v936_v19 = vshll.u32 %v5617_v59, 30  ;;  %v2684_v6 = vsel %vm2674_vm5, %v2681_v54, %v2683_v31  ;;  %v2687_v60 = vsel %vm2675_vm2, %v2669_v38, %v2686_v27  ;;  %v981_v7 = vshrl.u32 %v980_v18, 23 }
 0x17a   :  { %vm8135_vm8 = vcmp.lt.s32.totalorder %v4988_v45, 0  ;;  %v2677_v1 = vsel %vm2673_vm14, %v2657_v42, %v2660_v17  ;;  %v2679_v3 = vsel %vm2675_vm2, %v2663_v62, %v2678_v55  ;;  %v2688_v2 = vsel %vm2674_vm5, %v2685_v16, %v2687_v60 }
 0x17b   :  { %v5634_v15 = vmul.f32 %v5165_v22, %v174_v47  ;;  %v5636_v48 = vmul.u32.u64.low %v2689_v41, %v2688_v2  ;;  %v5637_v25 = vmul.u32.u64.high %v2689_v41, %v2688_v2, %v5636_v48  ;;  %v645_v38 = vxor.u32 2147483648, %v5483_v30 }
 0x17c   :  { %v5639_v53 = vmul.u32.u64.low %v2689_v41, %v2684_v6  ;;  %v5640_v51 = vmul.u32.u64.high %v2689_v41, %v2684_v6, %v5639_v53  ;;  %v2413_v18 = vxor.u32 2147483648, %v5576_v61  ;;  %v840_v17 = vsel %vm3897_vm11, 0, %v3896_v10 }
 0x17d   :  { %8288 = vst [vmem:[#allocation48_spill] sm:$0xff] %v5634_v15  ;;  %v3902_v54 = vadd.s32 4294967169, %v981_v7  ;;  %v747_v62 = vcvt.s32.f32 %v5587_v21  ;;  %v2605_v55 = vclz %v3963_v58  ;;  %v5647_v4 = vsub.s32 %v933_v12, %v936_v19 }
 0x17e   :  { %v2680_v22 = vsel %vm2674_vm5, %v2677_v1, %v2679_v3  ;;  %v745_v16 = vand.u32 2147483647, %v5589_v28  ;;  %v2515_v27 = vcvt.s32.f32 %v5613_v56  ;;  %v2748_v42 = vand.u32 2139095040, %v5634_v15 }
 0x17f   :  { %v987_v47 = vadd.s32 1, %v3902_v54  ;;  %v2513_v31 = vand.u32 2147483647, %v5615_v44  ;;  %v841_v6 = vsub.s32 32, %v840_v17  ;;  %vm2698_vm9 = vc.u32 %v5637_v25, %v5639_v53 }
 0x180   :  { %v2699_v21 = vadd.s32 1, %v5640_v51  ;;  %v845_v10 = vsub.s32 4294967266, %v840_v17  ;;  %v2696_v12 = vmul.u32 %v2689_v41, %v2680_v22  ;;  %v8125_v8 = vand.u32 2147483647, %v5603_v5 }
 0x181   :  { %vm988_vm10 = vcmp.gt.s32.totalorder %v987_v47, 0  ;;  %v3964_v58 = vadd.s32 4294967294, %v2605_v55  ;;  %v939_v28 = vsub.s32 0, %v5647_v4  ;;  %v5663_v44 = vsel %vm563_vm6, %v645_v38, %v5483_v30 }
 0x182   :  { %v2700_v56 = vsel %vm2698_vm9, %v2699_v21, %v5640_v51  ;;  %v989_v19 = vsel %vm988_vm10, %v987_v47, 0  ;;  %8289 = vst [vmem:[#allocation49_spill] sm:$0xff] %v5663_v44  ;;  %v825_v60 = vadd.s32 %v5413_v50, %v5426_v52  ;;  %v2749_v1 = vshrl.u32 %v2748_v42, 23 }
 0x183   :  { %v2701_v7 = vadd.s32 %v2700_v56, %v2696_v12  ;;  %v5670_v41 = vsel %vm8135_vm8, %v2413_v18, %v5576_v61  ;;  %v5672_v3 = vmul.f32 %v747_v62, %v745_v16  ;;  %v5674_v2 = vmul.f32 %v2515_v27, %v2513_v31 }
 0x184   :  { %8290 = vst [vmem:[#allocation50_spill] sm:$0xff] %v5670_v41  ;;  %v991_v48 = vand.u32 31, %v989_v19  ;;  %v842_v51 = vshll.u32 %v5533_v33, %v840_v17  ;;  %v843_v54 = vshrl.u32 %v825_v60, %v841_v6  ;;  %v984_v38 = vand.u32 8388607, %v8125_v8 }
 0x185   :  { %v2702_v30 = vadd.s32 536870912, %v2701_v7  ;;  %v846_v50 = vadd.s32 127, %v845_v10  ;;  %vm3965_vm11 = vcmp.lt.s32.totalorder %v3964_v58, 0  ;;  %v3899_v52 = vmin.u32 %v939_v28, %v5647_v4 }
 0x186   :  { %v992_v55 = vsub.s32 32, %v991_v48  ;;  %v994_v61 = vshll.u32 %v8263_v37, %v991_v48  ;;  %v997_v18 = vshll.u32 %v8260_v26, %v991_v48  ;;  %v1000_v62 = vshll.u32 %v8266_v36, %v991_v48 }
 0x187   :  { %v3970_v22 = vadd.s32 4294967169, %v2749_v1  ;;  %v5683_v16 = vshrl.u32 %v2702_v30, 30  ;;  %v985_v47 = vor.u32 8388608, %v984_v38  ;;  %v990_v42 = vshrl.u32 %v989_v19, 5 }
 0x188   :  { %v995_v33 = vshrl.u32 %v8260_v26, %v992_v55  ;;  %v998_v17 = vshrl.u32 %v8266_v36, %v992_v55  ;;  %v1001_v27 = vshrl.u32 %v8256_v24, %v992_v55  ;;  %v1003_v31 = vshll.u32 %v8256_v24, %v991_v48 }
 0x189   :  { %8291 = vst [vmem:[#allocation51_spill] sm:$0xff] %v5683_v16  ;;  %v1004_v6 = vshrl.u32 %v8270_v29, %v992_v55  ;;  %v5690_v21 = vor.u32 %v843_v54, %v842_v51  ;;  %v847_v56 = vshll.u32 %v846_v50, 23  ;;  %v1006_v1 = vshll.u32 %v8270_v29, %v991_v48 }
 0x18a   :  { %v996_v10 = vor.u32 %v995_v33, %v994_v61  ;;  %v999_v12 = vor.u32 %v998_v17, %v997_v18  ;;  %v1002_v28 = vor.u32 %v1001_v27, %v1000_v62  ;;  %v1007_v30 = vshrl.u32 %v8261_v40, %v992_v55 }
 0x18b   :  { %v1005_v60 = vor.u32 %v1004_v6, %v1003_v31  ;;  %v5695_v8 = vsel %vm3965_vm11, 0, %v3964_v58  ;;  %v941_v38 = vclz %v3899_v52  ;;  %v2704_v19 = vshll.u32 %v5683_v16, 30 }
 0x18c   :  { %v2755_v59 = vadd.s32 1, %v3970_v22  ;;  %v1008_v41 = vor.u32 %v1007_v30, %v1006_v1  ;;  %vm1009_vm14 = vcmp.lt.s32.totalorder %v990_v42, 1  ;;  %vm1012_vm2 = vcmp.lt.s32.totalorder %v990_v42, 4 }
 0x18d   :  { %v1025_v51 = vshll.u32 %v985_v47, 8  ;;  %vm1011_vm3 = vcmp.lt.s32.totalorder %v990_v42, 3  ;;  %v1014_v54 = vsel %vm1012_vm2, %v1002_v28, 2102212464  ;;  %v1017_v50 = vsel %vm1009_vm14, %v996_v10, %v999_v12 }
 0x18e   :  { %v1018_v61 = vsel %vm1012_vm2, %v1005_v60, 920167782  ;;  %v993_v48 = vshrl.u32 %v8263_v37, %v992_v55  ;;  %vm1010_vm5 = vcmp.lt.s32.totalorder %v990_v42, 2  ;;  %v1021_v58 = vsel %vm1009_vm14, %v999_v12, %v1002_v28 }
 0x18f   :  { %v1019_v18 = vsel %vm1011_vm3, %v1002_v28, %v1018_v61  ;;  %v5701_v62 = vsub.s32 %v2701_v7, %v2704_v19  ;;  %v1022_v22 = vsel %vm1012_vm2, %v1008_v41, 1326507024  ;;  %vm2756_vm9 = vcmp.gt.s32.totalorder %v2755_v59, 0 }
 0x190   :  { %v1020_v52 = vsel %vm1010_vm5, %v1017_v50, %v1019_v18  ;;  %v5704_v33 = vor.u32 4788187, %v847_v56  ;;  %v1013_v17 = vsel %vm1009_vm14, %v993_v48, %v996_v10  ;;  %v1015_v27 = vsel %vm1011_vm3, %v999_v12, %v1014_v54 }
 0x191   :  { %v1023_v47 = vsel %vm1011_vm3, %v1005_v60, %v1022_v22  ;;  %v5708_v6 = vmul.u32.u64.low %v1025_v51, %v1020_v52  ;;  %v5709_v55 = vmul.u32.u64.high %v1025_v51, %v1020_v52, %v5708_v6  ;;  %v2757_v1 = vsel %vm2756_vm9, %v2755_v59, 0  ;;  %v94_v60 = vpop.permute.xlu0 %93 }
 0x192   :  { %v1024_v31 = vsel %vm1010_vm5, %v1021_v58, %v1023_v47  ;;  %v2613_v7 = vsub.s32 4294967266, %v5695_v8  ;;  %v3900_v28 = vadd.s32 4294967294, %v941_v38  ;;  %v2707_v10 = vsub.s32 0, %v5701_v62  ;;  %v5734_v47 = vld [vmem:[%s8050_s1] ss:$0 sm:$0xff] }
 0x193   :  { %v5713_v30 = vmul.u32.u64.low %v1025_v51, %v1024_v31  ;;  %v5714_v19 = vmul.u32.u64.high %v1025_v51, %v1024_v31, %v5713_v30  ;;  %v2759_v12 = vand.u32 31, %v2757_v1  ;;  %v2593_v59 = vadd.s32 %v5505_v20, %v5503_v34 }
 0x194   :  { %v1016_v38 = vsel %vm1010_vm5, %v1013_v17, %v1015_v27  ;;  %v2609_v61 = vsub.s32 32, %v5695_v8  ;;  %v1035_v48 = vadd.s32 1, %v5709_v55  ;;  %v8128_v18 = vand.u32 2147483647, %v5634_v15 }
 0x195   :  { %v5727_v58 = vsub.s32 32, %v2759_v12  ;;  %v2610_v52 = vshll.u32 %v5595_v0, %v5695_v8  ;;  %v2614_v22 = vadd.s32 127, %v2613_v7  ;;  %vm3901_vm10 = vcmp.lt.s32.totalorder %v3900_v28, 0 }
 0x196   :  { %v5737_v34 = vmul.f32 %v5734_v47, %v94_v60  ;;  %v3967_v20 = vmin.u32 %v2707_v10, %v5701_v62  ;;  %v1032_v42 = vmul.u32 %v1025_v51, %v1016_v38  ;;  %vm1034_vm11 = vc.u32 %v5714_v19, %v5708_v6 }
 0x197   :  { %v2763_v17 = vshrl.u32 %v8260_v26, %v5727_v58  ;;  %v1036_v0 = vsel %vm1034_vm11, %v1035_v48, %v5709_v55  ;;  %v2762_v8 = vshll.u32 %v8263_v37, %v2759_v12  ;;  %v2765_v27 = vshll.u32 %v8260_v26, %v2759_v12 }
 0x198   :  { %8292 = vst [vmem:[#allocation52_spill] sm:$0xff] %v5737_v34  ;;  %v2766_v31 = vshrl.u32 %v8266_v36, %v5727_v58  ;;  %v5749_v7 = vadd.s32 %v1036_v0, %v1032_v42  ;;  %v5751_v30 = vshrl.u32 %v2757_v1, 5  ;;  %v2768_v51 = vshll.u32 %v8266_v36, %v2759_v12 }
 0x199   :  { %v2769_v10 = vshrl.u32 %v8256_v24, %v5727_v58  ;;  %v2611_v60 = vshrl.u32 %v2593_v59, %v2609_v61  ;;  %v2752_v55 = vand.u32 8388607, %v8128_v18  ;;  %v2764_v38 = vor.u32 %v2763_v17, %v2762_v8 }
 0x19a   :  { %v2767_v48 = vor.u32 %v2766_v31, %v2765_v27  ;;  %v2615_v50 = vshll.u32 %v2614_v22, 23  ;;  %v2771_v56 = vshll.u32 %v8256_v24, %v2759_v12  ;;  %v2772_v42 = vshrl.u32 %v8270_v29, %v5727_v58 }
 0x19b   :  { %v2770_v54 = vor.u32 %v2769_v10, %v2768_v51  ;;  %v5762_v1 = vsel %vm3901_vm10, 0, %v3900_v28  ;;  %v1038_v0 = vadd.s32 536870912, %v5749_v7  ;;  %v2774_v41 = vshll.u32 %v8270_v29, %v2759_v12  ;;  %v179_v10 = vpop.permute.xlu1 %178 }
 0x19c   :  { %v2775_v59 = vshrl.u32 %v8261_v40, %v5727_v58  ;;  %v2709_v61 = vclz %v3967_v20  ;;  %v2773_v17 = vor.u32 %v2772_v42, %v2771_v56  ;;  %vm2777_vm14 = vcmp.lt.s32.totalorder %v5751_v30, 1 }
 0x19d   :  { %v1084_v22 = vand.u32 2139095040, %v5737_v34  ;;  %v2753_v8 = vor.u32 8388608, %v2752_v55  ;;  %vm2780_vm2 = vcmp.lt.s32.totalorder %v5751_v30, 4  ;;  %v2785_v28 = vsel %vm2777_vm14, %v2764_v38, %v2767_v48 }
 0x19e   :  { %v2776_v27 = vor.u32 %v2775_v59, %v2774_v41  ;;  %v949_v31 = vsub.s32 4294967266, %v5762_v1  ;;  %vm2779_vm3 = vcmp.lt.s32.totalorder %v5751_v30, 3  ;;  %v2786_v12 = vsel %vm2780_vm2, %v2773_v17, 920167782 }
 0x19f   :  { %v2789_v56 = vsel %vm2777_vm14, %v2767_v48, %v2770_v54  ;;  %v5779_v20 = vshrl.u32 %v1038_v0, 30  ;;  %vm2778_vm5 = vcmp.lt.s32.totalorder %v5751_v30, 2  ;;  %v2787_v41 = vsel %vm2779_vm3, %v2770_v54, %v2786_v12 }
 0x1a0   :  { %v2790_v51 = vsel %vm2780_vm2, %v2776_v27, 1326507024  ;;  %vm667_vm9 = vcmp.lt.s32.totalorder %v5053_v43, 0  ;;  %vm8151_vm10 = vcmp.lt.s32.totalorder %v5168_v13, 0  ;;  %v3968_v55 = vadd.s32 4294967294, %v2709_v61 }
 0x1a1   :  { %8293 = vst [vmem:[#allocation53_spill] sm:$0xff] %v5779_v20  ;;  %v2788_v42 = vsel %vm2778_vm5, %v2785_v28, %v2787_v41  ;;  %v2791_v0 = vsel %vm2779_vm3, %v2773_v17, %v2790_v51  ;;  %v1085_v59 = vshrl.u32 %v1084_v22, 23  ;;  %v2612_v18 = vor.u32 %v2611_v60, %v2610_v52 }
 0x1a2   :  { %v2616_v16 = vor.u32 4788187, %v2615_v50  ;;  %v2792_v12 = vsel %vm2778_vm5, %v2789_v56, %v2791_v0  ;;  %v5794_v45 = vshll.u32 %v2753_v8, 8  ;;  %v929_v27 = vadd.s32 %v5566_v46, %v5572_v63 }
 0x1a3   :  { %v945_v44 = vsub.s32 32, %v5762_v1  ;;  %v3906_v61 = vadd.s32 4294967169, %v1085_v59  ;;  %v5800_v23 = vmul.f32 %v5734_v47, %v179_v10  ;;  %v950_v28 = vadd.s32 127, %v949_v31 }
 0x1a4   :  { %v1040_v17 = vshll.u32 %v5779_v20, 30  ;;  %v5804_v52 = vmul.u32.u64.low %v5794_v45, %v2788_v42  ;;  %v5805_v50 = vmul.u32.u64.high %v5794_v45, %v2788_v42, %v5804_v52  ;;  %vm3969_vm11 = vcmp.lt.s32.totalorder %v3968_v55, 0 }
 0x1a5   :  { %8294 = vst [vmem:[#allocation54_spill] sm:$0xff] %v5800_v23  ;;  %v5809_v60 = vmul.u32.u64.low %v5794_v45, %v2792_v12  ;;  %v5810_v22 = vmul.u32.u64.high %v5794_v45, %v2792_v12, %v5809_v60  ;;  %v1091_v46 = vadd.s32 1, %v3906_v61  ;;  %v2617_v63 = vand.u32 2147483647, %v2616_v16 }
 0x1a6   :  { %v2619_v8 = vcvt.s32.f32 %v2612_v18  ;;  %v2782_v56 = vsel %vm2780_vm2, %v2770_v54, 2102212464  ;;  %v8136_v31 = vand.u32 2147483647, %v5737_v34  ;;  %v946_v41 = vshll.u32 %v5647_v4, %v5762_v1 }
 0x1a7   :  { %v947_v51 = vshrl.u32 %v929_v27, %v945_v44  ;;  %v2761_v10 = vshrl.u32 %v8263_v37, %v5727_v58  ;;  %vm1092_vm8 = vcmp.gt.s32.totalorder %v1091_v46, 0  ;;  %v951_v42 = vshll.u32 %v950_v28, 23 }
 0x1a8   :  { %v5819_v0 = vsel %vm3969_vm11, 0, %v3968_v55  ;;  %v5822_v59 = vsub.s32 %v5749_v7, %v1040_v17  ;;  %v1093_v16 = vsel %vm1092_vm8, %v1091_v46, 0  ;;  %v2783_v18 = vsel %vm2779_vm3, %v2767_v48, %v2782_v56 }
 0x1a9   :  { %v2781_v54 = vsel %vm2777_vm14, %v2761_v10, %v2764_v38  ;;  %v1095_v12 = vand.u32 31, %v1093_v16  ;;  %v2852_v4 = vand.u32 2139095040, %v5800_v23  ;;  %v8295_v44 = vxor.u32 2147483648, %v5672_v3 }
 0x1aa   :  { %v8297_v7 = vxor.u32 2147483648, %v5674_v2  ;;  %v8299_v38 = vand.u32 2147483647, %v5704_v33  ;;  %v8300_v48 = vcvt.s32.f32 %v5690_v21  ;;  %v5849_v27 = vmul.f32 %v2619_v8, %v2617_v63 }
 0x1ab   :  { %v5834_v58 = vsel %vm667_vm9, %v8295_v44, %v5672_v3  ;;  %v5851_v61 = vor.u32 %v947_v51, %v946_v41  ;;  %v2697_v3 = vadd.s32 %v5639_v53, %v5637_v25  ;;  %v1088_v28 = vand.u32 8388607, %v8136_v31 }
 0x1ac   :  { %8296 = vst [vmem:[#allocation55_spill] sm:$0xff] %v5834_v58  ;;  %v5841_v1 = vsel %vm8151_vm10, %v8297_v7, %v5674_v2  ;;  %v5847_v55 = vmul.f32 %v8300_v48, %v8299_v38  ;;  %v1096_v17 = vsub.s32 32, %v1095_v12  ;;  %v5857_v60 = vor.u32 4788187, %v951_v42 }
 0x1ad   :  { %8298 = vst [vmem:[#allocation56_spill] sm:$0xff] %v5841_v1  ;;  %v2713_v2 = vsub.s32 32, %v5819_v0  ;;  %v1043_v33 = vsub.s32 0, %v5822_v59  ;;  %v2784_v21 = vsel %vm2778_vm5, %v2781_v54, %v2783_v18  ;;  %vm2802_vm8 = vc.u32 %v5810_v22, %v5804_v52 }
 0x1ae   :  { %v2803_v46 = vadd.s32 1, %v5805_v50  ;;  %v1098_v25 = vshll.u32 %v8263_v37, %v1095_v12  ;;  %v2853_v53 = vshrl.u32 %v2852_v4, 23  ;;  %v1099_v63 = vshrl.u32 %v8260_v26, %v1096_v17 }
 0x1af   :  { %v1101_v8 = vshll.u32 %v8260_v26, %v1095_v12  ;;  %v1102_v56 = vshrl.u32 %v8266_v36, %v1096_v17  ;;  %v1105_v41 = vshrl.u32 %v8256_v24, %v1096_v17  ;;  %v1089_v51 = vor.u32 8388608, %v1088_v28 }
 0x1b0   :  { %v1094_v10 = vshrl.u32 %v1093_v16, 5  ;;  %v1107_v30 = vshll.u32 %v8256_v24, %v1095_v12  ;;  %v1108_v42 = vshrl.u32 %v8270_v29, %v1096_v17  ;;  %v1100_v54 = vor.u32 %v1099_v63, %v1098_v25 }
 0x1b1   :  { %v1103_v18 = vor.u32 %v1102_v56, %v1101_v8  ;;  %v1104_v44 = vshll.u32 %v8266_v36, %v1095_v12  ;;  %v2717_v7 = vsub.s32 4294967266, %v5819_v0  ;;  %v2804_v38 = vsel %vm2802_vm8, %v2803_v46, %v5805_v50 }
 0x1b2   :  { %v1109_v48 = vor.u32 %v1108_v42, %v1107_v30  ;;  %v3974_v28 = vadd.s32 4294967169, %v2853_v53  ;;  %v2800_v16 = vmul.u32 %v5794_v45, %v2784_v21  ;;  %v1110_v20 = vshll.u32 %v8270_v29, %v1095_v12 }
 0x1b3   :  { %v1106_v31 = vor.u32 %v1105_v41, %v1104_v44  ;;  %v1111_v25 = vshrl.u32 %v8261_v40, %v1096_v17  ;;  %v2715_v63 = vshrl.u32 %v2697_v3, %v2713_v2  ;;  %v3903_v8 = vmin.u32 %v1043_v33, %v5822_v59 }
 0x1b4   :  { %vm1113_vm14 = vcmp.lt.s32.totalorder %v1094_v10, 1  ;;  %v1129_v56 = vshll.u32 %v1089_v51, 8  ;;  %v5884_v4 = vadd.s32 %v2804_v38, %v2800_v16  ;;  %vm1116_vm2 = vcmp.lt.s32.totalorder %v1094_v10, 4  ;;  %v99_v38 = vpop.permute.xlu0 %98 }
 0x1b5   :  { %v1112_v1 = vor.u32 %v1111_v25, %v1110_v20  ;;  %v1121_v50 = vsel %vm1113_vm14, %v1100_v54, %v1103_v18  ;;  %vm1114_vm3 = vcmp.lt.s32.totalorder %v1094_v10, 2  ;;  %vm1115_vm5 = vcmp.lt.s32.totalorder %v1094_v10, 3 }
 0x1b6   :  { %v1122_v46 = vsel %vm1116_vm2, %v1109_v48, 920167782  ;;  %v2859_v45 = vadd.s32 1, %v3974_v28  ;;  %v1118_v21 = vsel %vm1116_vm2, %v1106_v31, 2102212464  ;;  %v1125_v53 = vsel %vm1113_vm14, %v1103_v18, %v1106_v31 }
 0x1b7   :  { %v1123_v12 = vsel %vm1115_vm5, %v1106_v31, %v1122_v46  ;;  %v1126_v3 = vsel %vm1116_vm2, %v1112_v1, 1326507024  ;;  %v1045_v2 = vclz %v3903_v8  ;;  %v1097_v33 = vshrl.u32 %v8263_v37, %v1096_v17 }
 0x1b8   :  { %v1124_v41 = vsel %vm1114_vm3, %v1121_v50, %v1123_v12  ;;  %v1127_v20 = vsel %vm1115_vm5, %v1109_v48, %v1126_v3  ;;  %v2806_v51 = vadd.s32 536870912, %v5884_v4  ;;  %v1119_v31 = vsel %vm1115_vm5, %v1103_v18, %v1118_v21 }
 0x1b9   :  { %v1128_v30 = vsel %vm1114_vm3, %v1125_v53, %v1127_v20  ;;  %v5894_v42 = vmul.u32.u64.low %v1129_v56, %v1124_v41  ;;  %v5895_v44 = vmul.u32.u64.high %v1129_v56, %v1124_v41, %v5894_v42  ;;  %v1117_v28 = vsel %vm1113_vm14, %v1097_v33, %v1100_v54 }
 0x1ba   :  { %v5900_v1 = vmul.u32.u64.low %v1129_v56, %v1128_v30  ;;  %v5901_v16 = vmul.u32.u64.high %v1129_v56, %v1128_v30, %v5900_v1  ;;  %v2718_v25 = vadd.s32 127, %v2717_v7  ;;  %v8301_v48 = vand.u32 2147483647, %v5800_v23 }
 0x1bb   :  { %vm2860_vm11 = vcmp.gt.s32.totalorder %v2859_v45, 0  ;;  %v2714_v50 = vshll.u32 %v5701_v62, %v5819_v0  ;;  %v3904_v46 = vadd.s32 4294967294, %v1045_v2  ;;  %v5909_v53 = vmul.f32 %v5734_v47, %v99_v38 }
 0x1bc   :  { %v2856_v8 = vand.u32 8388607, %v8301_v48  ;;  %v2861_v12 = vsel %vm2860_vm11, %v2859_v45, 0  ;;  %v5911_v54 = vshrl.u32 %v2806_v51, 30  ;;  %v1120_v18 = vsel %vm1114_vm3, %v1117_v28, %v1119_v31 }
 0x1bd   :  { %8302 = vst [vmem:[#allocation57_spill] sm:$0xff] %v5909_v53  ;;  %v1139_v21 = vadd.s32 1, %v5895_v44  ;;  %v2863_v3 = vand.u32 31, %v2861_v12  ;;  %v5918_v20 = vor.u32 %v2715_v63, %v2714_v50  ;;  %v2719_v62 = vshll.u32 %v2718_v25, 23 }
 0x1be   :  { %8303 = vst [vmem:[#allocation58_spill] sm:$0xff] %v5911_v54  ;;  %vm1138_vm8 = vc.u32 %v5901_v16, %v5894_v42  ;;  %v2857_v0 = vor.u32 8388608, %v2856_v8  ;;  %vm3905_vm14 = vcmp.lt.s32.totalorder %v3904_v46, 0  ;;  %v1136_v10 = vmul.u32 %v1129_v56, %v1120_v18 }
 0x1bf   :  { %v2864_v45 = vsub.s32 32, %v2863_v3  ;;  %v1140_v2 = vsel %vm1138_vm8, %v1139_v21, %v5895_v44  ;;  %v1188_v51 = vand.u32 2139095040, %v5909_v53  ;;  %v2808_v30 = vshll.u32 %v5911_v54, 30 }
 0x1c0   :  { %v2866_v38 = vshll.u32 %v8263_v37, %v2863_v3  ;;  %v5928_v31 = vadd.s32 %v1140_v2, %v1136_v10  ;;  %v2869_v1 = vshll.u32 %v8260_v26, %v2863_v3  ;;  %v2872_v25 = vshll.u32 %v8266_v36, %v2863_v3 }
 0x1c1   :  { %v2867_v28 = vshrl.u32 %v8260_v26, %v2864_v45  ;;  %v2870_v63 = vshrl.u32 %v8266_v36, %v2864_v45  ;;  %v2873_v56 = vshrl.u32 %v8256_v24, %v2864_v45  ;;  %v5933_v48 = vsel %vm3905_vm14, 0, %v3904_v46 }
 0x1c2   :  { %v2862_v44 = vshrl.u32 %v2861_v12, 5  ;;  %v2875_v8 = vshll.u32 %v8256_v24, %v2863_v3  ;;  %v2876_v50 = vshrl.u32 %v8270_v29, %v2864_v45  ;;  %v5937_v18 = vor.u32 4788187, %v2719_v62 }
 0x1c3   :  { %v2868_v21 = vor.u32 %v2867_v28, %v2866_v38  ;;  %v2871_v7 = vor.u32 %v2870_v63, %v2869_v1  ;;  %v2874_v17 = vor.u32 %v2873_v56, %v2872_v25  ;;  %v5940_v10 = vsub.s32 %v5884_v4, %v2808_v30 }
 0x1c4   :  { %v2877_v2 = vor.u32 %v2876_v50, %v2875_v8  ;;  %v2878_v41 = vshll.u32 %v8270_v29, %v2863_v3  ;;  %v2879_v33 = vshrl.u32 %v8261_v40, %v2864_v45  ;;  %v1053_v46 = vsub.s32 4294967266, %v5933_v48  ;;  %v184_v8 = vpop.permute.xlu1 %183 }
 0x1c5   :  { %v1142_v12 = vadd.s32 536870912, %v5928_v31  ;;  %v2897_v54 = vshll.u32 %v2857_v0, 8  ;;  %v1189_v13 = vshrl.u32 %v1188_v51, 23  ;;  %v2865_v62 = vshrl.u32 %v8263_v37, %v2864_v45 }
 0x1c6   :  { %v2880_v58 = vor.u32 %v2879_v33, %v2878_v41  ;;  %vm2881_vm2 = vcmp.lt.s32.totalorder %v2862_v44, 1  ;;  %vm2884_vm3 = vcmp.lt.s32.totalorder %v2862_v44, 4  ;;  %vm2883_vm5 = vcmp.lt.s32.totalorder %v2862_v44, 3 }
 0x1c7   :  { %v2886_v38 = vsel %vm2884_vm3, %v2874_v17, 2102212464  ;;  %v2889_v4 = vsel %vm2881_vm2, %v2868_v21, %v2871_v7  ;;  %v2890_v30 = vsel %vm2884_vm3, %v2877_v2, 920167782  ;;  %v2811_v28 = vsub.s32 0, %v5940_v10 }
 0x1c8   :  { %vm2882_vm11 = vcmp.lt.s32.totalorder %v2862_v44, 2  ;;  %v2891_v3 = vsel %vm2883_vm5, %v2874_v17, %v2890_v30  ;;  %v2893_v63 = vsel %vm2881_vm2, %v2871_v7, %v2874_v17  ;;  %vm8171_vm8 = vcmp.lt.s32.totalorder %v5235_v11, 0 }
 0x1c9   :  { %vm8150_vm14 = vcmp.lt.s32.totalorder %v5357_v32, 0  ;;  %v5950_v0 = vshrl.u32 %v1142_v12, 30  ;;  %v2885_v51 = vsel %vm2881_vm2, %v2865_v62, %v2868_v21  ;;  %v2892_v33 = vsel %vm2882_vm11, %v2889_v4, %v2891_v3 }
 0x1ca   :  { %v2894_v41 = vsel %vm2884_vm3, %v2880_v58, 1326507024  ;;  %v2887_v45 = vsel %vm2883_vm5, %v2871_v7, %v2886_v38  ;;  %v5953_v25 = vmul.u32.u64.low %v2897_v54, %v2892_v33  ;;  %v5954_v56 = vmul.u32.u64.high %v2897_v54, %v2892_v33, %v5953_v25 }
 0x1cb   :  { %8304 = vst [vmem:[#allocation59_spill] sm:$0xff] %v5950_v0  ;;  %v2895_v1 = vsel %vm2883_vm5, %v2877_v2, %v2894_v41  ;;  %v1049_v50 = vsub.s32 32, %v5933_v48  ;;  %v1054_v17 = vadd.s32 127, %v1053_v46  ;;  %v3910_v43 = vadd.s32 4294967169, %v1189_v13 }
 0x1cc   :  { %v2896_v30 = vsel %vm2882_vm11, %v2893_v63, %v2895_v1  ;;  %v1033_v12 = vadd.s32 %v5708_v6, %v5714_v19  ;;  %v3971_v21 = vmin.u32 %v2811_v28, %v5940_v10  ;;  %v1144_v7 = vshll.u32 %v5950_v0, 30 }
 0x1cd   :  { %v5962_v62 = vmul.u32.u64.low %v2897_v54, %v2896_v30  ;;  %v5963_v58 = vmul.u32.u64.high %v2897_v54, %v2896_v30, %v5962_v62  ;;  %v2888_v2 = vsel %vm2882_vm11, %v2885_v51, %v2887_v45  ;;  %v1195_v38 = vadd.s32 1, %v3910_v43 }
 0x1ce   :  { %v5968_v4 = vmul.f32 %v5734_v47, %v184_v8  ;;  %v8306_v46 = vand.u32 2147483647, %v5857_v60  ;;  %v8307_v13 = vcvt.s32.f32 %v5851_v61  ;;  %v2721_v6 = vand.u32 2147483647, %v5937_v18 }
 0x1cf   :  { %v2723_v19 = vcvt.s32.f32 %v5918_v20  ;;  %v2907_v28 = vadd.s32 1, %v5954_v56  ;;  %v1051_v63 = vshrl.u32 %v1033_v12, %v1049_v50  ;;  %v1055_v33 = vshll.u32 %v1054_v17, 23 }
 0x1d0   :  { %8305 = vst [vmem:[#allocation60_spill] sm:$0xff] %v5968_v4  ;;  %v5974_v3 = vmul.f32 %v8307_v13, %v8306_v46  ;;  %v8145_v44 = vand.u32 2147483647, %v5909_v53  ;;  %vm1196_vm2 = vcmp.gt.s32.totalorder %v1195_v38, 0  ;;  %v2813_v43 = vclz %v3971_v21 }
 0x1d1   :  { %v2904_v51 = vmul.u32 %v2897_v54, %v2888_v2  ;;  %vm2906_vm3 = vc.u32 %v5963_v58, %v5953_v25  ;;  %v1197_v60 = vsel %vm1196_vm2, %v1195_v38, 0  ;;  %v5983_v61 = vsub.s32 %v5928_v31, %v1144_v7 }
 0x1d2   :  { %v2908_v18 = vsel %vm2906_vm3, %v2907_v28, %v5954_v56  ;;  %v1199_v41 = vand.u32 31, %v1197_v60  ;;  %v2956_v20 = vand.u32 2139095040, %v5968_v4  ;;  %v8308_v45 = vxor.u32 2147483648, %v5847_v55 }
 0x1d3   :  { %v8310_v54 = vxor.u32 2147483648, %v5849_v27  ;;  %v1050_v31 = vshll.u32 %v5822_v59, %v5933_v48  ;;  %v2909_v56 = vadd.s32 %v2908_v18, %v2904_v51  ;;  %v6004_v17 = vmul.f32 %v2723_v19, %v2721_v6 }
 0x1d4   :  { %v5992_v1 = vsel %vm8171_vm8, %v8308_v45, %v5847_v55  ;;  %v1192_v30 = vand.u32 8388607, %v8145_v44  ;;  %v1200_v55 = vsub.s32 32, %v1199_v41  ;;  %v6010_v21 = vor.u32 4788187, %v1055_v33 }
 0x1d5   :  { %8309 = vst [vmem:[#allocation61_spill] sm:$0xff] %v5992_v1  ;;  %v5999_v8 = vsel %vm8150_vm14, %v8310_v54, %v5849_v27  ;;  %v6008_v12 = vor.u32 %v1051_v63, %v1050_v31  ;;  %v3972_v62 = vadd.s32 4294967294, %v2813_v43  ;;  %v2910_v7 = vadd.s32 536870912, %v2909_v56  ;;  %v104_v43 = vpop.permute.xlu0 %103 }
 0x1d6   :  { %8311 = vst [vmem:[#allocation62_spill] sm:$0xff] %v5999_v8  ;;  %v1147_v27 = vsub.s32 0, %v5983_v61  ;;  %v1203_v2 = vshrl.u32 %v8260_v26, %v1200_v55  ;;  %v1206_v59 = vshrl.u32 %v8266_v36, %v1200_v55  ;;  %v2957_v48 = vshrl.u32 %v2956_v20, 23 }
 0x1d7   :  { %v6015_v38 = vshrl.u32 %v2910_v7, 30  ;;  %v1202_v46 = vshll.u32 %v8263_v37, %v1199_v41  ;;  %v1205_v13 = vshll.u32 %v8260_v26, %v1199_v41  ;;  %v1209_v6 = vshrl.u32 %v8256_v24, %v1200_v55 }
 0x1d8   :  { %v1198_v19 = vshrl.u32 %v1197_v60, 5  ;;  %v1208_v28 = vshll.u32 %v8266_v36, %v1199_v41  ;;  %v1211_v63 = vshll.u32 %v8256_v24, %v1199_v41  ;;  %v1212_v33 = vshrl.u32 %v8270_v29, %v1200_v55 }
 0x1d9   :  { %8312 = vst [vmem:[#allocation63_spill] sm:$0xff] %v6015_v38  ;;  %v2912_v51 = vshll.u32 %v6015_v38, 30  ;;  %v1193_v18 = vor.u32 8388608, %v1192_v30  ;;  %v1204_v20 = vor.u32 %v1203_v2, %v1202_v46  ;;  %v1207_v45 = vor.u32 %v1206_v59, %v1205_v13 }
 0x1da   :  { %v1210_v54 = vor.u32 %v1209_v6, %v1208_v28  ;;  %v1213_v31 = vor.u32 %v1212_v33, %v1211_v63  ;;  %v1214_v7 = vshll.u32 %v8270_v29, %v1199_v41  ;;  %v1215_v44 = vshrl.u32 %v8261_v40, %v1200_v55 }
 0x1db   :  { %v1057_v60 = vand.u32 2147483647, %v6010_v21  ;;  %vm3973_vm5 = vcmp.lt.s32.totalorder %v3972_v62, 0  ;;  %v3907_v50 = vmin.u32 %v1147_v27, %v5983_v61  ;;  %v6029_v0 = vmul.f32 %v5734_v47, %v104_v43 }
 0x1dc   :  { %vm8157_vm11 = vcmp.lt.s32.totalorder %v5437_v14, 0  ;;  %v6032_v38 = vsub.s32 %v2909_v56, %v2912_v51  ;;  %v1216_v30 = vor.u32 %v1215_v44, %v1214_v7  ;;  %vm1217_vm2 = vcmp.lt.s32.totalorder %v1198_v19, 1 }
 0x1dd   :  { %8313 = vst [vmem:[#allocation64_spill] sm:$0xff] %v6029_v0  ;;  %v3978_v2 = vadd.s32 4294967169, %v2957_v48  ;;  %vm1219_vm3 = vcmp.lt.s32.totalorder %v1198_v19, 3  ;;  %vm1220_vm14 = vcmp.lt.s32.totalorder %v1198_v19, 4  ;;  %v1225_v41 = vsel %vm1217_vm2, %v1204_v20, %v1207_v45 }
 0x1de   :  { %v1233_v59 = vshll.u32 %v1193_v18, 8  ;;  %v1222_v46 = vsel %vm1220_vm14, %v1210_v54, 2102212464  ;;  %v1226_v21 = vsel %vm1220_vm14, %v1213_v31, 920167782  ;;  %v1229_v13 = vsel %vm1217_vm2, %v1207_v45, %v1210_v54 }
 0x1df   :  { %v1230_v27 = vsel %vm1220_vm14, %v1216_v30, 1326507024  ;;  %v1149_v6 = vclz %v3907_v50  ;;  %v1201_v28 = vshrl.u32 %v8263_v37, %v1200_v55  ;;  %vm1218_vm10 = vcmp.lt.s32.totalorder %v1198_v19, 2 }
 0x1e0   :  { %v1227_v56 = vsel %vm1219_vm3, %v1210_v54, %v1226_v21  ;;  %v2915_v44 = vsub.s32 0, %v6032_v38  ;;  %v1231_v63 = vsel %vm1219_vm3, %v1213_v31, %v1230_v27  ;;  %v2963_v33 = vadd.s32 1, %v3978_v2 }
 0x1e1   :  { %v1228_v48 = vsel %vm1218_vm10, %v1225_v41, %v1227_v56  ;;  %v1221_v43 = vsel %vm1217_vm2, %v1201_v28, %v1204_v20  ;;  %v1223_v51 = vsel %vm1219_vm3, %v1207_v45, %v1222_v46  ;;  %v1232_v18 = vsel %vm1218_vm10, %v1229_v13, %v1231_v63 }
 0x1e2   :  { %v1292_v50 = vand.u32 2139095040, %v6029_v0  ;;  %v6045_v7 = vmul.u32.u64.low %v1233_v59, %v1232_v18  ;;  %v6046_v55 = vmul.u32.u64.high %v1233_v59, %v1232_v18, %v6045_v7  ;;  %v1059_v41 = vcvt.s32.f32 %v6008_v12 }
 0x1e3   :  { %v6048_v30 = vmul.u32.u64.low %v1233_v59, %v1228_v48  ;;  %v6049_v54 = vmul.u32.u64.high %v1233_v59, %v1228_v48, %v6048_v30  ;;  %v6054_v31 = vsel %vm3973_vm5, 0, %v3972_v62  ;;  %v8152_v20 = vand.u32 2147483647, %v5968_v4 }
 0x1e4   :  { %vm2964_vm14 = vcmp.gt.s32.totalorder %v2963_v33, 0  ;;  %v3908_v45 = vadd.s32 4294967294, %v1149_v6  ;;  %v3975_v2 = vmin.u32 %v2915_v44, %v6032_v38  ;;  %v1224_v46 = vsel %vm1218_vm10, %v1221_v43, %v1223_v51 }
 0x1e5   :  { %v2965_v21 = vsel %vm2964_vm14, %v2963_v33, 0  ;;  %v8314_v13 = vxor.u32 2147483648, %v5974_v3  ;;  %v1293_v28 = vshrl.u32 %v1292_v50, 23  ;;  %v6067_v56 = vmul.f32 %v1059_v41, %v1057_v60 }
 0x1e6   :  { %v2967_v62 = vand.u32 31, %v2965_v21  ;;  %v6071_v6 = vadd.s32 %v5804_v52, %v5810_v22  ;;  %vm1242_vm10 = vc.u32 %v6046_v55, %v6048_v30  ;;  %v1243_v19 = vadd.s32 1, %v6049_v54 }
 0x1e7   :  { %v6064_v27 = vsel %vm8157_vm11, %v8314_v13, %v5974_v3  ;;  %v2821_v3 = vsub.s32 4294967266, %v6054_v31  ;;  %v1240_v48 = vmul.u32 %v1233_v59, %v1224_v46  ;;  %vm3909_vm5 = vcmp.lt.s32.totalorder %v3908_v45, 0 }
 0x1e8   :  { %8315 = vst [vmem:[#allocation65_spill] sm:$0xff] %v6064_v27  ;;  %v2968_v63 = vsub.s32 32, %v2967_v62  ;;  %v2917_v33 = vclz %v3975_v2  ;;  %v1244_v60 = vsel %vm1242_vm10, %v1243_v19, %v6049_v54  ;;  %v2960_v43 = vand.u32 8388607, %v8152_v20 }
 0x1e9   :  { %v1245_v52 = vadd.s32 %v1244_v60, %v1240_v48  ;;  %v2970_v22 = vshll.u32 %v8263_v37, %v2967_v62  ;;  %v2973_v51 = vshll.u32 %v8260_v26, %v2967_v62  ;;  %v3914_v18 = vadd.s32 4294967169, %v1293_v28 }
 0x1ea   :  { %v2971_v50 = vshrl.u32 %v8260_v26, %v2968_v63  ;;  %v2974_v7 = vshrl.u32 %v8266_v36, %v2968_v63  ;;  %v2976_v59 = vshll.u32 %v8266_v36, %v2967_v62  ;;  %v2977_v41 = vshrl.u32 %v8256_v24, %v2968_v63 }
 0x1eb   :  { %v1246_v2 = vadd.s32 536870912, %v1245_v52  ;;  %v2966_v46 = vshrl.u32 %v2965_v21, 5  ;;  %v2979_v54 = vshll.u32 %v8256_v24, %v2967_v62  ;;  %v2980_v13 = vshrl.u32 %v8270_v29, %v2968_v63 }
 0x1ec   :  { %v6089_v19 = vadd.s32 127, %v2821_v3  ;;  %v2972_v48 = vor.u32 %v2971_v50, %v2970_v22  ;;  %v2975_v60 = vor.u32 %v2974_v7, %v2973_v51  ;;  %v2978_v20 = vor.u32 %v2977_v41, %v2976_v59  ;;  %v3592_v3 = vld [vmem:[%s8051_s2 + $0x78] sm:$0xff] }
 0x1ed   :  { %v6092_v28 = vsel %vm3909_vm5, 0, %v3908_v45  ;;  %v6094_v12 = vshrl.u32 %v1246_v2, 30  ;;  %v2961_v44 = vor.u32 8388608, %v2960_v43  ;;  %v2981_v8 = vor.u32 %v2980_v13, %v2979_v54  ;;  %4051 = vmatprep.subr.mxu0 %v3592_v3  ;;  %4131 = vmatprep.subr.mxu1 %v3592_v3 }
 0x1ee   :  { %v3976_v32 = vadd.s32 4294967294, %v2917_v33  ;;  %v2982_v27 = vshll.u32 %v8270_v29, %v2967_v62  ;;  %v2983_v21 = vshrl.u32 %v8261_v40, %v2968_v63  ;;  %v1299_v14 = vadd.s32 1, %v3914_v18  ;;  %4052 = vmatpush3.msra.mxu0 %v3592_v3  ;;  %4147 = vmatpush3.msra.mxu1 %v3592_v3 }
 0x1ef   :  { %8316 = vst [vmem:[#allocation66_spill] sm:$0xff] %v6094_v12  ;;  %v1248_v22 = vshll.u32 %v6094_v12, 30  ;;  %vm2985_vm2 = vcmp.lt.s32.totalorder %v2966_v46, 1  ;;  %vm2987_vm3 = vcmp.lt.s32.totalorder %v2966_v46, 3  ;;  %vm2988_vm14 = vcmp.lt.s32.totalorder %v2966_v46, 4 }
 0x1f0   :  { %v2984_v45 = vor.u32 %v2983_v21, %v2982_v27  ;;  %v2990_v43 = vsel %vm2988_vm14, %v2978_v20, 2102212464  ;;  %v2993_v33 = vsel %vm2985_vm2, %v2972_v48, %v2975_v60  ;;  %v2994_v62 = vsel %vm2988_vm14, %v2981_v8, 920167782 }
 0x1f1   :  { %v2969_v51 = vshrl.u32 %v8263_v37, %v2968_v63  ;;  %vm2986_vm10 = vcmp.lt.s32.totalorder %v2966_v46, 2  ;;  %v2995_v18 = vsel %vm2987_vm3, %v2978_v20, %v2994_v62  ;;  %v3001_v50 = vshll.u32 %v2961_v44, 8  ;;  %v109_v44 = vpop.permute.xlu0 %108 }
 0x1f2   :  { %vm3977_vm5 = vcmp.lt.s32.totalorder %v3976_v32, 0  ;;  %v2996_v7 = vsel %vm2986_vm10, %v2993_v33, %v2995_v18  ;;  %v2997_v59 = vsel %vm2985_vm2, %v2975_v60, %v2978_v20  ;;  %v2998_v27 = vsel %vm2988_vm14, %v2984_v45, 1326507024 }
 0x1f3   :  { %v6110_v41 = vsub.s32 %v1245_v52, %v1248_v22  ;;  %v2989_v2 = vsel %vm2985_vm2, %v2969_v51, %v2972_v48  ;;  %v2991_v54 = vsel %vm2987_vm3, %v2975_v60, %v2990_v43  ;;  %v2999_v13 = vsel %vm2987_vm3, %v2981_v8, %v2998_v27 }
 0x1f4   :  { %v3000_v63 = vsel %vm2986_vm10, %v2997_v59, %v2999_v13  ;;  %v6116_v21 = vmul.u32.u64.low %v3001_v50, %v2996_v7  ;;  %v6117_v3 = vmul.u32.u64.high %v3001_v50, %v2996_v7, %v6116_v21  ;;  %vm1300_vm11 = vcmp.gt.s32.totalorder %v1299_v14, 0 }
 0x1f5   :  { %v6121_v20 = vmul.u32.u64.low %v3001_v50, %v3000_v63  ;;  %v6122_v33 = vmul.u32.u64.high %v3001_v50, %v3000_v63, %v6121_v20  ;;  %v8158_v52 = vand.u32 2147483647, %v6029_v0  ;;  %v1153_v48 = vsub.s32 32, %v6092_v28 }
 0x1f6   :  { %v6126_v22 = vsel %vm3977_vm5, 0, %v3976_v32  ;;  %v2992_v8 = vsel %vm2986_vm10, %v2989_v2, %v2991_v54  ;;  %v1301_v60 = vsel %vm1300_vm11, %v1299_v14, 0  ;;  %v1157_v43 = vsub.s32 4294967266, %v6092_v28  ;;  %v189_v54 = vpop.permute.xlu1 %188 }
 0x1f7   :  { %v1251_v62 = vsub.s32 0, %v6110_v41  ;;  %v1303_v51 = vand.u32 31, %v1301_v60  ;;  %v8317_v18 = vsub.s32 32, %v6054_v31  ;;  %v1137_v32 = vadd.s32 %v5894_v42, %v5901_v16 }
 0x1f8   :  { %v3011_v14 = vadd.s32 1, %v6117_v3  ;;  %v2925_v46 = vsub.s32 4294967266, %v6126_v22  ;;  %v3008_v27 = vmul.u32 %v3001_v50, %v2992_v8  ;;  %vm3010_vm11 = vc.u32 %v6122_v33, %v6116_v21 }
 0x1f9   :  { %v6136_v7 = vshrl.u32 %v6071_v6, %v8317_v18  ;;  %v1304_v2 = vsub.s32 32, %v1303_v51  ;;  %v6145_v13 = vshrl.u32 %v1137_v32, %v1153_v48  ;;  %v2905_v6 = vadd.s32 %v5953_v25, %v5963_v58 }
 0x1fa   :  { %v3012_v63 = vsel %vm3010_vm11, %v3011_v14, %v6117_v3  ;;  %v1296_v42 = vand.u32 8388607, %v8158_v52  ;;  %v6152_v16 = vadd.s32 127, %v1157_v43  ;;  %v3911_v20 = vmin.u32 %v1251_v62, %v6110_v41 }
 0x1fb   :  { %v3013_v50 = vadd.s32 %v3012_v63, %v3008_v27  ;;  %v1307_v8 = vshrl.u32 %v8260_v26, %v1304_v2  ;;  %v2921_v18 = vsub.s32 32, %v6126_v22  ;;  %v1310_v48 = vshrl.u32 %v8266_v36, %v1304_v2 }
 0x1fc   :  { %v1313_v32 = vshrl.u32 %v8256_v24, %v1304_v2  ;;  %v6160_v25 = vmul.f32 %v5734_v47, %v189_v54  ;;  %v2926_v58 = vadd.s32 127, %v2925_v46  ;;  %v1302_v3 = vshrl.u32 %v1301_v60, 5 }
 0x1fd   :  { %v1306_v14 = vshll.u32 %v8263_v37, %v1303_v51  ;;  %v1309_v43 = vshll.u32 %v8260_v26, %v1303_v51  ;;  %v3014_v52 = vadd.s32 536870912, %v3013_v50  ;;  %v1312_v62 = vshll.u32 %v8266_v36, %v1303_v51 }
 0x1fe   :  { %8318 = vst [vmem:[#allocation67_spill] sm:$0xff] %v6160_v25  ;;  %v1315_v27 = vshll.u32 %v8256_v24, %v1303_v51  ;;  %v1316_v63 = vshrl.u32 %v8270_v29, %v1304_v2  ;;  %v1159_v59 = vshll.u32 %v6152_v16, 23  ;;  %v1253_v45 = vclz %v3911_v20 }
 0x1ff   :  { %v1308_v12 = vor.u32 %v1307_v8, %v1306_v14  ;;  %v1311_v54 = vor.u32 %v1310_v48, %v1309_v43  ;;  %v1314_v1 = vor.u32 %v1313_v32, %v1312_v62  ;;  %v1318_v60 = vshll.u32 %v8270_v29, %v1303_v51 }
 0x200   :  { %v1317_v46 = vor.u32 %v1316_v63, %v1315_v27  ;;  %v1319_v11 = vshrl.u32 %v8261_v40, %v1304_v2  ;;  %v2923_v9 = vshrl.u32 %v2905_v6, %v2921_v18  ;;  %v2927_v39 = vshll.u32 %v2926_v58, 23 }
 0x201   :  { %v1297_v57 = vor.u32 8388608, %v1296_v42  ;;  %v6171_v35 = vmul.f32 %v5734_v47, %v109_v44  ;;  %v6173_v0 = vshrl.u32 %v3014_v52, 30  ;;  %vm1321_vm2 = vcmp.lt.s32.totalorder %v1302_v3, 1 }
 0x202   :  { %v1320_v4 = vor.u32 %v1319_v11, %v1318_v60  ;;  %v3060_v16 = vand.u32 2139095040, %v6160_v25  ;;  %v3912_v20 = vadd.s32 4294967294, %v1253_v45  ;;  %vm1323_vm3 = vcmp.lt.s32.totalorder %v1302_v3, 3 }
 0x203   :  { %8319 = vst [vmem:[#allocation68_spill] sm:$0xff] %v6171_v35  ;;  %8320 = vst [vmem:[#allocation69_spill] sm:$0xff] %v6173_v0  ;;  %vm1324_vm14 = vcmp.lt.s32.totalorder %v1302_v3, 4  ;;  %v1329_v8 = vsel %vm1321_vm2, %v1308_v12, %v1311_v54  ;;  %v1333_v6 = vsel %vm1321_vm2, %v1311_v54, %v1314_v1  ;;  %v1305_v42 = vshrl.u32 %v8263_v37, %v1304_v2 }
 0x204   :  { %v1326_v51 = vsel %vm1324_vm14, %v1314_v1, 2102212464  ;;  %v1330_v48 = vsel %vm1324_vm14, %v1317_v46, 920167782  ;;  %v1334_v18 = vsel %vm1324_vm14, %v1320_v4, 1326507024  ;;  %v2922_v60 = vshll.u32 %v6032_v38, %v6126_v22 }
 0x205   :  { %vm1322_vm10 = vcmp.lt.s32.totalorder %v1302_v3, 2  ;;  %v1331_v47 = vsel %vm1323_vm3, %v1314_v1, %v1330_v48  ;;  %v1337_v44 = vshll.u32 %v1297_v57, 8  ;;  %v3016_v11 = vshll.u32 %v6173_v0, 30 }
 0x206   :  { %v1332_v52 = vsel %vm1322_vm10, %v1329_v8, %v1331_v47  ;;  %v1335_v45 = vsel %vm1323_vm3, %v1317_v46, %v1334_v18  ;;  %v3061_v32 = vshrl.u32 %v3060_v16, 23  ;;  %vm3913_vm5 = vcmp.lt.s32.totalorder %v3912_v20, 0 }
 0x207   :  { %v1325_v58 = vsel %vm1321_vm2, %v1305_v42, %v1308_v12  ;;  %v1327_v14 = vsel %vm1323_vm3, %v1311_v54, %v1326_v51  ;;  %v1336_v4 = vsel %vm1322_vm10, %v1333_v6, %v1335_v45  ;;  %v8321_v57 = vshll.u32 %v5940_v10, %v6054_v31 }
 0x208   :  { %v6186_v43 = vmul.u32.u64.low %v1337_v44, %v1336_v4  ;;  %v6187_v2 = vmul.u32.u64.high %v1337_v44, %v1336_v4, %v6186_v43  ;;  %v6189_v62 = vmul.u32.u64.low %v1337_v44, %v1332_v52  ;;  %v6190_v1 = vmul.u32.u64.high %v1337_v44, %v1332_v52, %v6189_v62 }
 0x209   :  { %v6197_v27 = vor.u32 %v6136_v7, %v8321_v57  ;;  %v8322_v63 = vshll.u32 %v6089_v19, 23  ;;  %v1154_v54 = vshll.u32 %v5983_v61, %v6092_v28  ;;  %v3982_v46 = vadd.s32 4294967169, %v3061_v32 }
 0x20a   :  { %v1256_v16 = vsel %vm3913_vm5, 0, %v3912_v20  ;;  %v6207_v8 = vsub.s32 %v3013_v50, %v3016_v11  ;;  %v1328_v51 = vsel %vm1322_vm10, %v1325_v58, %v1327_v14  ;;  %v6213_v31 = vor.u32 4788187, %v1159_v59 }
 0x20b   :  { %v6201_v12 = vor.u32 4788187, %v8322_v63  ;;  %v6211_v10 = vor.u32 %v6145_v13, %v1154_v54  ;;  %v3067_v19 = vadd.s32 1, %v3982_v46  ;;  %v1396_v7 = vand.u32 2139095040, %v6171_v35 }
 0x20c   :  { %v6216_v48 = vor.u32 %v2923_v9, %v2922_v60  ;;  %v6218_v61 = vor.u32 4788187, %v2927_v39  ;;  %vm1346_vm11 = vc.u32 %v6187_v2, %v6189_v62  ;;  %v1347_v38 = vadd.s32 1, %v6190_v1 }
 0x20d   :  { %v1257_v28 = vsub.s32 32, %v1256_v16  ;;  %v1344_v22 = vmul.u32 %v1337_v44, %v1328_v51  ;;  %v8174_v50 = vand.u32 2147483647, %v6160_v25  ;;  %vm3068_vm2 = vcmp.gt.s32.totalorder %v3067_v19, 0 }
 0x20e   :  { %v1261_v13 = vsub.s32 4294967266, %v1256_v16  ;;  %v3019_v59 = vsub.s32 0, %v6207_v8  ;;  %v1348_v3 = vsel %vm1346_vm11, %v1347_v38, %v6190_v1  ;;  %v3069_v20 = vsel %vm3068_vm2, %v3067_v19, 0  ;;  %v3591_v38 = vld [vmem:[%s8051_s2 + $0x70] sm:$0xff] }
 0x20f   :  { %v2825_v9 = vand.u32 2147483647, %v6201_v12  ;;  %v2827_v39 = vcvt.s32.f32 %v6197_v27  ;;  %v6228_v6 = vadd.s32 %v1348_v3, %v1344_v22  ;;  %v1397_v18 = vshrl.u32 %v1396_v7, 23  ;;  %4053 = vmatprep.subr.mxu0 %v3591_v38  ;;  %4132 = vmatprep.subr.mxu1 %v3591_v38 }
 0x210   :  { %v1161_v42 = vand.u32 2147483647, %v6213_v31  ;;  %v1163_v47 = vcvt.s32.f32 %v6211_v10  ;;  %v1241_v44 = vadd.s32 %v6048_v30, %v6046_v55  ;;  %v3071_v11 = vand.u32 31, %v3069_v20  ;;  %4054 = vmatpush3.msra.mxu0 %v3591_v38  ;;  %4148 = vmatpush3.msra.mxu1 %v3591_v38 }
 0x211   :  { %v2929_v52 = vand.u32 2147483647, %v6218_v61  ;;  %v2931_v45 = vcvt.s32.f32 %v6216_v48  ;;  %v1258_v32 = vshll.u32 %v6110_v41, %v1256_v16  ;;  %v3064_v58 = vand.u32 8388607, %v8174_v50  ;;  %v6343_v61 = vld [vmem:[%s8050_s1] ss:$0 sm:$0xff] }
 0x212   :  { %v1259_v14 = vshrl.u32 %v1241_v44, %v1257_v28  ;;  %v1262_v4 = vadd.s32 127, %v1261_v13  ;;  %v3979_v43 = vmin.u32 %v3019_v59, %v6207_v8  ;;  %v3072_v1 = vsub.s32 32, %v3071_v11 }
 0x213   :  { %v1350_v57 = vadd.s32 536870912, %v6228_v6  ;;  %v3074_v63 = vshll.u32 %v8263_v37, %v3071_v11  ;;  %v3077_v55 = vshll.u32 %v8260_v26, %v3071_v11  ;;  %v3918_v30 = vadd.s32 4294967169, %v1397_v18 }
 0x214   :  { %v3075_v54 = vshrl.u32 %v8260_v26, %v3072_v1  ;;  %v3078_v46 = vshrl.u32 %v8266_v36, %v3072_v1  ;;  %v3080_v41 = vshll.u32 %v8266_v36, %v3071_v11  ;;  %v3081_v60 = vshrl.u32 %v8256_v24, %v3072_v1 }
 0x215   :  { %v6247_v16 = vshrl.u32 %v3069_v20, 5  ;;  %v3083_v51 = vshll.u32 %v8256_v24, %v3071_v11  ;;  %v3084_v19 = vshrl.u32 %v8270_v29, %v3072_v1  ;;  %v8175_v7 = vand.u32 2147483647, %v6171_v35 }
 0x216   :  { %v6255_v28 = vor.u32 %v1259_v14, %v1258_v32  ;;  %v3076_v22 = vor.u32 %v3075_v54, %v3074_v63  ;;  %v3079_v13 = vor.u32 %v3078_v46, %v3077_v55  ;;  %v3082_v59 = vor.u32 %v3081_v60, %v3080_v41  ;;  %v3590_v32 = vld [vmem:[%s8051_s2 + $0x68] sm:$0xff] }
 0x217   :  { %vm8172_vm3 = vcmp.lt.s32.totalorder %v5491_v49, 0  ;;  %vm8173_vm14 = vcmp.lt.s32.totalorder %v5603_v5, 0  ;;  %v6259_v3 = vshrl.u32 %v1350_v57, 30  ;;  %v3085_v20 = vor.u32 %v3084_v19, %v3083_v51  ;;  %4055 = vmatprep.subr.mxu0 %v3590_v32  ;;  %4133 = vmatprep.subr.mxu1 %v3590_v32 }
 0x218   :  { %v3086_v18 = vshll.u32 %v8270_v29, %v3071_v11  ;;  %v3087_v44 = vshrl.u32 %v8261_v40, %v3072_v1  ;;  %v1263_v14 = vshll.u32 %v1262_v4, 23  ;;  %v3021_v63 = vclz %v3979_v43  ;;  %4056 = vmatpush3.msra.mxu0 %v3590_v32  ;;  %4149 = vmatpush3.msra.mxu1 %v3590_v32 }
 0x219   :  { %8323 = vst [vmem:[#allocation70_spill] sm:$0xff] %v6259_v3  ;;  %v3065_v55 = vor.u32 8388608, %v3064_v58  ;;  %v1403_v54 = vadd.s32 1, %v3918_v30  ;;  %v3073_v57 = vshrl.u32 %v8263_v37, %v3072_v1  ;;  %vm3089_vm10 = vcmp.lt.s32.totalorder %v6247_v16, 1 }
 0x21a   :  { %v3088_v46 = vor.u32 %v3087_v44, %v3086_v18  ;;  %vm3092_vm5 = vcmp.lt.s32.totalorder %v6247_v16, 4  ;;  %vm3091_vm11 = vcmp.lt.s32.totalorder %v6247_v16, 3  ;;  %v3097_v4 = vsel %vm3089_vm10, %v3076_v22, %v3079_v13 }
 0x21b   :  { %v3094_v11 = vsel %vm3092_vm5, %v3082_v59, 2102212464  ;;  %v3098_v43 = vsel %vm3092_vm5, %v3085_v20, 920167782  ;;  %v1352_v58 = vshll.u32 %v6259_v3, 30  ;;  %vm3090_vm2 = vcmp.lt.s32.totalorder %v6247_v16, 2 }
 0x21c   :  { %v3099_v1 = vsel %vm3091_vm11, %v3082_v59, %v3098_v43  ;;  %v3101_v30 = vsel %vm3089_vm10, %v3079_v13, %v3082_v59  ;;  %v3102_v60 = vsel %vm3092_vm5, %v3088_v46, 1326507024  ;;  %v3105_v51 = vshll.u32 %v3065_v55, 8 }
 0x21d   :  { %v3100_v41 = vsel %vm3090_vm2, %v3097_v4, %v3099_v1  ;;  %vm1404_vm8 = vcmp.gt.s32.totalorder %v1403_v54, 0  ;;  %v6280_v19 = vor.u32 4788187, %v1263_v14  ;;  %v3093_v38 = vsel %vm3089_vm10, %v3073_v57, %v3076_v22 }
 0x21e   :  { %v3095_v18 = vsel %vm3091_vm11, %v3079_v13, %v3094_v11  ;;  %v3103_v44 = vsel %vm3091_vm11, %v3085_v20, %v3102_v60  ;;  %v6290_v32 = vmul.u32.u64.low %v3105_v51, %v3100_v41  ;;  %v6291_v43 = vmul.u32.u64.high %v3105_v51, %v3100_v41, %v6290_v32  ;;  %v194_v11 = vpop.permute.xlu1 %193 }
 0x21f   :  { %v3104_v59 = vsel %vm3090_vm2, %v3101_v30, %v3103_v44  ;;  %v1405_v55 = vsel %vm1404_vm8, %v1403_v54, 0  ;;  %v3980_v46 = vadd.s32 4294967294, %v3021_v63  ;;  %v6295_v14 = vsub.s32 %v6228_v6, %v1352_v58  ;;  %v114_v58 = vpop.permute.xlu0 %113 }
 0x220   :  { %v6297_v4 = vmul.u32.u64.low %v3105_v51, %v3104_v59  ;;  %v6298_v22 = vmul.u32.u64.high %v3105_v51, %v3104_v59, %v6297_v4  ;;  %v8324_v13 = vxor.u32 2147483648, %v6004_v17  ;;  %v8325_v57 = vxor.u32 2147483648, %v6067_v56 }
 0x221   :  { %v1400_v6 = vand.u32 8388607, %v8175_v7  ;;  %v1407_v63 = vand.u32 31, %v1405_v55  ;;  %v6320_v1 = vmul.f32 %v2827_v39, %v2825_v9  ;;  %v3096_v30 = vsel %vm3090_vm2, %v3093_v38, %v3095_v18 }
 0x222   :  { %v6305_v20 = vsel %vm8172_vm3, %v8324_v13, %v6004_v17  ;;  %v6312_v54 = vsel %vm8173_vm14, %v8325_v57, %v6067_v56  ;;  %v6326_v17 = vmul.f32 %v1163_v47, %v1161_v42  ;;  %v6332_v56 = vmul.f32 %v2931_v45, %v2929_v52 }
 0x223   :  { %v1265_v12 = vand.u32 2147483647, %v6280_v19  ;;  %v1267_v27 = vcvt.s32.f32 %v6255_v28  ;;  %v3115_v9 = vadd.s32 1, %v6291_v43  ;;  %v1408_v31 = vsub.s32 32, %v1407_v63 }
 0x224   :  { %vm3981_vm8 = vcmp.lt.s32.totalorder %v3980_v46, 0  ;;  %v1355_v10 = vsub.s32 0, %v6295_v14  ;;  %v6346_v48 = vmul.f32 %v6343_v61, %v194_v11  ;;  %v6349_v39 = vmul.f32 %v6343_v61, %v114_v58 }
 0x225   :  { %v3112_v42 = vmul.u32 %v3105_v51, %v3096_v30  ;;  %vm3114_vm10 = vc.u32 %v6298_v22, %v6290_v32  ;;  %v1401_v47 = vor.u32 8388608, %v1400_v6  ;;  %v1411_v52 = vshrl.u32 %v8260_v26, %v1408_v31 }
 0x226   :  { %v3116_v45 = vsel %vm3114_vm10, %v3115_v9, %v6291_v43  ;;  %v1410_v16 = vshll.u32 %v8263_v37, %v1407_v63  ;;  %v1413_v41 = vshll.u32 %v8260_v26, %v1407_v63  ;;  %v1414_v60 = vshrl.u32 %v8266_v36, %v1408_v31 }
 0x227   :  { %v3117_v38 = vadd.s32 %v3116_v45, %v3112_v42  ;;  %v1406_v18 = vshrl.u32 %v1405_v55, 5  ;;  %v1416_v44 = vshll.u32 %v8266_v36, %v1407_v63  ;;  %v1417_v51 = vshrl.u32 %v8256_v24, %v1408_v31 }
 0x228   :  { %v3915_v59 = vmin.u32 %v1355_v10, %v6295_v14  ;;  %v1412_v4 = vor.u32 %v1411_v52, %v1410_v16  ;;  %v1415_v13 = vor.u32 %v1414_v60, %v1413_v41  ;;  %v8176_v57 = vand.u32 2147483647, %v6346_v48 }
 0x229   :  { %v3118_v6 = vadd.s32 536870912, %v3117_v38  ;;  %v1418_v43 = vor.u32 %v1417_v51, %v1416_v44  ;;  %v1419_v11 = vshll.u32 %v8256_v24, %v1407_v63  ;;  %v1420_v58 = vshrl.u32 %v8270_v29, %v1408_v31 }
 0x22a   :  { %v6365_v30 = vsel %vm3981_vm8, 0, %v3980_v46  ;;  %v1422_v55 = vshll.u32 %v8270_v29, %v1407_v63  ;;  %v1423_v9 = vshrl.u32 %v8261_v40, %v1408_v31  ;;  %v6369_v42 = vshll.u32 %v1401_v47, 8 }
 0x22b   :  { %v6371_v10 = vshrl.u32 %v3118_v6, 30  ;;  %v1421_v52 = vor.u32 %v1420_v58, %v1419_v11  ;;  %vm1425_vm5 = vcmp.lt.s32.totalorder %v1406_v18, 1  ;;  %v3164_v45 = vand.u32 2139095040, %v6346_v48 }
 0x22c   :  { %v1357_v16 = vclz %v3915_v59  ;;  %v1424_v41 = vor.u32 %v1423_v9, %v1422_v55  ;;  %vm1428_vm11 = vcmp.lt.s32.totalorder %v1406_v18, 4  ;;  %v1433_v60 = vsel %vm1425_vm5, %v1412_v4, %v1415_v13 }
 0x22d   :  { %8326 = vst [vmem:[#allocation71_spill] sm:$0xff] %v6371_v10  ;;  %v3120_v46 = vshll.u32 %v6371_v10, 30  ;;  %vm1427_vm2 = vcmp.lt.s32.totalorder %v1406_v18, 3  ;;  %v1434_v44 = vsel %vm1428_vm11, %v1421_v52, 920167782  ;;  %v1437_v63 = vsel %vm1425_vm5, %v1415_v13, %v1418_v43 }
 0x22e   :  { %vm1426_vm8 = vcmp.lt.s32.totalorder %v1406_v18, 2  ;;  %v1430_v47 = vsel %vm1428_vm11, %v1418_v43, 2102212464  ;;  %v1435_v51 = vsel %vm1427_vm2, %v1418_v43, %v1434_v44  ;;  %v1438_v6 = vsel %vm1428_vm11, %v1424_v41, 1326507024 }
 0x22f   :  { %vm8201_vm10 = vcmp.lt.s32.totalorder %v5634_v15, 0  ;;  %vm8202_vm3 = vcmp.lt.s32.totalorder %v5737_v34, 0  ;;  %v6380_v59 = vsub.s32 %v3117_v38, %v3120_v46  ;;  %v1436_v11 = vsel %vm1426_vm8, %v1433_v60, %v1435_v51 }
 0x230   :  { %v1439_v58 = vsel %vm1427_vm2, %v1421_v52, %v1438_v6  ;;  %v3165_v55 = vshrl.u32 %v3164_v45, 23  ;;  %vm8177_vm14 = vcmp.lt.s32.totalorder %v5800_v23, 0  ;;  %v1409_v9 = vshrl.u32 %v8263_v37, %v1408_v31  ;;  %v3579_v23 = vld [vmem:[%s8051_s2 + $0x10] sm:$0xff] }
 0x231   :  { %v1440_v50 = vsel %vm1426_vm8, %v1437_v63, %v1439_v58  ;;  %v6388_v43 = vmul.u32.u64.low %v6369_v42, %v1436_v11  ;;  %v6389_v41 = vmul.u32.u64.high %v6369_v42, %v1436_v11, %v6388_v43  ;;  %v3123_v44 = vsub.s32 0, %v6380_v59 }
 0x232   :  { %v6394_v38 = vmul.u32.u64.low %v6369_v42, %v1440_v50  ;;  %v6395_v46 = vmul.u32.u64.high %v6369_v42, %v1440_v50, %v6394_v38  ;;  %v3986_v60 = vadd.s32 4294967169, %v3165_v55  ;;  %v3029_v52 = vsub.s32 4294967266, %v6365_v30 }
 0x233   :  { %v3916_v45 = vadd.s32 4294967294, %v1357_v16  ;;  %v1429_v51 = vsel %vm1425_vm5, %v1409_v9, %v1412_v4  ;;  %v1431_v31 = vsel %vm1427_vm2, %v1415_v13, %v1430_v47  ;;  %v2829_v63 = vxor.u32 2147483648, %v6320_v1 }
 0x234   :  { %v3983_v6 = vmin.u32 %v3123_v44, %v6380_v59  ;;  %v3171_v11 = vadd.s32 1, %v3986_v60  ;;  %v1500_v58 = vand.u32 2139095040, %v6349_v39  ;;  %v1165_v7 = vxor.u32 2147483648, %v6326_v17 }
 0x235   :  { %v2933_v50 = vxor.u32 2147483648, %v6332_v56  ;;  %v6409_v16 = vmul.f32 %v1267_v27, %v1265_v12  ;;  %v1451_v4 = vadd.s32 1, %v6389_v41  ;;  %v3025_v13 = vsub.s32 32, %v6365_v30 }
 0x236   :  { %v1432_v47 = vsel %vm1426_vm8, %v1429_v51, %v1431_v31  ;;  %vm1450_vm5 = vc.u32 %v6395_v46, %v6388_v43  ;;  %vm3172_vm11 = vcmp.gt.s32.totalorder %v3171_v11, 0  ;;  %v3030_v55 = vadd.s32 127, %v3029_v52 }
 0x237   :  { %vm3917_vm2 = vcmp.lt.s32.totalorder %v3916_v45, 0  ;;  %v3168_v9 = vand.u32 8388607, %v8176_v57  ;;  %v3173_v19 = vsel %vm3172_vm11, %v3171_v11, 0  ;;  %v3125_v44 = vclz %v3983_v6 }
 0x238   :  { %v1452_v28 = vsel %vm1450_vm5, %v1451_v4, %v6389_v41  ;;  %v3175_v12 = vand.u32 31, %v3173_v19  ;;  %v1501_v27 = vshrl.u32 %v1500_v58, 23  ;;  %v6422_v18 = vsel %vm8201_vm10, %v2829_v63, %v6320_v1 }
 0x239   :  { %8327 = vst [vmem:[#allocation72_spill] sm:$0xff] %v6422_v18  ;;  %v6427_v38 = vsel %vm8202_vm3, %v1165_v7, %v6326_v17  ;;  %v3009_v60 = vadd.s32 %v6116_v21, %v6122_v33  ;;  %v1448_v52 = vmul.u32 %v6369_v42, %v1432_v47  ;;  %v6435_v41 = vsel %vm8177_vm14, %v2933_v50, %v6332_v56 }
 0x23a   :  { %8328 = vst [vmem:[#allocation73_spill] sm:$0xff] %v6427_v38  ;;  %8329 = vst [vmem:[#allocation74_spill] sm:$0xff] %v6435_v41  ;;  %v3026_v1 = vshll.u32 %v6207_v8, %v6365_v30  ;;  %v3176_v31 = vsub.s32 32, %v3175_v12  ;;  %v3031_v6 = vshll.u32 %v3030_v55, 23  ;;  %v6441_v7 = vsel %vm3917_vm2, 0, %v3916_v45 }
 0x23b   :  { %v3027_v63 = vshrl.u32 %v3009_v60, %v3025_v13  ;;  %v6443_v17 = vadd.s32 %v1452_v28, %v1448_v52  ;;  %v3984_v21 = vadd.s32 4294967294, %v3125_v44  ;;  %v3169_v33 = vor.u32 8388608, %v3168_v9  ;;  %v3589_v28 = vld [vmem:[%s8051_s2 + $0x60] sm:$0xff] }
 0x23c   :  { %v3178_v42 = vshll.u32 %v8263_v37, %v3175_v12  ;;  %v3922_v11 = vadd.s32 4294967169, %v1501_v27  ;;  %v3179_v56 = vshrl.u32 %v8260_v26, %v3176_v31  ;;  %v3181_v58 = vshll.u32 %v8260_v26, %v3175_v12  ;;  %4057 = vmatprep.subr.mxu0 %v3589_v28  ;;  %4134 = vmatprep.subr.mxu1 %v3589_v28 }
 0x23d   :  { %v3182_v50 = vshrl.u32 %v8266_v36, %v3176_v31  ;;  %v3185_v8 = vshrl.u32 %v8256_v24, %v3176_v31  ;;  %v6450_v30 = vshrl.u32 %v3173_v19, 5  ;;  %v3184_v45 = vshll.u32 %v8266_v36, %v3175_v12  ;;  %4058 = vmatpush3.msra.mxu0 %v3589_v28  ;;  %4150 = vmatpush3.msra.mxu1 %v3589_v28 }
 0x23e   :  { %v3187_v4 = vshll.u32 %v8256_v24, %v3175_v12  ;;  %v3188_v13 = vshrl.u32 %v8270_v29, %v3176_v31  ;;  %v6455_v47 = vor.u32 %v3027_v63, %v3026_v1  ;;  %v1454_v55 = vadd.s32 536870912, %v6443_v17 }
 0x23f   :  { %v3180_v9 = vor.u32 %v3179_v56, %v3178_v42  ;;  %v3183_v44 = vor.u32 %v3182_v50, %v3181_v58  ;;  %v6461_v27 = vor.u32 4788187, %v3031_v6  ;;  %v3186_v19 = vor.u32 %v3185_v8, %v3184_v45  ;;  %v3588_v6 = vld [vmem:[%s8051_s2 + $0x58] sm:$0xff]  ;;  %v3587_v45 = vld [vmem:[%s8051_s2 + $0x50] sm:$0xff] }
 0x240   :  { %v3189_v60 = vor.u32 %v3188_v13, %v3187_v4  ;;  %v8178_v52 = vand.u32 2147483647, %v6349_v39  ;;  %v1361_v57 = vsub.s32 32, %v6441_v7  ;;  %v1365_v1 = vsub.s32 4294967266, %v6441_v7  ;;  %4059 = vmatprep.subr.mxu0 %v3588_v6  ;;  %4135 = vmatprep.subr.mxu1 %v3588_v6 }
 0x241   :  { %v3190_v63 = vshll.u32 %v8270_v29, %v3175_v12  ;;  %v3191_v42 = vshrl.u32 %v8261_v40, %v3176_v31  ;;  %vm3985_vm8 = vcmp.lt.s32.totalorder %v3984_v21, 0  ;;  %vm3193_vm5 = vcmp.lt.s32.totalorder %v6450_v30, 1  ;;  %4060 = vmatpush3.msra.mxu0 %v3588_v6  ;;  %4151 = vmatpush3.msra.mxu1 %v3588_v6 }
 0x242   :  { %v6472_v56 = vshll.u32 %v3169_v33, 8  ;;  %v1507_v58 = vadd.s32 1, %v3922_v11  ;;  %v6474_v50 = vshrl.u32 %v1454_v55, 30  ;;  %vm3196_vm11 = vcmp.lt.s32.totalorder %v6450_v30, 4  ;;  %4061 = vmatprep.subr.mxu0 %v3587_v45  ;;  %4136 = vmatprep.subr.mxu1 %v3587_v45 }
 0x243   :  { %v3192_v8 = vor.u32 %v3191_v42, %v3190_v63  ;;  %v3201_v12 = vsel %vm3193_vm5, %v3180_v9, %v3183_v44  ;;  %v3177_v33 = vshrl.u32 %v8263_v37, %v3176_v31  ;;  %vm3195_vm2 = vcmp.lt.s32.totalorder %v6450_v30, 3  ;;  %4062 = vmatpush3.msra.mxu0 %v3587_v45  ;;  %v3586_v31 = vld [vmem:[%s8051_s2 + $0x48] sm:$0xff]  ;;  %4152 = vmatpush3.msra.mxu1 %v3587_v45 }
 0x244   :  { %8330 = vst [vmem:[#allocation75_spill] sm:$0xff] %v6474_v50  ;;  %v3198_v11 = vsel %vm3196_vm11, %v3186_v19, 2102212464  ;;  %v3202_v4 = vsel %vm3196_vm11, %v3189_v60, 920167782  ;;  %vm3194_vm14 = vcmp.lt.s32.totalorder %v6450_v30, 2  ;;  %v3205_v55 = vsel %vm3193_vm5, %v3183_v44, %v3186_v19  ;;  %4063 = vmatprep.subr.mxu0 %v3586_v31  ;;  %4137 = vmatprep.subr.mxu1 %v3586_v31 }
 0x245   :  { %v3203_v13 = vsel %vm3195_vm2, %v3186_v19, %v3202_v4  ;;  %v3206_v28 = vsel %vm3196_vm11, %v3192_v8, 1326507024  ;;  %v6493_v63 = vsel %vm3985_vm8, 0, %v3984_v21  ;;  %v3197_v42 = vsel %vm3193_vm5, %v3177_v33, %v3180_v9  ;;  %v199_v19 = vpop.permute.xlu1 %198  ;;  %4064 = vmatpush3.msra.mxu0 %v3586_v31  ;;  %v3585_v9 = vld [vmem:[%s8051_s2 + $0x40] sm:$0xff]  ;;  %4153 = vmatpush3.msra.mxu1 %v3586_v31 }
 0x246   :  { %v3204_v6 = vsel %vm3194_vm14, %v3201_v12, %v3203_v13  ;;  %v3207_v4 = vsel %vm3195_vm2, %v3189_v60, %v3206_v28  ;;  %v3199_v8 = vsel %vm3195_vm2, %v3183_v44, %v3198_v11  ;;  %v1366_v60 = vadd.s32 127, %v1365_v1  ;;  %4065 = vmatprep.subr.mxu0 %v3585_v9  ;;  %4138 = vmatprep.subr.mxu1 %v3585_v9  ;;  %v3584_v1 = vld [vmem:[%s8051_s2 + $0x38] sm:$0xff] }
 0x247   :  { %v3208_v45 = vsel %vm3194_vm14, %v3205_v55, %v3207_v4  ;;  %v6506_v21 = vmul.u32.u64.low %v6472_v56, %v3204_v6  ;;  %v6507_v51 = vmul.u32.u64.high %v6472_v56, %v3204_v6, %v6506_v21  ;;  %v1456_v12 = vshll.u32 %v6474_v50, 30  ;;  %4066 = vmatpush3.msra.mxu0 %v3585_v9  ;;  %4154 = vmatpush3.msra.mxu1 %v3585_v9  ;;  %v3583_v9 = vld [vmem:[%s8051_s2 + $0x30] sm:$0xff]  ;;  %v3580_v4 = vld [vmem:[%s8051_s2 + $0x18] sm:$0xff] }
 0x248   :  { %v6515_v33 = vmul.u32.u64.low %v6472_v56, %v3208_v45  ;;  %v6516_v44 = vmul.u32.u64.high %v6472_v56, %v3208_v45, %v6515_v33  ;;  %v1345_v11 = vadd.s32 %v6189_v62, %v6187_v2  ;;  %v1504_v13 = vand.u32 8388607, %v8178_v52  ;;  %4067 = vmatprep.subr.mxu0 %v3584_v1  ;;  %4139 = vmatprep.subr.mxu1 %v3584_v1 }
 0x249   :  { %vm1508_vm8 = vcmp.gt.s32.totalorder %v1507_v58, 0  ;;  %v6523_v55 = vmul.f32 %v6343_v61, %v199_v19  ;;  %v3133_v31 = vsub.s32 4294967266, %v6493_v63  ;;  %v3200_v2 = vsel %vm3194_vm14, %v3197_v42, %v3199_v8  ;;  %4068 = vmatpush3.msra.mxu0 %v3584_v1  ;;  %4155 = vmatpush3.msra.mxu1 %v3584_v1 }
 0x24a   :  { %v1509_v62 = vsel %vm1508_vm8, %v1507_v58, 0  ;;  %v3219_v19 = vadd.s32 1, %v6507_v51  ;;  %v6541_v30 = vshrl.u32 %v1345_v11, %v1361_v57  ;;  %v1367_v58 = vshll.u32 %v1366_v60, 23  ;;  %4069 = vmatprep.subr.mxu0 %v3583_v9  ;;  %4140 = vmatprep.subr.mxu1 %v3583_v9  ;;  %v3582_v57 = vld [vmem:[%s8051_s2 + $0x28] sm:$0xff] }
 0x24b   :  { %v1511_v45 = vand.u32 31, %v1509_v62  ;;  %v3113_v42 = vadd.s32 %v6290_v32, %v6298_v22  ;;  %v6546_v8 = vsub.s32 %v6443_v17, %v1456_v12  ;;  %v3216_v33 = vmul.u32 %v6472_v56, %v3200_v2  ;;  %4070 = vmatpush3.msra.mxu0 %v3583_v9  ;;  %4156 = vmatpush3.msra.mxu1 %v3583_v9 }
 0x24c   :  { %vm3218_vm14 = vc.u32 %v6516_v44, %v6506_v21  ;;  %v1505_v52 = vor.u32 8388608, %v1504_v13  ;;  %v3129_v32 = vsub.s32 32, %v6493_v63  ;;  %v6555_v22 = vadd.s32 127, %v3133_v31  ;;  %4071 = vmatprep.subr.mxu0 %v3582_v57  ;;  %4141 = vmatprep.subr.mxu1 %v3582_v57  ;;  %v3581_v31 = vld [vmem:[%s8051_s2 + $0x20] sm:$0xff] }
 0x24d   :  { %v1512_v1 = vsub.s32 32, %v1511_v45  ;;  %v3220_v17 = vsel %vm3218_vm14, %v3219_v19, %v6507_v51  ;;  %v3268_v60 = vand.u32 2139095040, %v6523_v55  ;;  %v1514_v12 = vshll.u32 %v8263_v37, %v1511_v45  ;;  %4072 = vmatpush3.msra.mxu0 %v3582_v57  ;;  %4157 = vmatpush3.msra.mxu1 %v3582_v57 }
 0x24e   :  { %v6559_v56 = vadd.s32 %v3220_v17, %v3216_v33  ;;  %v1459_v2 = vsub.s32 0, %v6546_v8  ;;  %v1517_v51 = vshll.u32 %v8260_v26, %v1511_v45  ;;  %v1520_v19 = vshll.u32 %v8266_v36, %v1511_v45  ;;  %4073 = vmatprep.subr.mxu0 %v3581_v31  ;;  %4142 = vmatprep.subr.mxu1 %v3581_v31 }
 0x24f   :  { %v1515_v11 = vshrl.u32 %v8260_v26, %v1512_v1  ;;  %v1518_v13 = vshrl.u32 %v8266_v36, %v1512_v1  ;;  %v1521_v9 = vshrl.u32 %v8256_v24, %v1512_v1  ;;  %v6571_v33 = vor.u32 4788187, %v1367_v58  ;;  %4074 = vmatpush3.msra.mxu0 %v3581_v31  ;;  %4158 = vmatpush3.msra.mxu1 %v3581_v31 }
 0x250   :  { %v6573_v17 = vshrl.u32 %v1509_v62, 5  ;;  %v1523_v28 = vshll.u32 %v8256_v24, %v1511_v45  ;;  %v1524_v6 = vshrl.u32 %v8270_v29, %v1512_v1  ;;  %v6580_v3 = vshll.u32 %v1505_v52, 8  ;;  %4075 = vmatprep.subr.mxu0 %v3580_v4  ;;  %4143 = vmatprep.subr.mxu1 %v3580_v4 }
 0x251   :  { %v1516_v10 = vor.u32 %v1515_v11, %v1514_v12  ;;  %v1519_v50 = vor.u32 %v1518_v13, %v1517_v51  ;;  %v1522_v0 = vor.u32 %v1521_v9, %v1520_v19  ;;  %v3222_v62 = vadd.s32 536870912, %v6559_v56  ;;  %4076 = vmatpush3.msra.mxu0 %v3580_v4  ;;  %4159 = vmatpush3.msra.mxu1 %v3580_v4 }
 0x252   :  { %v1525_v58 = vor.u32 %v1524_v6, %v1523_v28  ;;  %v1526_v57 = vshll.u32 %v8270_v29, %v1511_v45  ;;  %v1527_v41 = vshrl.u32 %v8261_v40, %v1512_v1  ;;  %v3131_v12 = vshrl.u32 %v3113_v42, %v3129_v32  ;;  %4077 = vmatprep.subr.mxu0 %v3579_v23  ;;  %v3578_v45 = vld [vmem:[%s8051_s2 + $0x8] sm:$0xff] }
 0x253   :  { %v3135_v11 = vshll.u32 %v6555_v22, 23  ;;  %v3919_v52 = vmin.u32 %v1459_v2, %v6546_v8  ;;  %v3269_v13 = vshrl.u32 %v3268_v60, 23  ;;  %v1513_v28 = vshrl.u32 %v8263_v37, %v1512_v1  ;;  %4078 = vmatpush3.msra.mxu0 %v3579_v23  ;;  %4144 = vmatprep.subr.mxu1 %v3579_v23  ;;  %v3577_v60 = vld [vmem:[%s8051_s2] sm:$0xff] }
 0x254   :  { %v1528_v6 = vor.u32 %v1527_v41, %v1526_v57  ;;  %vm1529_vm5 = vcmp.lt.s32.totalorder %v6573_v17, 1  ;;  %vm1532_vm11 = vcmp.lt.s32.totalorder %v6573_v17, 4  ;;  %vm1531_vm2 = vcmp.lt.s32.totalorder %v6573_v17, 3  ;;  %4079 = vmatprep.subr.mxu0 %v3578_v45  ;;  %4160 = vmatpush3.msra.mxu1 %v3579_v23 }
 0x255   :  { %v1534_v42 = vsel %vm1532_vm11, %v1522_v0, 2102212464  ;;  %v1537_v4 = vsel %vm1529_vm5, %v1516_v10, %v1519_v50  ;;  %v1538_v41 = vsel %vm1532_vm11, %v1525_v58, 920167782  ;;  %v6603_v1 = vshrl.u32 %v3222_v62, 30  ;;  %4080 = vmatpush3.msra.mxu0 %v3578_v45  ;;  %4145 = vmatprep.subr.mxu1 %v3578_v45 }
 0x256   :  { %vm1530_vm8 = vcmp.lt.s32.totalorder %v6573_v17, 2  ;;  %v1539_v32 = vsel %vm1531_vm2, %v1522_v0, %v1538_v41  ;;  %v1541_v22 = vsel %vm1529_vm5, %v1519_v50, %v1522_v0  ;;  %vm8192_vm14 = vcmp.lt.s32.totalorder %v5909_v53, 0  ;;  %4081 = vmatprep.subr.mxu0 %v3577_v60  ;;  %4161 = vmatpush3.msra.mxu1 %v3578_v45 }
 0x257   :  { %8331 = vst [vmem:[#allocation76_spill] sm:$0xff] %v6603_v1  ;;  %v1461_v31 = vclz %v3919_v52  ;;  %v1533_v23 = vsel %vm1529_vm5, %v1513_v28, %v1516_v10  ;;  %v1540_v2 = vsel %vm1530_vm8, %v1537_v4, %v1539_v32  ;;  %v1542_v51 = vsel %vm1532_vm11, %v1528_v6, 1326507024  ;;  %v119_v10 = vpop.permute.xlu0 %118  ;;  %4082 = vmatpush3.msra.mxu0 %v3577_v60  ;;  %4146 = vmatprep.subr.mxu1 %v3577_v60 }
 0x258   :  { %v1535_v0 = vsel %vm1531_vm2, %v1519_v50, %v1534_v42  ;;  %v1543_v19 = vsel %vm1531_vm2, %v1525_v58, %v1542_v51  ;;  %v6625_v9 = vmul.u32.u64.low %v6580_v3, %v1540_v2  ;;  %v6626_v62 = vmul.u32.u64.high %v6580_v3, %v1540_v2, %v6625_v9  ;;  %4162 = vmatpush3.msra.mxu1 %v3577_v60 }
 0x259   :  { %v3136_v57 = vor.u32 4788187, %v3135_v11  ;;  %v1544_v52 = vsel %vm1530_vm8, %v1541_v22, %v1543_v19  ;;  %v8189_v28 = vand.u32 2147483647, %v6523_v55  ;;  %v3990_v6 = vadd.s32 4294967169, %v3269_v13 }
 0x25a   :  { %v3130_v50 = vshll.u32 %v6380_v59, %v6493_v63  ;;  %v3224_v58 = vshll.u32 %v6603_v1, 30  ;;  %v6636_v42 = vmul.u32.u64.low %v6580_v3, %v1544_v52  ;;  %v6637_v4 = vmul.u32.u64.high %v6580_v3, %v1544_v52, %v6636_v42 }
 0x25b   :  { %v8332_v11 = vshll.u32 %v6295_v14, %v6441_v7  ;;  %v1536_v41 = vsel %vm1530_vm8, %v1533_v23, %v1535_v0  ;;  %v3275_v13 = vadd.s32 1, %v3990_v6  ;;  %v6646_v32 = vmul.f32 %v6343_v61, %v119_v10 }
 0x25c   :  { %v1369_v59 = vand.u32 2147483647, %v6571_v33  ;;  %v3132_v63 = vor.u32 %v3131_v12, %v3130_v50  ;;  %v3920_v22 = vadd.s32 4294967294, %v1461_v31  ;;  %v1555_v2 = vadd.s32 1, %v6626_v62 }
 0x25d   :  { %v1364_v45 = vor.u32 %v6541_v30, %v8332_v11  ;;  %v8333_v60 = vand.u32 2147483647, %v6461_v27  ;;  %v8334_v51 = vcvt.s32.f32 %v6455_v47  ;;  %v3137_v7 = vand.u32 2147483647, %v3136_v57 }
 0x25e   :  { %v3272_v30 = vand.u32 8388607, %v8189_v28  ;;  %vm3276_vm5 = vcmp.gt.s32.totalorder %v3275_v13, 0  ;;  %v6659_v17 = vsub.s32 %v6559_v56, %v3224_v58  ;;  %v1552_v33 = vmul.u32 %v6580_v3, %v1536_v41 }
 0x25f   :  { %v6654_v14 = vmul.f32 %v8334_v51, %v8333_v60  ;;  %vm1554_vm11 = vc.u32 %v6637_v4, %v6625_v9  ;;  %v3277_v12 = vsel %vm3276_vm5, %v3275_v13, 0  ;;  %v1371_v31 = vcvt.s32.f32 %v1364_v45  ;;  %v204_v13 = vpop.permute.xlu1 %203 }
 0x260   :  { %v1556_v27 = vsel %vm1554_vm11, %v1555_v2, %v6626_v62  ;;  %v3279_v47 = vand.u32 31, %v3277_v12  ;;  %v1604_v23 = vand.u32 2139095040, %v6646_v32  ;;  %v8335_v0 = vxor.u32 2147483648, %v6409_v16 }
 0x261   :  { %v3139_v56 = vcvt.s32.f32 %v3132_v63  ;;  %vm3921_vm2 = vcmp.lt.s32.totalorder %v3920_v22, 0  ;;  %v1557_v3 = vadd.s32 %v1556_v27, %v1552_v33  ;;  %v3037_v10 = vxor.u32 2147483648, %v6654_v14 }
 0x262   :  { %v6671_v19 = vsel %vm8192_vm14, %v8335_v0, %v6409_v16  ;;  %v6674_v57 = vmul.f32 %v1371_v31, %v1369_v59  ;;  %v1449_v62 = vadd.s32 %v6388_v43, %v6395_v46  ;;  %v3280_v52 = vsub.s32 32, %v3279_v47  ;;  %v8338_v31 = vld [vmem:[#allocation60_spill] sm:$0xff] }
 0x263   :  { %8336 = vst [vmem:[#allocation77_spill] sm:$0xff] %v6671_v19  ;;  %v6678_v6 = vmul.f32 %v3139_v56, %v3137_v7  ;;  %v3227_v50 = vsub.s32 0, %v6659_v17  ;;  %v1558_v58 = vadd.s32 536870912, %v1557_v3  ;;  %v3273_v42 = vor.u32 8388608, %v3272_v30 }
 0x264   :  { %v6681_v11 = vsel %vm3921_vm2, 0, %v3920_v22  ;;  %v3283_v16 = vshrl.u32 %v8260_v26, %v3280_v52  ;;  %v3286_v45 = vshrl.u32 %v8266_v36, %v3280_v52  ;;  %v1605_v41 = vshrl.u32 %v1604_v23, 23 }
 0x265   :  { %v3278_v59 = vshrl.u32 %v3277_v12, 5  ;;  %v3282_v63 = vshll.u32 %v8263_v37, %v3279_v47  ;;  %v3285_v43 = vshll.u32 %v8260_v26, %v3279_v47  ;;  %v3289_v46 = vshrl.u32 %v8256_v24, %v3280_v52 }
 0x266   :  { %v6688_v2 = vshrl.u32 %v1558_v58, 30  ;;  %v3288_v60 = vshll.u32 %v8266_v36, %v3279_v47  ;;  %v3291_v22 = vshll.u32 %v8256_v24, %v3279_v47  ;;  %v3292_v51 = vshrl.u32 %v8270_v29, %v3280_v52 }
 0x267   :  { %v3987_v7 = vmin.u32 %v3227_v50, %v6659_v17  ;;  %v3284_v30 = vor.u32 %v3283_v16, %v3282_v63  ;;  %v3287_v33 = vor.u32 %v3286_v45, %v3285_v43  ;;  %v6695_v12 = vmul.f32 %v6343_v61, %v204_v13 }
 0x268   :  { %8337 = vst [vmem:[#allocation78_spill] sm:$0xff] %v6688_v2  ;;  %vm8200_vm8 = vcmp.lt.s32.totalorder %v8338_v31, 0  ;;  %v3290_v27 = vor.u32 %v3289_v46, %v3288_v60  ;;  %v3293_v23 = vor.u32 %v3292_v51, %v3291_v22  ;;  %v3294_v0 = vshll.u32 %v8270_v29, %v3279_v47 }
 0x269   :  { %v3295_v56 = vshrl.u32 %v8261_v40, %v3280_v52  ;;  %v1465_v58 = vsub.s32 32, %v6681_v11  ;;  %v1469_v28 = vsub.s32 4294967266, %v6681_v11  ;;  %v3313_v1 = vshll.u32 %v3273_v42, 8 }
 0x26a   :  { %v1560_v16 = vshll.u32 %v6688_v2, 30  ;;  %vm3297_vm5 = vcmp.lt.s32.totalorder %v3278_v59, 1  ;;  %v3926_v13 = vadd.s32 4294967169, %v1605_v41  ;;  %v3229_v63 = vclz %v3987_v7 }
 0x26b   :  { %v3296_v45 = vor.u32 %v3295_v56, %v3294_v0  ;;  %vm3299_vm11 = vcmp.lt.s32.totalorder %v3278_v59, 3  ;;  %vm3300_vm2 = vcmp.lt.s32.totalorder %v3278_v59, 4  ;;  %v3305_v43 = vsel %vm3297_vm5, %v3284_v30, %v3287_v33 }
 0x26c   :  { %v3302_v47 = vsel %vm3300_vm2, %v3290_v27, 2102212464  ;;  %v3306_v46 = vsel %vm3300_vm2, %v3293_v23, 920167782  ;;  %v3309_v60 = vsel %vm3297_vm5, %v3287_v33, %v3290_v27  ;;  %v3281_v51 = vshrl.u32 %v8263_v37, %v3280_v52 }
 0x26d   :  { %v3310_v22 = vsel %vm3300_vm2, %v3296_v45, 1326507024  ;;  %vm3298_vm14 = vcmp.lt.s32.totalorder %v3278_v59, 2  ;;  %v3307_v42 = vsel %vm3299_vm11, %v3290_v27, %v3306_v46  ;;  %v3372_v50 = vand.u32 2139095040, %v6695_v12 }
 0x26e   :  { %v6709_v0 = vsub.s32 %v1557_v3, %v1560_v16  ;;  %v3308_v41 = vsel %vm3298_vm14, %v3305_v43, %v3307_v42  ;;  %v3311_v7 = vsel %vm3299_vm11, %v3293_v23, %v3310_v22  ;;  %v1611_v56 = vadd.s32 1, %v3926_v13 }
 0x26f   :  { %v3988_v2 = vadd.s32 4294967294, %v3229_v63  ;;  %v3301_v19 = vsel %vm3297_vm5, %v3281_v51, %v3284_v30  ;;  %v3303_v53 = vsel %vm3299_vm11, %v3287_v33, %v3302_v47  ;;  %v3312_v45 = vsel %vm3298_vm14, %v3309_v60, %v3311_v7 }
 0x270   :  { %v6716_v52 = vmul.u32.u64.low %v3313_v1, %v3312_v45  ;;  %v6717_v18 = vmul.u32.u64.high %v3313_v1, %v3312_v45, %v6716_v52  ;;  %v6719_v27 = vmul.u32.u64.low %v3313_v1, %v3308_v41  ;;  %v6720_v46 = vmul.u32.u64.high %v3313_v1, %v3308_v41, %v6719_v27 }
 0x271   :  { %v6726_v3 = vsel %vm8200_vm8, %v3037_v10, %v6654_v14  ;;  %v1467_v23 = vshrl.u32 %v1449_v62, %v1465_v58  ;;  %v1470_v16 = vadd.s32 127, %v1469_v28  ;;  %vm1612_vm2 = vcmp.gt.s32.totalorder %v1611_v56, 0 }
 0x272   :  { %8339 = vst [vmem:[#allocation79_spill] sm:$0xff] %v6726_v3  ;;  %v1563_v30 = vsub.s32 0, %v6709_v0  ;;  %v3304_v33 = vsel %vm3298_vm14, %v3301_v19, %v3303_v53  ;;  %v8340_v13 = vand.u32 2147483647, %v6646_v32  ;;  %v1613_v43 = vsel %vm1612_vm2, %v1611_v56, 0 }
 0x273   :  { %v1466_v47 = vshll.u32 %v6546_v8, %v6681_v11  ;;  %vm3989_vm5 = vcmp.lt.s32.totalorder %v3988_v2, 0  ;;  %v1615_v60 = vand.u32 31, %v1613_v43  ;;  %v3373_v22 = vshrl.u32 %v3372_v50, 23 }
 0x274   :  { %v1608_v63 = vand.u32 8388607, %v8340_v13  ;;  %v1373_v14 = vxor.u32 2147483648, %v6674_v57  ;;  %vm3322_vm11 = vc.u32 %v6717_v18, %v6719_v27  ;;  %v3323_v28 = vadd.s32 1, %v6720_v46 }
 0x275   :  { %v6739_v53 = vor.u32 %v1467_v23, %v1466_v47  ;;  %v1471_v19 = vshll.u32 %v1470_v16, 23  ;;  %v3320_v62 = vmul.u32 %v3313_v1, %v3304_v33  ;;  %v1616_v59 = vsub.s32 32, %v1615_v60 }
 0x276   :  { %v6741_v58 = vsel %vm3989_vm5, 0, %v3988_v2  ;;  %v3923_v8 = vmin.u32 %v1563_v30, %v6709_v0  ;;  %v3324_v11 = vsel %vm3322_vm11, %v3323_v28, %v6720_v46  ;;  %v1609_v50 = vor.u32 8388608, %v1608_v63  ;;  %v8341_v30 = vld [vmem:[#allocation64_spill] sm:$0xff] }
 0x277   :  { %v3325_v51 = vadd.s32 %v3324_v11, %v3320_v62  ;;  %v1618_v42 = vshll.u32 %v8263_v37, %v1615_v60  ;;  %v1621_v41 = vshll.u32 %v8260_v26, %v1615_v60  ;;  %v3994_v7 = vadd.s32 4294967169, %v3373_v22 }
 0x278   :  { %v1619_v56 = vshrl.u32 %v8260_v26, %v1616_v59  ;;  %v1622_v45 = vshrl.u32 %v8266_v36, %v1616_v59  ;;  %v1624_v1 = vshll.u32 %v8266_v36, %v1615_v60  ;;  %v1625_v2 = vshrl.u32 %v8256_v24, %v1616_v59 }
 0x279   :  { %v3326_v52 = vadd.s32 536870912, %v3325_v51  ;;  %v1614_v23 = vshrl.u32 %v1613_v43, 5  ;;  %v1627_v16 = vshll.u32 %v8256_v24, %v1615_v60  ;;  %v1628_v46 = vshrl.u32 %v8270_v29, %v1616_v59 }
 0x27a   :  { %vm8213_vm14 = vcmp.lt.s32.totalorder %v8341_v30, 0  ;;  %v1472_v33 = vor.u32 4788187, %v1471_v19  ;;  %v1620_v13 = vor.u32 %v1619_v56, %v1618_v42  ;;  %v1623_v63 = vor.u32 %v1622_v45, %v1621_v41 }
 0x27b   :  { %v1626_v47 = vor.u32 %v1625_v2, %v1624_v1  ;;  %v3237_v22 = vsub.s32 4294967266, %v6741_v58  ;;  %v1565_v28 = vclz %v3923_v8  ;;  %v6755_v62 = vshrl.u32 %v3326_v52, 30 }
 0x27c   :  { %v1629_v11 = vor.u32 %v1628_v46, %v1627_v16  ;;  %v1630_v10 = vshll.u32 %v8270_v29, %v1615_v60  ;;  %v1631_v43 = vshrl.u32 %v8261_v40, %v1616_v59  ;;  %v1649_v3 = vshll.u32 %v1609_v50, 8 }
 0x27d   :  { %8342 = vst [vmem:[#allocation80_spill] sm:$0xff] %v6755_v62  ;;  %v3379_v31 = vadd.s32 1, %v3994_v7  ;;  %vm8212_vm2 = vcmp.lt.s32.totalorder %v6160_v25, 0  ;;  %v3328_v15 = vshll.u32 %v6755_v62, 30  ;;  %vm1633_vm5 = vcmp.lt.s32.totalorder %v1614_v23, 1 }
 0x27e   :  { %vm1635_vm11 = vcmp.lt.s32.totalorder %v1614_v23, 3  ;;  %vm1636_vm8 = vcmp.lt.s32.totalorder %v1614_v23, 4  ;;  %v1632_v19 = vor.u32 %v1631_v43, %v1630_v10  ;;  %v1641_v8 = vsel %vm1633_vm5, %v1620_v13, %v1623_v63 }
 0x27f   :  { %v1638_v42 = vsel %vm1636_vm8, %v1626_v47, 2102212464  ;;  %v1642_v41 = vsel %vm1636_vm8, %v1629_v11, 920167782  ;;  %v6762_v56 = vsub.s32 %v3325_v51, %v3328_v15  ;;  %v1617_v60 = vshrl.u32 %v8263_v37, %v1616_v59 }
 0x280   :  { %vm1634_vm10 = vcmp.lt.s32.totalorder %v1614_v23, 2  ;;  %v1643_v50 = vsel %vm1635_vm11, %v1626_v47, %v1642_v41  ;;  %v3924_v7 = vadd.s32 4294967294, %v1565_v28  ;;  %v1645_v1 = vsel %vm1633_vm5, %v1623_v63, %v1626_v47 }
 0x281   :  { %v1644_v45 = vsel %vm1634_vm10, %v1641_v8, %v1643_v50  ;;  %v1646_v2 = vsel %vm1636_vm8, %v1632_v19, 1326507024  ;;  %v3331_v52 = vsub.s32 0, %v6762_v56  ;;  %v1637_v10 = vsel %vm1633_vm5, %v1617_v60, %v1620_v13 }
 0x282   :  { %v1639_v16 = vsel %vm1635_vm11, %v1623_v63, %v1638_v42  ;;  %v1647_v15 = vsel %vm1635_vm11, %v1629_v11, %v1646_v2  ;;  %v6773_v59 = vmul.u32.u64.low %v1649_v3, %v1644_v45  ;;  %v6774_v46 = vmul.u32.u64.high %v1649_v3, %v1644_v45, %v6773_v59 }
 0x283   :  { %v1648_v51 = vsel %vm1634_vm10, %v1645_v1, %v1647_v15  ;;  %vm3380_vm3 = vcmp.gt.s32.totalorder %v3379_v31, 0  ;;  %v6780_v47 = vsel %vm8213_vm14, %v1373_v14, %v6674_v57  ;;  %v1473_v28 = vand.u32 2147483647, %v1472_v33  ;;  %v124_v1 = vpop.permute.xlu0 %123 }
 0x284   :  { %8343 = vst [vmem:[#allocation81_spill] sm:$0xff] %v6780_v47  ;;  %v6782_v43 = vmul.u32.u64.low %v1649_v3, %v1648_v51  ;;  %v6783_v19 = vmul.u32.u64.high %v1649_v3, %v1648_v51, %v6782_v43  ;;  %v1475_v13 = vcvt.s32.f32 %v6739_v53  ;;  %v1640_v63 = vsel %vm1634_vm10, %v1637_v10, %v1639_v16 }
 0x285   :  { %v8203_v11 = vand.u32 2147483647, %v6695_v12  ;;  %v3381_v42 = vsel %vm3380_vm3, %v3379_v31, 0  ;;  %v3233_v8 = vsub.s32 32, %v6741_v58  ;;  %vm3925_vm8 = vcmp.lt.s32.totalorder %v3924_v7, 0 }
 0x286   :  { %v3991_v41 = vmin.u32 %v3331_v52, %v6762_v56  ;;  %v3383_v60 = vand.u32 31, %v3381_v42  ;;  %v8344_v57 = vxor.u32 2147483648, %v6678_v6  ;;  %v3217_v53 = vadd.s32 %v6506_v21, %v6516_v44 }
 0x287   :  { %v6799_v23 = vadd.s32 127, %v3237_v22  ;;  %v1659_v31 = vadd.s32 1, %v6774_v46  ;;  %v6802_v33 = vmul.f32 %v1475_v13, %v1473_v28  ;;  %v1656_v50 = vmul.u32 %v1649_v3, %v1640_v63 }
 0x288   :  { %v6795_v14 = vsel %vm8212_vm2, %v8344_v57, %v6678_v6  ;;  %vm1658_vm3 = vc.u32 %v6783_v19, %v6773_v59  ;;  %v3384_v45 = vsub.s32 32, %v3383_v60  ;;  %v6808_v6 = vsel %vm3925_vm8, 0, %v3924_v7 }
 0x289   :  { %8345 = vst [vmem:[#allocation82_spill] sm:$0xff] %v6795_v14  ;;  %v1660_v52 = vsel %vm1658_vm3, %v1659_v31, %v6774_v46  ;;  %v3376_v21 = vand.u32 8388607, %v8203_v11  ;;  %v3235_v44 = vshrl.u32 %v3217_v53, %v3233_v8  ;;  %v3333_v22 = vclz %v3991_v41  ;;  %v209_v53 = vpop.permute.xlu1 %208 }
 0x28a   :  { %v1661_v10 = vadd.s32 %v1660_v52, %v1656_v50  ;;  %v3387_v3 = vshrl.u32 %v8260_v26, %v3384_v45  ;;  %v3239_v16 = vshll.u32 %v6799_v23, 23  ;;  %v3390_v15 = vshrl.u32 %v8266_v36, %v3384_v45 }
 0x28b   :  { %v3393_v51 = vshrl.u32 %v8256_v24, %v3384_v45  ;;  %v6818_v28 = vmul.f32 %v6343_v61, %v124_v1  ;;  %v1573_v7 = vsub.s32 4294967266, %v6808_v6  ;;  %v3386_v43 = vshll.u32 %v8263_v37, %v3383_v60 }
 0x28c   :  { %v1662_v46 = vadd.s32 536870912, %v1661_v10  ;;  %v3389_v13 = vshll.u32 %v8260_v26, %v3383_v60  ;;  %v3382_v63 = vshrl.u32 %v3381_v42, 5  ;;  %v3392_v8 = vshll.u32 %v8266_v36, %v3383_v60 }
 0x28d   :  { %v3395_v41 = vshll.u32 %v8256_v24, %v3383_v60  ;;  %v3396_v57 = vshrl.u32 %v8270_v29, %v3384_v45  ;;  %v3992_v23 = vadd.s32 4294967294, %v3333_v22  ;;  %v3388_v50 = vor.u32 %v3387_v3, %v3386_v43 }
 0x28e   :  { %v6826_v31 = vshrl.u32 %v1662_v46, 30  ;;  %v3391_v1 = vor.u32 %v3390_v15, %v3389_v13  ;;  %v3394_v52 = vor.u32 %v3393_v51, %v3392_v8  ;;  %v3398_v2 = vshll.u32 %v8270_v29, %v3383_v60 }
 0x28f   :  { %v3397_v11 = vor.u32 %v3396_v57, %v3395_v41  ;;  %v3399_v62 = vshrl.u32 %v8261_v40, %v3384_v45  ;;  %v1569_v42 = vsub.s32 32, %v6808_v6  ;;  %v1574_v14 = vadd.s32 127, %v1573_v7 }
 0x290   :  { %8346 = vst [vmem:[#allocation83_spill] sm:$0xff] %v6826_v31  ;;  %v3377_v25 = vor.u32 8388608, %v3376_v21  ;;  %v6832_v47 = vmul.f32 %v6343_v61, %v209_v53  ;;  %v1664_v30 = vshll.u32 %v6826_v31, 30  ;;  %vm3401_vm10 = vcmp.lt.s32.totalorder %v3382_v63, 1 }
 0x291   :  { %v3400_v22 = vor.u32 %v3399_v62, %v3398_v2  ;;  %v1708_v3 = vand.u32 2139095040, %v6818_v28  ;;  %vm3993_vm5 = vcmp.lt.s32.totalorder %v3992_v23, 0  ;;  %vm3403_vm11 = vcmp.lt.s32.totalorder %v3382_v63, 3 }
 0x292   :  { %8347 = vst [vmem:[#allocation84_spill] sm:$0xff] %v6832_v47  ;;  %vm3404_vm8 = vcmp.lt.s32.totalorder %v3382_v63, 4  ;;  %v3409_v60 = vsel %vm3401_vm10, %v3388_v50, %v3391_v1  ;;  %v3413_v46 = vsel %vm3401_vm10, %v3391_v1, %v3394_v52  ;;  %v3385_v21 = vshrl.u32 %v8263_v37, %v3384_v45 }
 0x293   :  { %v3406_v15 = vsel %vm3404_vm8, %v3394_v52, 2102212464  ;;  %v3410_v51 = vsel %vm3404_vm8, %v3397_v11, 920167782  ;;  %v3414_v7 = vsel %vm3404_vm8, %v3400_v22, 1326507024  ;;  %v6840_v62 = vsub.s32 %v1661_v10, %v1664_v30 }
 0x294   :  { %vm3402_vm3 = vcmp.lt.s32.totalorder %v3382_v63, 2  ;;  %v3411_v61 = vsel %vm3403_vm11, %v3394_v52, %v3410_v51  ;;  %v3417_v43 = vshll.u32 %v3377_v25, 8  ;;  %v3415_v13 = vsel %vm3403_vm11, %v3397_v11, %v3414_v7 }
 0x295   :  { %v3412_v2 = vsel %vm3402_vm3, %v3409_v60, %v3411_v61  ;;  %v1709_v8 = vshrl.u32 %v1708_v3, 23  ;;  %v6845_v41 = vsel %vm3993_vm5, 0, %v3992_v23  ;;  %v3405_v57 = vsel %vm3401_vm10, %v3385_v21, %v3388_v50 }
 0x296   :  { %v3407_v53 = vsel %vm3403_vm11, %v3391_v1, %v3406_v15  ;;  %v3416_v45 = vsel %vm3402_vm3, %v3413_v46, %v3415_v13  ;;  %v6853_v25 = vmul.u32.u64.low %v3417_v43, %v3412_v2  ;;  %v6854_v30 = vmul.u32.u64.high %v3417_v43, %v3412_v2, %v6853_v25 }
 0x297   :  { %v6850_v22 = vmul.u32.u64.low %v3417_v43, %v3416_v45  ;;  %v6851_v31 = vmul.u32.u64.high %v3417_v43, %v3416_v45, %v6850_v22  ;;  %v1553_v11 = vadd.s32 %v6625_v9, %v6637_v4  ;;  %v8211_v23 = vand.u32 2147483647, %v6818_v28 }
 0x298   :  { %v3930_v52 = vadd.s32 4294967169, %v1709_v8  ;;  %v8348_v50 = vshll.u32 %v6659_v17, %v6741_v58  ;;  %v3341_v3 = vsub.s32 4294967266, %v6845_v41  ;;  %v1667_v60 = vsub.s32 0, %v6840_v62 }
 0x299   :  { %v3408_v15 = vsel %vm3402_vm3, %v3405_v57, %v3407_v53  ;;  %v6869_v51 = vor.u32 4788187, %v3239_v16  ;;  %v1570_v46 = vshll.u32 %v6709_v0, %v6808_v6  ;;  %v3476_v4 = vand.u32 2139095040, %v6832_v47 }
 0x29a   :  { %v6864_v1 = vor.u32 %v3235_v44, %v8348_v50  ;;  %v1715_v9 = vadd.s32 1, %v3930_v52  ;;  %v1571_v7 = vshrl.u32 %v1553_v11, %v1569_v42  ;;  %v1575_v21 = vshll.u32 %v1574_v14, 23 }
 0x29b   :  { %vm3426_vm10 = vc.u32 %v6851_v31, %v6853_v25  ;;  %v3427_v17 = vadd.s32 1, %v6854_v30  ;;  %v3337_v58 = vsub.s32 32, %v6845_v41  ;;  %v3424_v44 = vmul.u32 %v3417_v43, %v3408_v15 }
 0x29c   :  { %v1712_v16 = vand.u32 8388607, %v8211_v23  ;;  %vm1716_vm5 = vcmp.gt.s32.totalorder %v1715_v9, 0  ;;  %v3342_v63 = vadd.s32 127, %v3341_v3  ;;  %v3927_v0 = vmin.u32 %v1667_v60, %v6840_v62 }
 0x29d   :  { %v3428_v6 = vsel %vm3426_vm10, %v3427_v17, %v6854_v30  ;;  %v1717_v61 = vsel %vm1716_vm5, %v1715_v9, 0  ;;  %v3321_v42 = vadd.s32 %v6719_v27, %v6717_v18  ;;  %v3477_v13 = vshrl.u32 %v3476_v4, 23 }
 0x29e   :  { %v3429_v2 = vadd.s32 %v3428_v6, %v3424_v44  ;;  %v6886_v43 = vor.u32 %v1571_v7, %v1570_v46  ;;  %v6888_v57 = vor.u32 4788187, %v1575_v21  ;;  %v1719_v53 = vand.u32 31, %v1717_v61 }
 0x29f   :  { %v6892_v22 = vshrl.u32 %v3321_v42, %v3337_v58  ;;  %v3343_v52 = vshll.u32 %v3342_v63, 23  ;;  %v1669_v50 = vclz %v3927_v0  ;;  %v1713_v18 = vor.u32 8388608, %v1712_v16 }
 0x2a0   :  { %v3430_v30 = vadd.s32 536870912, %v3429_v2  ;;  %v1720_v27 = vsub.s32 32, %v1719_v53  ;;  %v1722_v60 = vshll.u32 %v8263_v37, %v1719_v53  ;;  %v1725_v15 = vshll.u32 %v8260_v26, %v1719_v53 }
 0x2a1   :  { %v3998_v46 = vadd.s32 4294967169, %v3477_v13  ;;  %v1728_v7 = vshll.u32 %v8266_v36, %v1719_v53  ;;  %v1718_v58 = vshrl.u32 %v1717_v61, 5  ;;  %v1731_v44 = vshll.u32 %v8256_v24, %v1719_v53 }
 0x2a2   :  { %v6895_v3 = vshrl.u32 %v3430_v30, 30  ;;  %v1723_v9 = vshrl.u32 %v8260_v26, %v1720_v27  ;;  %v1726_v4 = vshrl.u32 %v8266_v36, %v1720_v27  ;;  %v1729_v21 = vshrl.u32 %v8256_v24, %v1720_v27 }
 0x2a3   :  { %v1732_v16 = vshrl.u32 %v8270_v29, %v1720_v27  ;;  %v6906_v63 = vor.u32 4788187, %v3343_v52  ;;  %vm8229_vm11 = vcmp.lt.s32.totalorder %v6171_v35, 0  ;;  %v1734_v23 = vshll.u32 %v8270_v29, %v1719_v53 }
 0x2a4   :  { %8349 = vst [vmem:[#allocation85_spill] sm:$0xff] %v6895_v3  ;;  %v3432_v17 = vshll.u32 %v6895_v3, 30  ;;  %v1724_v0 = vor.u32 %v1723_v9, %v1722_v60  ;;  %v1727_v6 = vor.u32 %v1726_v4, %v1725_v15  ;;  %v1730_v42 = vor.u32 %v1729_v21, %v1728_v7 }
 0x2a5   :  { %v1733_v30 = vor.u32 %v1732_v16, %v1731_v44  ;;  %v1735_v45 = vshrl.u32 %v8261_v40, %v1720_v27  ;;  %v3928_v14 = vadd.s32 4294967294, %v1669_v50  ;;  %v1721_v61 = vshrl.u32 %v8263_v37, %v1720_v27 }
 0x2a6   :  { %v6909_v13 = vsub.s32 %v3429_v2, %v3432_v17  ;;  %v1753_v8 = vshll.u32 %v1713_v18, 8  ;;  %v3483_v10 = vadd.s32 1, %v3998_v46  ;;  %vm1737_vm8 = vcmp.lt.s32.totalorder %v1718_v58, 1 }
 0x2a7   :  { %v1736_v11 = vor.u32 %v1735_v45, %v1734_v23  ;;  %vm1740_vm3 = vcmp.lt.s32.totalorder %v1718_v58, 4  ;;  %vm1739_vm10 = vcmp.lt.s32.totalorder %v1718_v58, 3  ;;  %v1745_v2 = vsel %vm1737_vm8, %v1724_v0, %v1727_v6  ;;  %v129_v45 = vpop.permute.xlu0 %128 }
 0x2a8   :  { %v3435_v52 = vsub.s32 0, %v6909_v13  ;;  %v1742_v60 = vsel %vm1740_vm3, %v1730_v42, 2102212464  ;;  %v1746_v15 = vsel %vm1740_vm3, %v1733_v30, 920167782  ;;  %vm1738_vm5 = vcmp.lt.s32.totalorder %v1718_v58, 2 }
 0x2a9   :  { %v1747_v53 = vsel %vm1739_vm10, %v1730_v42, %v1746_v15  ;;  %v1749_v50 = vsel %vm1737_vm8, %v1727_v6, %v1730_v42  ;;  %v1750_v27 = vsel %vm1740_vm3, %v1736_v11, 1326507024  ;;  %v8350_v46 = vand.u32 2147483647, %v6832_v47  ;;  %v4434_v15 = vld [vmem:[%s8050_s1] ss:$0 sm:$0xff] }
 0x2aa   :  { %v3995_v9 = vmin.u32 %v3435_v52, %v6909_v13  ;;  %v1748_v18 = vsel %vm1738_vm5, %v1745_v2, %v1747_v53  ;;  %vm3484_vm2 = vcmp.gt.s32.totalorder %v3483_v10, 0  ;;  %vm3929_vm14 = vcmp.lt.s32.totalorder %v3928_v14, 0 }
 0x2ab   :  { %v3480_v23 = vand.u32 8388607, %v8350_v46  ;;  %v1741_v4 = vsel %vm1737_vm8, %v1721_v61, %v1724_v0  ;;  %v1743_v7 = vsel %vm1739_vm10, %v1727_v6, %v1742_v60  ;;  %v1751_v21 = vsel %vm1739_vm10, %v1733_v30, %v1750_v27 }
 0x2ac   :  { %v1752_v17 = vsel %vm1738_vm5, %v1749_v50, %v1751_v21  ;;  %v6926_v44 = vmul.u32.u64.low %v1753_v8, %v1748_v18  ;;  %v6927_v16 = vmul.u32.u64.high %v1753_v8, %v1748_v18, %v6926_v44  ;;  %v3485_v42 = vsel %vm3484_vm2, %v3483_v10, 0 }
 0x2ad   :  { %v3437_v11 = vclz %v3995_v9  ;;  %v6930_v52 = vmul.u32.u64.low %v1753_v8, %v1752_v17  ;;  %v6931_v2 = vmul.u32.u64.high %v1753_v8, %v1752_v17, %v6930_v52  ;;  %v6936_v0 = vmul.f32 %v4434_v15, %v129_v45 }
 0x2ae   :  { %v8352_v6 = vxor.u32 2147483648, %v6802_v33  ;;  %v8354_v61 = vand.u32 2147483647, %v6869_v51  ;;  %v8355_v10 = vcvt.s32.f32 %v6864_v1  ;;  %v6951_v9 = vsel %vm3929_vm14, 0, %v3928_v14 }
 0x2af   :  { %8351 = vst [vmem:[#allocation86_spill] sm:$0xff] %v6936_v0  ;;  %v3487_v53 = vand.u32 31, %v3485_v42  ;;  %v8356_v27 = vshll.u32 %v6762_v56, %v6845_v41  ;;  %v1763_v1 = vadd.s32 1, %v6927_v16  ;;  %v3481_v45 = vor.u32 8388608, %v3480_v23 }
 0x2b0   :  { %v6943_v30 = vsel %vm8229_vm11, %v8352_v6, %v6802_v33  ;;  %v6949_v60 = vmul.f32 %v8355_v10, %v8354_v61  ;;  %v1744_v33 = vsel %vm1738_vm5, %v1741_v4, %v1743_v7  ;;  %v1677_v17 = vsub.s32 4294967266, %v6951_v9 }
 0x2b1   :  { %8353 = vst [vmem:[#allocation87_spill] sm:$0xff] %v6943_v30  ;;  %v6959_v46 = vor.u32 %v6892_v22, %v8356_v27  ;;  %v3488_v14 = vsub.s32 32, %v3487_v53  ;;  %v3996_v52 = vadd.s32 4294967294, %v3437_v11  ;;  %v1760_v6 = vmul.u32 %v1753_v8, %v1744_v33 }
 0x2b2   :  { %vm1762_vm14 = vc.u32 %v6931_v2, %v6926_v44  ;;  %v3486_v56 = vshrl.u32 %v3485_v42, 5  ;;  %v3490_v58 = vshll.u32 %v8263_v37, %v3487_v53  ;;  %v3493_v23 = vshll.u32 %v8260_v26, %v3487_v53 }
 0x2b3   :  { %v3491_v41 = vshrl.u32 %v8260_v26, %v3488_v14  ;;  %v1764_v22 = vsel %vm1762_vm14, %v1763_v1, %v6927_v16  ;;  %v3494_v4 = vshrl.u32 %v8266_v36, %v3488_v14  ;;  %v3496_v11 = vshll.u32 %v8266_v36, %v3487_v53 }
 0x2b4   :  { %v1765_v7 = vadd.s32 %v1764_v22, %v1760_v6  ;;  %v3497_v61 = vshrl.u32 %v8256_v24, %v3488_v14  ;;  %v6976_v8 = vshll.u32 %v3481_v45, 8  ;;  %vm3997_vm2 = vcmp.lt.s32.totalorder %v3996_v52, 0 }
 0x2b5   :  { %v3492_v10 = vor.u32 %v3491_v41, %v3490_v58  ;;  %v3495_v42 = vor.u32 %v3494_v4, %v3493_v23  ;;  %v1812_v27 = vand.u32 2139095040, %v6936_v0  ;;  %v3499_v1 = vshll.u32 %v8256_v24, %v3487_v53 }
 0x2b6   :  { %v1766_v33 = vadd.s32 536870912, %v1765_v7  ;;  %v3498_v16 = vor.u32 %v3497_v61, %v3496_v11  ;;  %v3500_v15 = vshrl.u32 %v8270_v29, %v3488_v14  ;;  %v3502_v21 = vshll.u32 %v8270_v29, %v3487_v53 }
 0x2b7   :  { %v3503_v6 = vshrl.u32 %v8261_v40, %v3488_v14  ;;  %vm3505_vm8 = vcmp.lt.s32.totalorder %v3486_v56, 1  ;;  %vm3508_vm3 = vcmp.lt.s32.totalorder %v3486_v56, 4  ;;  %vm3506_vm10 = vcmp.lt.s32.totalorder %v3486_v56, 2 }
 0x2b8   :  { %v6983_v22 = vshrl.u32 %v1766_v33, 30  ;;  %v3501_v45 = vor.u32 %v3500_v15, %v3499_v1  ;;  %v3510_v41 = vsel %vm3508_vm3, %v3498_v16, 2102212464  ;;  %v3489_v58 = vshrl.u32 %v8263_v37, %v3488_v14 }
 0x2b9   :  { %v3504_v23 = vor.u32 %v3503_v6, %v3502_v21  ;;  %vm3507_vm5 = vcmp.lt.s32.totalorder %v3486_v56, 3  ;;  %v3513_v4 = vsel %vm3505_vm8, %v3492_v10, %v3495_v42  ;;  %v6988_v11 = vsel %vm3997_vm2, 0, %v3996_v52 }
 0x2ba   :  { %8357 = vst [vmem:[#allocation88_spill] sm:$0xff] %v6983_v22  ;;  %v1768_v53 = vshll.u32 %v6983_v22, 30  ;;  %v3514_v61 = vsel %vm3508_vm3, %v3501_v45, 920167782  ;;  %v3517_v51 = vsel %vm3505_vm8, %v3495_v42, %v3498_v16  ;;  %v3509_v18 = vsel %vm3505_vm8, %v3489_v58, %v3492_v10 }
 0x2bb   :  { %v3511_v33 = vsel %vm3507_vm5, %v3495_v42, %v3510_v41  ;;  %v3515_v50 = vsel %vm3507_vm5, %v3498_v16, %v3514_v61  ;;  %v3518_v15 = vsel %vm3508_vm3, %v3504_v23, 1326507024  ;;  %v1813_v6 = vshrl.u32 %v1812_v27, 23 }
 0x2bc   :  { %v6993_v1 = vsub.s32 %v1765_v7, %v1768_v53  ;;  %v3516_v14 = vsel %vm3506_vm10, %v3513_v4, %v3515_v50  ;;  %v3519_v21 = vsel %vm3507_vm5, %v3501_v45, %v3518_v15  ;;  %v1678_v47 = vadd.s32 127, %v1677_v17 }
 0x2bd   :  { %v3520_v52 = vsel %vm3506_vm10, %v3517_v51, %v3519_v21  ;;  %v6998_v3 = vmul.u32.u64.low %v6976_v8, %v3516_v14  ;;  %v6999_v22 = vmul.u32.u64.high %v6976_v8, %v3516_v14, %v6998_v3  ;;  %v3347_v10 = vcvt.s32.f32 %v6959_v46 }
 0x2be   :  { %v7004_v42 = vmul.u32.u64.low %v6976_v8, %v3520_v52  ;;  %v7005_v16 = vmul.u32.u64.high %v6976_v8, %v3520_v52, %v7004_v42  ;;  %v3934_v7 = vadd.s32 4294967169, %v1813_v6  ;;  %v1657_v50 = vadd.s32 %v6773_v59, %v6783_v19  ;;  %v8363_v6 = vld [vmem:[#allocation7_spill] sm:$0xff] }
 0x2bf   :  { %v3445_v27 = vsub.s32 4294967266, %v6988_v11  ;;  %v1771_v17 = vsub.s32 0, %v6993_v1  ;;  %v3512_v51 = vsel %vm3506_vm10, %v3509_v18, %v3511_v33  ;;  %v8358_v45 = vand.u32 2147483647, %v6888_v57 }
 0x2c0   :  { %v8359_v41 = vcvt.s32.f32 %v6886_v43  ;;  %v8360_v46 = vand.u32 2147483647, %v6906_v63  ;;  %v1674_v4 = vshll.u32 %v6840_v62, %v6951_v9  ;;  %v1819_v59 = vadd.s32 1, %v3934_v7 }
 0x2c1   :  { %v8361_v19 = vsub.s32 32, %v6951_v9  ;;  %v1679_v61 = vshll.u32 %v1678_v47, 23  ;;  %v3531_v18 = vadd.s32 1, %v6999_v22  ;;  %v8362_v57 = vand.u32 2147483647, %v6936_v0 }
 0x2c2   :  { %v7016_v58 = vmul.f32 %v8359_v41, %v8358_v45  ;;  %v7020_v23 = vmul.f32 %v3347_v10, %v8360_v46  ;;  %v3441_v43 = vsub.s32 32, %v6988_v11  ;;  %v3528_v33 = vmul.u32 %v6976_v8, %v3512_v51  ;;  %v8366_v10 = vld [vmem:[#allocation15_spill] sm:$0xff] }
 0x2c3   :  { %v1675_v53 = vshrl.u32 %v1657_v50, %v8361_v19  ;;  %v1816_v56 = vand.u32 8388607, %v8362_v57  ;;  %vm3530_vm14 = vc.u32 %v7005_v16, %v6998_v3  ;;  %vm1820_vm2 = vcmp.gt.s32.totalorder %v1819_v59, 0 }
 0x2c4   :  { %v7033_v63 = vadd.s32 127, %v3445_v27  ;;  %v3931_v62 = vmin.u32 %v1771_v17, %v6993_v1  ;;  %v3532_v9 = vsel %vm3530_vm14, %v3531_v18, %v6999_v22  ;;  %v1821_v47 = vsel %vm1820_vm2, %v1819_v59, 0 }
 0x2c5   :  { %v3533_v14 = vadd.s32 %v3532_v9, %v3528_v33  ;;  %v1823_v21 = vand.u32 31, %v1821_v47  ;;  %v8220_v52 = vand.u32 2147483647, %v8363_v6  ;;  %v7041_v42 = vor.u32 %v1675_v53, %v1674_v4 }
 0x2c6   :  { %v3425_v7 = vadd.s32 %v6853_v25, %v6851_v31  ;;  %v7045_v50 = vor.u32 4788187, %v1679_v61  ;;  %v3447_v45 = vshll.u32 %v7033_v63, 23  ;;  %v1773_v41 = vclz %v3931_v62 }
 0x2c7   :  { %v3534_v27 = vadd.s32 536870912, %v3533_v14  ;;  %v1824_v17 = vsub.s32 32, %v1823_v21  ;;  %v1817_v46 = vor.u32 8388608, %v1816_v56  ;;  %v1822_v19 = vshrl.u32 %v1821_v47, 5  ;;  %v8365_v47 = vld [vmem:[#allocation12_spill] sm:$0xff] }
 0x2c8   :  { %v3443_v51 = vshrl.u32 %v3425_v7, %v3441_v43  ;;  %v1826_v4 = vshll.u32 %v8263_v37, %v1823_v21  ;;  %v7055_v31 = vand.u32 8388607, %v8220_v52  ;;  %v1829_v53 = vshll.u32 %v8260_v26, %v1823_v21 }
 0x2c9   :  { %v7050_v59 = vshrl.u32 %v3534_v27, 30  ;;  %v1827_v25 = vshrl.u32 %v8260_v26, %v1824_v17  ;;  %v1830_v61 = vshrl.u32 %v8266_v36, %v1824_v17  ;;  %v1833_v18 = vshrl.u32 %v8256_v24, %v1824_v17 }
 0x2ca   :  { %v1832_v56 = vshll.u32 %v8266_v36, %v1823_v21  ;;  %v1835_v43 = vshll.u32 %v8256_v24, %v1823_v21  ;;  %v1836_v33 = vshrl.u32 %v8270_v29, %v1824_v17  ;;  %v3932_v63 = vadd.s32 4294967294, %v1773_v41 }
 0x2cb   :  { %8364 = vst [vmem:[#allocation7_spill] sm:$0xff] %v7050_v59  ;;  %v3536_v57 = vshll.u32 %v7050_v59, 30  ;;  %v1828_v62 = vor.u32 %v1827_v25, %v1826_v4  ;;  %v1831_v9 = vor.u32 %v1830_v61, %v1829_v53  ;;  %v266_v7 = vshll.u32 %v8263_v37, %v8365_v47 }
 0x2cc   :  { %v1834_v27 = vor.u32 %v1833_v18, %v1832_v56  ;;  %v1837_v52 = vor.u32 %v1836_v33, %v1835_v43  ;;  %v1857_v8 = vshll.u32 %v1817_v46, 8  ;;  %v267_v15 = vshrl.u32 %v8260_v26, %v8366_v10 }
 0x2cd   :  { %v1838_v22 = vshll.u32 %v8270_v29, %v1823_v21  ;;  %v1839_v59 = vshrl.u32 %v8261_v40, %v1824_v17  ;;  %v269_v0 = vshll.u32 %v8260_v26, %v8365_v47  ;;  %v270_v41 = vshrl.u32 %v8266_v36, %v8366_v10 }
 0x2ce   :  { %v7075_v4 = vsub.s32 %v3533_v14, %v3536_v57  ;;  %vm1841_vm8 = vcmp.lt.s32.totalorder %v1822_v19, 1  ;;  %v272_v25 = vshll.u32 %v8266_v36, %v8365_v47  ;;  %v273_v46 = vshrl.u32 %v8256_v24, %v8366_v10 }
 0x2cf   :  { %vm3933_vm3 = vcmp.lt.s32.totalorder %v3932_v63, 0  ;;  %v1840_v53 = vor.u32 %v1839_v59, %v1838_v22  ;;  %vm1844_vm10 = vcmp.lt.s32.totalorder %v1822_v19, 4  ;;  %v1849_v40 = vsel %vm1841_vm8, %v1828_v62, %v1831_v9 }
 0x2d0   :  { %v1825_v29 = vshrl.u32 %v8263_v37, %v1824_v17  ;;  %vm1843_vm5 = vcmp.lt.s32.totalorder %v1822_v19, 3  ;;  %v1846_v21 = vsel %vm1844_vm10, %v1834_v27, 2102212464  ;;  %v1850_v61 = vsel %vm1844_vm10, %v1837_v52, 920167782 }
 0x2d1   :  { %vm1842_vm14 = vcmp.lt.s32.totalorder %v1822_v19, 2  ;;  %v1851_v14 = vsel %vm1843_vm5, %v1834_v27, %v1850_v61  ;;  %v1853_v18 = vsel %vm1841_vm8, %v1831_v9, %v1834_v27  ;;  %v1854_v57 = vsel %vm1844_vm10, %v1840_v53, 1326507024  ;;  %v8371_v19 = vld [vmem:[#allocation18_spill] sm:$0xff] }
 0x2d2   :  { %v3539_v56 = vsub.s32 0, %v7075_v4  ;;  %v1845_v43 = vsel %vm1841_vm8, %v1825_v29, %v1828_v62  ;;  %v1852_v33 = vsel %vm1842_vm14, %v1849_v40, %v1851_v14  ;;  %v1855_v22 = vsel %vm1843_vm5, %v1837_v52, %v1854_v57 }
 0x2d3   :  { %v1847_v59 = vsel %vm1843_vm5, %v1831_v9, %v1846_v21  ;;  %v1856_v47 = vsel %vm1842_vm14, %v1853_v18, %v1855_v22  ;;  %v7088_v30 = vmul.u32.u64.low %v1857_v8, %v1852_v33  ;;  %v7089_v17 = vmul.u32.u64.high %v1857_v8, %v1852_v33, %v7088_v30 }
 0x2d4   :  { %v7092_v35 = vmul.u32.u64.low %v1857_v8, %v1856_v47  ;;  %v7093_v38 = vmul.u32.u64.high %v1857_v8, %v1856_v47, %v7092_v35  ;;  %v268_v61 = vor.u32 %v267_v15, %v266_v7  ;;  %v271_v27 = vor.u32 %v270_v41, %v269_v0 }
 0x2d5   :  { %v1681_v53 = vand.u32 2147483647, %v7045_v50  ;;  %v1683_v34 = vcvt.s32.f32 %v7041_v42  ;;  %v7098_v62 = vsel %vm3933_vm3, 0, %v3932_v63  ;;  %v274_v52 = vor.u32 %v273_v46, %v272_v25  ;;  %v8368_v42 = vld [vmem:[#allocation14_spill] sm:$0xff] }
 0x2d6   :  { %vm8233_vm2 = vcmp.lt.s32.totalorder %v6346_v48, 0  ;;  %v8367_v9 = vshll.u32 %v6909_v13, %v6988_v11  ;;  %v3448_v29 = vor.u32 4788187, %v3447_v45  ;;  %v3999_v21 = vmin.u32 %v3539_v56, %v7075_v4  ;;  %v8369_v11 = vld [vmem:[#allocation22_spill] sm:$0xff]  ;;  %v8370_v45 = vld [vmem:[#allocation24_spill] sm:$0xff] }
 0x2d7   :  { %v1848_v35 = vsel %vm1842_vm14, %v1845_v43, %v1847_v59  ;;  %v1867_v0 = vadd.s32 1, %v7089_v17  ;;  %v257_v15 = vor.u32 8388608, %v7055_v31  ;;  %vm281_vm8 = vcmp.lt.s32.totalorder %v8368_v42, 1 }
 0x2d8   :  { %v3444_v40 = vor.u32 %v3443_v51, %v8367_v9  ;;  %vm283_vm3 = vcmp.lt.s32.totalorder %v8368_v42, 3  ;;  %vm8234_vm10 = vcmp.lt.s32.totalorder %v6349_v39, 0  ;;  %v1781_v50 = vsub.s32 4294967266, %v7098_v62 }
 0x2d9   :  { %v289_v13 = vsel %vm281_vm8, %v268_v61, %v271_v27  ;;  %v291_v51 = vsel %vm283_vm3, %v274_v52, %v8369_v11  ;;  %v295_v31 = vsel %vm283_vm3, %v8371_v19, %v8370_v45  ;;  %vm8231_vm5 = vcmp.lt.s32.totalorder %v6523_v55, 0  ;;  %v8375_v19 = vld [vmem:[#allocation11_spill] sm:$0xff] }
 0x2da   :  { %v1864_v63 = vmul.u32 %v1857_v8, %v1848_v35  ;;  %vm1866_vm14 = vc.u32 %v7093_v38, %v7088_v30  ;;  %v265_v7 = vshrl.u32 %v8263_v37, %v8366_v10  ;;  %v293_v41 = vsel %vm281_vm8, %v271_v27, %v274_v52 }
 0x2db   :  { %v3541_v25 = vclz %v3999_v21  ;;  %v1868_v46 = vsel %vm1866_vm14, %v1867_v0, %v7089_v17  ;;  %vm282_vm11 = vcmp.lt.s32.totalorder %v8368_v42, 2  ;;  %v286_v14 = vsel %vm284_vm0, %v274_v52, 2102212464 }
 0x2dc   :  { %v1869_v18 = vadd.s32 %v1868_v46, %v1864_v63  ;;  %v292_v8 = vsel %vm282_vm11, %v289_v13, %v291_v51  ;;  %v296_v57 = vsel %vm282_vm11, %v293_v41, %v295_v31  ;;  %v297_v56 = vshll.u32 %v257_v15, 8 }
 0x2dd   :  { %v1684_v10 = vmul.f32 %v1683_v34, %v1681_v53  ;;  %v3449_v43 = vand.u32 2147483647, %v3448_v29  ;;  %v1782_v33 = vadd.s32 127, %v1781_v50  ;;  %v285_v22 = vsel %vm281_vm8, %v265_v7, %v268_v61  ;;  %v8376_v7 = vld [vmem:[#allocation9_spill] sm:$0xff] }
 0x2de   :  { %v1870_v59 = vadd.s32 536870912, %v1869_v18  ;;  %v287_v47 = vsel %vm283_vm3, %v271_v27, %v286_v14  ;;  %v7140_v17 = vmul.u32.u64.low %v297_v56, %v296_v57  ;;  %v7141_v52 = vmul.u32.u64.high %v297_v56, %v296_v57, %v7140_v17 }
 0x2df   :  { %v3451_v9 = vcvt.s32.f32 %v3444_v40  ;;  %v1777_v21 = vsub.s32 32, %v7098_v62  ;;  %v7144_v35 = vmul.u32.u64.low %v297_v56, %v292_v8  ;;  %v7145_v0 = vmul.u32.u64.high %v297_v56, %v292_v8, %v7144_v35 }
 0x2e0   :  { %v8372_v34 = vxor.u32 2147483648, %v6949_v60  ;;  %vm8232_vm0 = vcmp.lt.s32.totalorder %v6646_v32, 0  ;;  %v4000_v27 = vadd.s32 4294967294, %v3541_v25  ;;  %v7156_v53 = vshrl.u32 %v1870_v59, 30 }
 0x2e1   :  { %v1685_v29 = vxor.u32 2147483648, %v1684_v10  ;;  %vm8230_vm8 = vcmp.lt.s32.totalorder %v6695_v12, 0  ;;  %v3452_v40 = vmul.f32 %v3451_v9, %v3449_v43  ;;  %v1761_v15 = vadd.s32 %v6926_v44, %v6931_v2 }
 0x2e2   :  { %v7153_v61 = vsel %vm8233_vm2, %v8372_v34, %v6949_v60  ;;  %v288_v50 = vsel %vm282_vm11, %v285_v22, %v287_v47  ;;  %v8373_v13 = vxor.u32 2147483648, %v7016_v58  ;;  %v1783_v11 = vshll.u32 %v1782_v33, 23  ;;  %v8377_v33 = vld [vmem:[#allocation5_spill] sm:$0xff]  ;;  %v8383_v34 = vld [vmem:[#allocation19_spill] sm:$0xff] }
 0x2e3   :  { %v1872_v51 = vshll.u32 %v7156_v53, 30  ;;  %vm306_vm3 = vc.u32 %v7141_v52, %v7144_v35  ;;  %v8374_v45 = vxor.u32 2147483648, %v7020_v23  ;;  %v1779_v2 = vshrl.u32 %v1761_v15, %v1777_v21  ;;  %v8381_v47 = vld [vmem:[#allocation37_spill] sm:$0xff] }
 0x2e4   :  { %v7168_v60 = vsel %vm8234_vm10, %v8373_v13, %v7016_v58  ;;  %v307_v42 = vadd.s32 1, %v7145_v0  ;;  %v439_v31 = vsub.s32 4, %v8375_v19  ;;  %vm4001_vm11 = vcmp.lt.s32.totalorder %v4000_v27, 0  ;;  %v8382_v21 = vld [vmem:[#allocation21_spill] sm:$0xff] }
 0x2e5   :  { %v7178_v44 = vsel %vm8231_vm5, %v8374_v45, %v7020_v23  ;;  %v7182_v58 = vsub.s32 %v1869_v18, %v1872_v51  ;;  %v304_v63 = vmul.u32 %v297_v56, %v288_v50  ;;  %v1913_v41 = vand.u32 2147483647, %v8376_v7 }
 0x2e6   :  { %v7187_v25 = vsel %vm8232_vm0, %v1685_v29, %v1684_v10  ;;  %v3453_v46 = vxor.u32 2147483648, %v3452_v40  ;;  %v1778_v23 = vshll.u32 %v6993_v1, %v7098_v62  ;;  %v308_v14 = vsel %vm306_vm3, %v307_v42, %v7145_v0 }
 0x2e7   :  { %v1784_v8 = vor.u32 4788187, %v1783_v11  ;;  %v1875_v57 = vsub.s32 0, %v7182_v58  ;;  %v309_v43 = vadd.s32 %v308_v14, %v304_v63  ;;  %v8378_v18 = vand.u32 2147483647, %v8377_v33 }
 0x2e8   :  { %v1780_v22 = vor.u32 %v1779_v2, %v1778_v23  ;;  %v3544_v59 = vsel %vm4001_vm11, 0, %v4000_v27  ;;  %v440_v10 = vsel %vm355_vm12, %v439_v31, %v8375_v19  ;;  %v1920_v9 = vand.u32 8388607, %v1913_v41 }
 0x2e9   :  { %vm7195_vm14 = vcmp.le.f32.partialorder %v8378_v18, 0.7853982  ;;  %v3935_v62 = vmin.u32 %v1875_v57, %v7182_v58  ;;  %v310_v17 = vadd.s32 536870912, %v309_v43  ;;  %v1931_v0 = vshrl.u32 %v8260_v26, %v8382_v21 }
 0x2ea   :  { %v441_v1 = vsel %vm7195_vm14, %v8377_v33, %v8381_v47  ;;  %v1933_v27 = vshll.u32 %v8260_v26, %v8383_v34  ;;  %v1934_v29 = vshrl.u32 %v8266_v36, %v8382_v21  ;;  %v1936_v15 = vshll.u32 %v8266_v36, %v8383_v34 }
 0x2eb   :  { %v1937_v50 = vshrl.u32 %v8256_v24, %v8382_v21  ;;  %v7221_v13 = vsel %vm8230_vm8, %v3453_v46, %v3452_v40  ;;  %v1785_v11 = vand.u32 2147483647, %v1784_v8  ;;  %v311_v51 = vshrl.u32 %v310_v17, 30  ;;  %v8384_v8 = vld [vmem:[#allocation25_spill] sm:$0xff] }
 0x2ec   :  { %4303 = vcosq.f32 %v441_v1  ;;  %v1930_v26 = vshll.u32 %v8263_v37, %v8383_v34  ;;  %v1935_v45 = vor.u32 %v1934_v29, %v1933_v27  ;;  %v3545_v42 = vsub.s32 32, %v3544_v59 }
 0x2ed   :  { %4305 = vsinq.f32 %v441_v1  ;;  %v1938_v2 = vor.u32 %v1937_v50, %v1936_v15  ;;  %v1877_v19 = vclz %v3935_v62  ;;  %vm251_vm12 = vcmp.lt.s32.totalorder %v8363_v6, 0 }
 0x2ee   :  { %v312_v36 = vshll.u32 %v311_v51, 30  ;;  %v442_v24 = vsel %vm7195_vm14, 0, %v440_v10  ;;  %v1787_v31 = vcvt.s32.f32 %v1780_v22  ;;  %v3529_v40 = vadd.s32 %v6998_v3, %v7005_v16  ;;  %v8388_v16 = vld [vmem:[#allocation31_spill] sm:$0xff] }
 0x2ef   :  { %v1921_v63 = vor.u32 8388608, %v1920_v9  ;;  %v1932_v46 = vor.u32 %v1931_v0, %v1930_v26  ;;  %v3549_v23 = vsub.s32 4294967266, %v3544_v59  ;;  %vm1945_vm3 = vcmp.lt.s32.totalorder %v8384_v8, 1  ;;  %v8389_v10 = vld [vmem:[#allocation27_spill] sm:$0xff]  ;;  %v8390_v0 = vld [vmem:[#allocation30_spill] sm:$0xff] }
 0x2f0   :  { %v7230_v14 = vsub.s32 %v309_v43, %v312_v36  ;;  %vm1947_vm11 = vcmp.lt.s32.totalorder %v8384_v8, 3  ;;  %v7234_v57 = vmul.f32 %v1787_v31, %v1785_v11  ;;  %v8385_v18 = vand.u32 2147483647, %v8363_v6 }
 0x2f1   :  { %v446_v22 = vadd.s32 3, %v442_v24  ;;  %v1957_v3 = vsel %vm1945_vm3, %v1935_v45, %v1938_v2  ;;  %v1959_v43 = vsel %vm1947_vm11, %v8389_v10, %v8388_v16  ;;  %v3547_v47 = vshrl.u32 %v3529_v40, %v3545_v42 }
 0x2f2   :  { %vm7238_vm8 = vcmp.le.f32.partialorder %v8385_v18, 0.7853982  ;;  %v3936_v1 = vadd.s32 4294967294, %v1877_v19  ;;  %v315_v62 = vsub.s32 0, %v7230_v14  ;;  %vm1946_vm14 = vcmp.lt.s32.totalorder %v8384_v8, 2 }
 0x2f3   :  { %v335_v17 = vsub.s32 4, %v311_v51  ;;  %v1953_v9 = vsel %vm1945_vm3, %v1932_v46, %v1935_v45  ;;  %v1955_v34 = vsel %vm1947_vm11, %v1938_v2, %v8390_v0  ;;  %v1961_v27 = vshll.u32 %v1921_v63, 8 }
 0x2f4   :  { %v3546_v29 = vshll.u32 %v7075_v4, %v3544_v59  ;;  %v7256_v15 = vadd.s32 127, %v3549_v23  ;;  %v3875_v50 = vmin.u32 %v315_v62, %v7230_v14  ;;  %v1960_v11 = vsel %vm1946_vm14, %v1957_v3, %v1959_v43 }
 0x2f5   :  { %v7261_v26 = vand.u32 3, %v446_v22  ;;  %v1950_v42 = vsel %vm1948_vm4, %v1938_v2, 2102212464  ;;  %v7265_v19 = vmul.u32.u64.low %v1961_v27, %v1960_v11  ;;  %v7266_v36 = vmul.u32.u64.high %v1961_v27, %v1960_v11, %v7265_v19 }
 0x2f6   :  { %v317_v31 = vclz %v3875_v50  ;;  %v1929_v4 = vshrl.u32 %v8263_v37, %v8382_v21  ;;  %v1956_v59 = vsel %vm1946_vm14, %v1953_v9, %v1955_v34  ;;  %v7273_v40 = vor.u32 %v3547_v47, %v3546_v29  ;;  %v8395_v47 = vld [vmem:[#allocation16_spill] sm:$0xff]  ;;  %v8396_v9 = vld [vmem:[#allocation38_spill] sm:$0xff] }
 0x2f7   :  { %v1865_v63 = vadd.s32 %v7088_v30, %v7093_v38  ;;  %vm3937_vm5 = vcmp.lt.s32.totalorder %v3936_v1, 0  ;;  %v336_v2 = vsel %vm251_vm12, %v335_v17, %v311_v51  ;;  %v3551_v23 = vshll.u32 %v7256_v15, 23 }
 0x2f8   :  { %v3876_v18 = vadd.s32 4294967294, %v317_v31  ;;  %v1949_v22 = vsel %vm1945_vm3, %v1929_v4, %v1932_v46  ;;  %v1951_v37 = vsel %vm1947_vm11, %v1935_v45, %v1950_v42  ;;  %v305_v3 = vadd.s32 %v7144_v35, %v7141_v52  ;;  %v8391_v52 = vld [vmem:[#allocation6_spill] sm:$0xff] }
 0x2f9   :  { %v4304_v21 = vpop.eup %4303  ;;  %vm449_vm4 = vcmp.eq.s32.totalorder %v7261_v26, 0  ;;  %v7287_v38 = vmul.u32.u64.low %v1961_v27, %v1956_v59  ;;  %v7288_v30 = vmul.u32.u64.high %v1961_v27, %v1956_v59, %v7287_v38  ;;  %v7291_v16 = vsel %vm3937_vm5, 0, %v3936_v1  ;;  %v8397_v59 = vld [vmem:[#allocation23_spill] sm:$0xff] }
 0x2fa   :  { %v4306_v51 = vpop.eup %4305  ;;  %vm3877_vm0 = vcmp.lt.s32.totalorder %v3876_v18, 0  ;;  %v338_v46 = vsel %vm7238_vm8, 0, %v336_v2  ;;  %vm452_vm3 = vcmp.eq.s32.totalorder %v7261_v26, 2  ;;  %v1952_v10 = vsel %vm1946_vm14, %v1949_v22, %v1951_v37 }
 0x2fb   :  { %v320_v45 = vsel %vm3877_vm0, 0, %v3876_v18  ;;  %v8392_v35 = vand.u32 2147483647, %v8391_v52  ;;  %v2103_v62 = vsub.s32 4, %v8395_v47  ;;  %vm448_vm5 = vcmp.lt.s32.totalorder %v7261_v26, 2 }
 0x2fc   :  { %v321_v1 = vsub.s32 32, %v320_v45  ;;  %v325_v17 = vsub.s32 4294967266, %v320_v45  ;;  %vm1970_vm2 = vc.u32 %v7266_v36, %v7287_v38  ;;  %v1885_v0 = vsub.s32 4294967266, %v7291_v16 }
 0x2fd   :  { %vm7300_vm11 = vcmp.le.f32.partialorder %v8392_v35, 0.7853982  ;;  %v450_v34 = vxor.u32 2147483648, %v4306_v51  ;;  %v453_v29 = vxor.u32 2147483648, %v4304_v21  ;;  %v1971_v15 = vadd.s32 1, %v7288_v30  ;;  %v8398_v35 = vld [vmem:[#allocation10_spill] sm:$0xff] }
 0x2fe   :  { %v2105_v8 = vsel %vm7300_vm11, %v8391_v52, %v8396_v9  ;;  %v322_v50 = vshll.u32 %v7230_v14, %v320_v45  ;;  %v323_v11 = vshrl.u32 %v305_v3, %v321_v1  ;;  %v326_v42 = vadd.s32 127, %v325_v17  ;;  %v8402_v3 = vld [vmem:[#allocation43_spill] sm:$0xff] }
 0x2ff   :  { %v1968_v19 = vmul.u32 %v1961_v27, %v1952_v10  ;;  %v1972_v31 = vsel %vm1970_vm2, %v1971_v15, %v7288_v30  ;;  %v2104_v4 = vsel %vm2019_vm13, %v2103_v62, %v8395_v47  ;;  %4307 = vcosq.f32 %v2105_v8 }
 0x300   :  { %v543_v2 = vsub.s32 4, %v8397_v59  ;;  %v324_v18 = vor.u32 %v323_v11, %v322_v50  ;;  %v327_v22 = vshll.u32 %v326_v42, 23  ;;  %v8399_v9 = vand.u32 2147483647, %v8398_v35 }
 0x301   :  { %v1973_v37 = vadd.s32 %v1972_v31, %v1968_v19  ;;  %v1881_v14 = vsub.s32 32, %v7291_v16  ;;  %v1886_v27 = vadd.s32 127, %v1885_v0  ;;  %4309 = vsinq.f32 %v2105_v8 }
 0x302   :  { %vm7322_vm0 = vcmp.le.f32.partialorder %v8399_v9, 0.7853982  ;;  %v328_v45 = vor.u32 4788187, %v327_v22  ;;  %v451_v10 = vsel %vm449_vm4, %v4304_v21, %v450_v34  ;;  %v454_v47 = vsel %vm452_vm3, %v453_v29, %v4306_v51 }
 0x303   :  { %v545_v30 = vsel %vm7322_vm0, %v8398_v35, %v8402_v3  ;;  %v1974_v62 = vadd.s32 536870912, %v1973_v37  ;;  %v342_v1 = vadd.s32 3, %v338_v46  ;;  %v2106_v17 = vsel %vm7300_vm11, 0, %v2104_v4 }
 0x304   :  { %v544_v8 = vsel %vm459_vm15, %v543_v2, %v8397_v59  ;;  %4311 = vcosq.f32 %v545_v30  ;;  %v329_v0 = vand.u32 2147483647, %v328_v45  ;;  %v331_v15 = vcvt.s32.f32 %v324_v18  ;;  %v8405_v18 = vld [vmem:[#allocation8_spill] sm:$0xff] }
 0x305   :  { %v1975_v50 = vshrl.u32 %v1974_v62, 30  ;;  %4313 = vsinq.f32 %v545_v30  ;;  %v7340_v11 = vor.u32 4788187, %v3551_v23  ;;  %v1883_v21 = vshrl.u32 %v1865_v63, %v1881_v14  ;;  %v8410_v30 = vld [vmem:[#allocation32_spill] sm:$0xff]  ;;  %v8411_v62 = vld [vmem:[#allocation41_spill] sm:$0xff] }
 0x306   :  { %v1887_v34 = vshll.u32 %v1886_v27, 23  ;;  %v455_v51 = vsel %vm448_vm5, %v451_v10, %v454_v47  ;;  %v332_v46 = vmul.f32 %v331_v15, %v329_v0  ;;  %v2110_v43 = vadd.s32 3, %v2106_v17  ;;  %v8409_v27 = vld [vmem:[#allocation17_spill] sm:$0xff]  ;;  %v8412_v17 = vld [vmem:[#allocation20_spill] sm:$0xff] }
 0x307   :  { %v1976_v29 = vshll.u32 %v1975_v50, 30  ;;  %v546_v42 = vsel %vm7322_vm0, 0, %v544_v8  ;;  %v1882_v19 = vshll.u32 %v7182_v58, %v7291_v16  ;;  %vm445_vm13 = vweird.f32 %v8377_v33 }
 0x308   :  { %vm7351_vm15 = vcmp.le.f32.partialorder %v1913_v41, 0.7853982  ;;  %v1999_v63 = vsub.s32 4, %v1975_v50  ;;  %v333_v26 = vxor.u32 2147483648, %v332_v46  ;;  %v7355_v31 = vand.u32 3, %v342_v1 }
 0x309   :  { %vm1915_vm2 = vcmp.lt.s32.totalorder %v8376_v7, 0  ;;  %v7358_v4 = vsub.s32 %v1973_v37, %v1976_v29  ;;  %v7360_v24 = vor.u32 %v1883_v21, %v1882_v19  ;;  %v7362_v59 = vor.u32 4788187, %v1887_v34 }
 0x30a   :  { %v7364_v58 = vsel %vm445_vm13, nan, %v455_v51  ;;  %v550_v33 = vadd.s32 3, %v546_v42  ;;  %v334_v41 = vsel %vm251_vm12, %v333_v26, %v332_v46  ;;  %v7369_v2 = vand.u32 3, %v2110_v43 }
 0x30b   :  { %v1979_v16 = vsub.s32 0, %v7358_v4  ;;  %v8406_v22 = vand.u32 2147483647, %v8405_v18  ;;  %v337_v37 = vsel %vm7238_vm8, %v8363_v6, %v334_v41  ;;  %v2000_v14 = vsel %vm1915_vm2, %v1999_v63, %v1975_v50  ;;  %v8416_v50 = vld [vmem:[#allocation49_spill] sm:$0xff] }
 0x30c   :  { %v2207_v3 = vsub.s32 4, %v8409_v27  ;;  %v647_v45 = vsub.s32 4, %v8410_v30  ;;  %v4308_v10 = vpop.eup %4307  ;;  %4315 = vcosq.f32 %v337_v37  ;;  %v8413_v8 = vand.u32 2147483647, %v8412_v17 }
 0x30d   :  { %vm7373_vm14 = vcmp.le.f32.partialorder %v8406_v22, 0.7853982  ;;  %v3939_v47 = vmin.u32 %v1979_v16, %v7358_v4  ;;  %v1891_v0 = vcvt.s32.f32 %v7360_v24  ;;  %4317 = vsinq.f32 %v337_v37 }
 0x30e   :  { %v2209_v1 = vsel %vm7373_vm14, %v8405_v18, %v8411_v62  ;;  %vm7391_vm12 = vcmp.le.f32.partialorder %v8413_v8, 0.7853982  ;;  %v7396_v15 = vand.u32 3, %v550_v33  ;;  %v4310_v34 = vpop.eup %4309  ;;  %v1889_v51 = vand.u32 2147483647, %v7362_v59  ;;  %v8481_v59 = vld [vmem:[#allocation58_spill] sm:$0xff] }
 0x30f   :  { %v649_v21 = vsel %vm7391_vm12, %v8412_v17, %v8416_v50  ;;  %v1969_v46 = vadd.s32 %v7287_v38, %v7266_v36  ;;  %v1981_v29 = vclz %v3939_v47  ;;  %v2002_v43 = vsel %vm7351_vm15, 0, %v2000_v14 }
 0x310   :  { %vm2113_vm8 = vcmp.eq.s32.totalorder %v7369_v2, 0  ;;  %v2208_v42 = vsel %vm2123_vm7, %v2207_v3, %v8409_v27  ;;  %4319 = vcosq.f32 %v2209_v1  ;;  %v648_v19 = vsel %vm563_vm6, %v647_v45, %v8410_v30  ;;  %v8417_v3 = vld [vmem:[#allocation28_spill] sm:$0xff] }
 0x311   :  { %v4312_v63 = vpop.eup %4311  ;;  %v3940_v26 = vadd.s32 4294967294, %v1981_v29  ;;  %vm2112_vm4 = vcmp.lt.s32.totalorder %v7369_v2, 2  ;;  %vm2116_vm3 = vcmp.eq.s32.totalorder %v7369_v2, 2  ;;  %v2117_v36 = vxor.u32 2147483648, %v4308_v10 }
 0x312   :  { %4321 = vcosq.f32 %v649_v21  ;;  %v4314_v38 = vpop.eup %4313  ;;  %v2006_v33 = vadd.s32 3, %v2002_v43  ;;  %v2114_v41 = vxor.u32 2147483648, %v4310_v34  ;;  %vm553_vm11 = vcmp.eq.s32.totalorder %v7396_v15, 0 }
 0x313   :  { %4323 = vsinq.f32 %v2209_v1  ;;  %vm3941_vm7 = vcmp.lt.s32.totalorder %v3940_v26, 0  ;;  %vm552_vm5 = vcmp.lt.s32.totalorder %v7396_v15, 2  ;;  %v2210_v16 = vsel %vm7373_vm14, 0, %v2208_v42 }
 0x314   :  { %v650_v22 = vsel %vm7391_vm12, 0, %v648_v19  ;;  %4325 = vsinq.f32 %v649_v21  ;;  %vm348_vm6 = vcmp.eq.s32.totalorder %v7355_v31, 2  ;;  %v1984_v37 = vsel %vm3941_vm7, 0, %v3940_v26 }
 0x315   :  { %v554_v14 = vxor.u32 2147483648, %v4314_v38  ;;  %v557_v27 = vxor.u32 2147483648, %v4312_v63  ;;  %v2311_v30 = vsub.s32 4, %v8417_v3  ;;  %vm345_vm0 = vcmp.eq.s32.totalorder %v7355_v31, 0 }
 0x316   :  { %v1985_v45 = vsub.s32 32, %v1984_v37  ;;  %v1989_v47 = vsub.s32 4294967266, %v1984_v37  ;;  %vm2109_vm13 = vweird.f32 %v8391_v52  ;;  %v2118_v9 = vsel %vm2116_vm3, %v2117_v36, %v4310_v34  ;;  %v8418_v34 = vld [vmem:[#allocation13_spill] sm:$0xff]  ;;  %v8422_v36 = vld [vmem:[#allocation44_spill] sm:$0xff] }
 0x317   :  { %vm556_vm14 = vcmp.eq.s32.totalorder %v7396_v15, 2  ;;  %vm344_vm12 = vcmp.lt.s32.totalorder %v7355_v31, 2  ;;  %v7430_v62 = vand.u32 3, %v2006_v33  ;;  %v2115_v1 = vsel %vm2113_vm8, %v4308_v10, %v2114_v41  ;;  %v8423_v41 = vld [vmem:[#allocation29_spill] sm:$0xff] }
 0x318   :  { %v2214_v8 = vadd.s32 3, %v2210_v16  ;;  %v654_v56 = vadd.s32 3, %v650_v22  ;;  %vm341_vm7 = vweird.f32 %v8363_v6  ;;  %v1986_v50 = vshll.u32 %v7358_v4, %v1984_v37  ;;  %v8427_v37 = vld [vmem:[#allocation36_spill] sm:$0xff] }
 0x319   :  { %v1987_v21 = vshrl.u32 %v1969_v46, %v1985_v45  ;;  %v1990_v29 = vadd.s32 127, %v1989_v47  ;;  %vm549_vm10 = vweird.f32 %v8398_v35  ;;  %v8419_v43 = vand.u32 2147483647, %v8418_v34 }
 0x31a   :  { %v555_v19 = vsel %vm553_vm11, %v4312_v63, %v554_v14  ;;  %v558_v10 = vsel %vm556_vm14, %v557_v27, %v4314_v38  ;;  %v2312_v26 = vsel %vm2227_vm1, %v2311_v30, %v8417_v3  ;;  %v8424_v16 = vand.u32 2147483647, %v8423_v41  ;;  %v4316_v63 = vpop.eup %4315  ;;  %v8428_v27 = vld [vmem:[#allocation55_spill] sm:$0xff] }
 0x31b   :  { %vm7439_vm3 = vcmp.le.f32.partialorder %v8419_v43, 0.7853982  ;;  %v1988_v46 = vor.u32 %v1987_v21, %v1986_v50  ;;  %v1991_v33 = vshll.u32 %v1990_v29, 23  ;;  %v2119_v38 = vsel %vm2112_vm4, %v2115_v1, %v2118_v9  ;;  %v4318_v30 = vpop.eup %4317 }
 0x31c   :  { %v2313_v4 = vsel %vm7439_vm3, %v8418_v34, %v8422_v36  ;;  %vm7454_vm8 = vcmp.le.f32.partialorder %v8424_v16, 0.7853982  ;;  %v751_v14 = vsub.s32 4, %v8427_v37  ;;  %v349_v45 = vxor.u32 2147483648, %v4316_v63 }
 0x31d   :  { %4327 = vcosq.f32 %v2313_v4  ;;  %v753_v3 = vsel %vm7454_vm8, %v8423_v41, %v8428_v27  ;;  %v1992_v47 = vor.u32 4788187, %v1991_v33  ;;  %v655_v50 = vand.u32 3, %v654_v56  ;;  %v4320_v9 = vpop.eup %4319 }
 0x31e   :  { %4329 = vsinq.f32 %v2313_v4  ;;  %v2314_v21 = vsel %vm7439_vm3, 0, %v2312_v26  ;;  %v346_v29 = vxor.u32 2147483648, %v4318_v30  ;;  %v559_v2 = vsel %vm552_vm5, %v555_v19, %v558_v10 }
 0x31f   :  { %vm653_vm1 = vweird.f32 %v8412_v17  ;;  %4331 = vcosq.f32 %v753_v3  ;;  %v350_v1 = vsel %vm348_vm6, %v349_v45, %v4318_v30  ;;  %v1993_v43 = vand.u32 2147483647, %v1992_v47  ;;  %v4322_v4 = vpop.eup %4321  ;;  %v8429_v30 = vld [vmem:[#allocation34_spill] sm:$0xff] }
 0x320   :  { %v1995_v36 = vcvt.s32.f32 %v1988_v46  ;;  %v752_v56 = vsel %vm667_vm9, %v751_v14, %v8427_v37  ;;  %v347_v42 = vsel %vm345_vm0, %v4316_v63, %v346_v29  ;;  %v7479_v15 = vsel %vm2109_vm13, nan, %v2119_v38  ;;  %v4324_v26 = vpop.eup %4323  ;;  %v8430_v47 = vld [vmem:[#allocation26_spill] sm:$0xff] }
 0x321   :  { %v7481_v19 = vand.u32 3, %v2214_v8  ;;  %v2318_v10 = vadd.s32 3, %v2314_v21  ;;  %v351_v33 = vsel %vm344_vm12, %v347_v42, %v350_v1  ;;  %vm660_vm4 = vcmp.eq.s32.totalorder %v655_v50, 2  ;;  %v4326_v27 = vpop.eup %4325  ;;  %v8436_v42 = vld [vmem:[#allocation35_spill] sm:$0xff] }
 0x322   :  { %v1996_v46 = vmul.f32 %v1995_v36, %v1993_v43  ;;  %v661_v16 = vxor.u32 2147483648, %v4322_v4  ;;  %v352_v37 = vsel %vm341_vm7, nan, %v351_v33  ;;  %v560_v63 = vsel %vm549_vm10, nan, %v559_v2  ;;  %v8434_v43 = vld [vmem:[#allocation50_spill] sm:$0xff] }
 0x323   :  { %v754_v52 = vsel %vm7454_vm8, 0, %v752_v56  ;;  %4333 = vsinq.f32 %v753_v3  ;;  %4083 = vmatprep.mubr.f32.mxu0 %v352_v37  ;;  %vm656_vm9 = vcmp.lt.s32.totalorder %v655_v50, 2  ;;  %v658_v38 = vxor.u32 2147483648, %v4326_v27  ;;  %v8441_v37 = vld [vmem:[#allocation61_spill] sm:$0xff] }
 0x324   :  { %v1997_v8 = vxor.u32 2147483648, %v1996_v46  ;;  %v662_v31 = vsel %vm660_vm4, %v661_v16, %v4326_v27  ;;  %4084 = vmatmul.mubr.f32.vlgmr.msra.gmra.mxu0 %v7364_v58  ;;  %vm2216_vm11 = vcmp.lt.s32.totalorder %v7481_v19, 2  ;;  %v2221_v14 = vxor.u32 2147483648, %v4320_v9 }
 0x325   :  { %vm657_vm5 = vcmp.eq.s32.totalorder %v655_v50, 0  ;;  %v7493_v6 = vand.u32 3, %v2318_v10  ;;  %v2415_v35 = vsub.s32 4, %v8429_v30  ;;  %4086 = vmatprep.mubr.f32.mxu0 %v560_v63  ;;  %v758_v45 = vadd.s32 3, %v754_v52 }
 0x326   :  { %v1998_v22 = vsel %vm1915_vm2, %v1997_v8, %v1996_v46  ;;  %v659_v3 = vsel %vm657_vm5, %v4322_v4, %v658_v38  ;;  %v8431_v21 = vand.u32 2147483647, %v8430_v47  ;;  %v2218_v2 = vxor.u32 2147483648, %v4324_v26  ;;  %v8440_v46 = vld [vmem:[#allocation45_spill] sm:$0xff] }
 0x327   :  { %v2001_v58 = vsel %vm7351_vm15, %v8376_v7, %v1998_v22  ;;  %v663_v1 = vsel %vm656_vm9, %v659_v3, %v662_v31  ;;  %vm2217_vm2 = vcmp.eq.s32.totalorder %v7481_v19, 0  ;;  %vm8435_vm6 = vcmp.lt.s32.totalorder %v8430_v47, 0 }
 0x328   :  { %vm7500_vm10 = vcmp.le.f32.partialorder %v8431_v21, 0.7853982  ;;  %4335 = vcosq.f32 %v2001_v58  ;;  %v664_v56 = vsel %vm653_vm1, nan, %v663_v1  ;;  %v2416_v4 = vsel %vm8435_vm6, %v2415_v35, %v8429_v30 }
 0x329   :  { %v2417_v36 = vsel %vm7500_vm10, %v8430_v47, %v8434_v43  ;;  %4337 = vsinq.f32 %v2001_v58  ;;  %4087 = vmatmul.mubr.f32.gmra.mxu0 %v664_v56  ;;  %v2418_v50 = vsel %vm7500_vm10, 0, %v2416_v4  ;;  %v8437_v10 = vand.u32 2147483647, %v8436_v42  ;;  %v8447_v58 = vld [vmem:[#allocation40_spill] sm:$0xff]  ;;  %v8449_v4 = vld [vmem:[#allocation47_spill] sm:$0xff] }
 0x32a   :  { %v4328_v23 = vpop.eup %4327  ;;  %v855_v16 = vsub.s32 4, %v8440_v46  ;;  %vm2220_vm0 = vcmp.eq.s32.totalorder %v7481_v19, 2  ;;  %v759_v27 = vand.u32 3, %v758_v45  ;;  %4339 = vcosq.f32 %v2417_v36  ;;  %v8443_v45 = vld [vmem:[#allocation33_spill] sm:$0xff] }
 0x32b   :  { %vm7522_vm15 = vcmp.le.f32.partialorder %v8437_v10, 0.7853982  ;;  %v4330_v17 = vpop.eup %4329  ;;  %v2219_v52 = vsel %vm2217_vm2, %v4320_v9, %v2218_v2  ;;  %v2222_v8 = vsel %vm2220_vm0, %v2221_v14, %v4324_v26  ;;  %vm2320_vm13 = vcmp.lt.s32.totalorder %v7493_v6, 2 }
 0x32c   :  { %v857_v63 = vsel %vm7522_vm15, %v8436_v42, %v8441_v37  ;;  %4341 = vsinq.f32 %v2417_v36  ;;  %vm8442_vm14 = vcmp.lt.s32.totalorder %v8436_v42, 0  ;;  %v4332_v31 = vpop.eup %4331  ;;  %vm2213_vm12 = vweird.f32 %v8405_v18  ;;  %v8448_v36 = vld [vmem:[#allocation56_spill] sm:$0xff]  ;;  %v8451_v37 = vld [vmem:[#allocation42_spill] sm:$0xff] }
 0x32d   :  { %v856_v38 = vsel %vm8442_vm14, %v855_v16, %v8440_v46  ;;  %v2325_v30 = vxor.u32 2147483648, %v4328_v23  ;;  %vm757_vm7 = vweird.f32 %v8423_v41  ;;  %v2422_v35 = vadd.s32 3, %v2418_v50 }
 0x32e   :  { %v858_v22 = vsel %vm7522_vm15, 0, %v856_v38  ;;  %4343 = vcosq.f32 %v857_v63  ;;  %v2322_v9 = vxor.u32 2147483648, %v4330_v17  ;;  %v765_v26 = vxor.u32 2147483648, %v4332_v31 }
 0x32f   :  { %4345 = vsinq.f32 %v857_v63  ;;  %v862_v14 = vadd.s32 3, %v858_v22  ;;  %v2223_v3 = vsel %vm2216_vm11, %v2219_v52, %v2222_v8  ;;  %vm2317_vm3 = vweird.f32 %v8418_v34 }
 0x330   :  { %vm2321_vm8 = vcmp.eq.s32.totalorder %v7493_v6, 0  ;;  %vm2324_vm1 = vcmp.eq.s32.totalorder %v7493_v6, 2  ;;  %vm760_vm4 = vcmp.lt.s32.totalorder %v759_v27, 2  ;;  %vm2012_vm9 = vcmp.eq.s32.totalorder %v7430_v62, 2  ;;  %v4334_v2 = vpop.eup %4333 }
 0x331   :  { %vm761_vm5 = vcmp.eq.s32.totalorder %v759_v27, 0  ;;  %vm764_vm10 = vcmp.eq.s32.totalorder %v759_v27, 2  ;;  %v8444_v21 = vand.u32 2147483647, %v8443_v45  ;;  %v2519_v19 = vsub.s32 4, %v8447_v58 }
 0x332   :  { %vm2009_vm11 = vcmp.eq.s32.totalorder %v7430_v62, 0  ;;  %v2326_v1 = vsel %vm2324_vm1, %v2325_v30, %v4330_v17  ;;  %v2423_v43 = vand.u32 3, %v2422_v35  ;;  %v959_v50 = vsub.s32 4, %v8449_v4  ;;  %v8456_v30 = vld [vmem:[#allocation65_spill] sm:$0xff] }
 0x333   :  { %vm7548_vm2 = vcmp.le.f32.partialorder %v8444_v21, 0.7853982  ;;  %vm2008_vm6 = vcmp.lt.s32.totalorder %v7430_v62, 2  ;;  %v2323_v10 = vsel %vm2321_vm8, %v4328_v23, %v2322_v9  ;;  %v762_v33 = vxor.u32 2147483648, %v4334_v2 }
 0x334   :  { %v2521_v56 = vsel %vm7548_vm2, %v8443_v45, %v8448_v36  ;;  %v766_v46 = vsel %vm764_vm10, %v765_v26, %v4334_v2  ;;  %v7560_v16 = vand.u32 3, %v862_v14  ;;  %vm2005_vm15 = vweird.f32 %v8376_v7  ;;  %v8457_v36 = vld [vmem:[#allocation39_spill] sm:$0xff] }
 0x335   :  { %vm8450_vm0 = vcmp.lt.s32.totalorder %v8443_v45, 0  ;;  %4347 = vcosq.f32 %v2521_v56  ;;  %v8452_v63 = vand.u32 2147483647, %v8451_v37  ;;  %vm8455_vm8 = vcmp.lt.s32.totalorder %v8451_v37, 0  ;;  %v4336_v14 = vpop.eup %4335 }
 0x336   :  { %v2520_v17 = vsel %vm8450_vm0, %v2519_v19, %v8447_v58  ;;  %v960_v23 = vsel %vm8455_vm8, %v959_v50, %v8449_v4  ;;  %v763_v8 = vsel %vm761_vm5, %v4332_v31, %v762_v33  ;;  %4349 = vsinq.f32 %v2521_v56  ;;  %v4338_v58 = vpop.eup %4337  ;;  %v8461_v50 = vld [vmem:[#allocation46_spill] sm:$0xff]  ;;  %v8469_v4 = vld [vmem:[#allocation51_spill] sm:$0xff] }
 0x337   :  { %vm7568_vm14 = vcmp.le.f32.partialorder %v8452_v63, 0.7853982  ;;  %v2522_v38 = vsel %vm7548_vm2, 0, %v2520_v17  ;;  %v2327_v22 = vsel %vm2320_vm13, %v2323_v10, %v2326_v1  ;;  %v767_v9 = vsel %vm760_vm4, %v763_v8, %v766_v46  ;;  %v4340_v6 = vpop.eup %4339  ;;  %v8462_v63 = vld [vmem:[#allocation62_spill] sm:$0xff] }
 0x338   :  { %v961_v35 = vsel %vm7568_vm14, %v8451_v37, %v8456_v30  ;;  %v962_v26 = vsel %vm7568_vm14, 0, %v960_v23  ;;  %v2224_v31 = vsel %vm2213_vm12, nan, %v2223_v3  ;;  %v768_v21 = vsel %vm757_vm7, nan, %v767_v9 }
 0x339   :  { %4351 = vcosq.f32 %v961_v35  ;;  %v2526_v29 = vadd.s32 3, %v2522_v38  ;;  %v2013_v19 = vxor.u32 2147483648, %v4336_v14  ;;  %4089 = vmatprep.mubr.f32.mxu0 %v768_v21  ;;  %vm2421_vm13 = vweird.f32 %v8430_v47  ;;  %v4342_v3 = vpop.eup %4341 }
 0x33a   :  { %4353 = vsinq.f32 %v961_v35  ;;  %vm2424_vm1 = vcmp.lt.s32.totalorder %v2423_v43, 2  ;;  %vm2425_vm4 = vcmp.eq.s32.totalorder %v2423_v43, 0  ;;  %vm2428_vm5 = vcmp.eq.s32.totalorder %v2423_v43, 2 }
 0x33b   :  { %vm861_vm10 = vweird.f32 %v8436_v42  ;;  %v2010_v27 = vxor.u32 2147483648, %v4338_v58  ;;  %v2328_v18 = vsel %vm2317_vm3, nan, %v2327_v22  ;;  %vm864_vm12 = vcmp.lt.s32.totalorder %v7560_v16, 2  ;;  %v4344_v33 = vpop.eup %4343 }
 0x33c   :  { %v966_v41 = vadd.s32 3, %v962_v26  ;;  %v2014_v2 = vsel %vm2012_vm9, %v2013_v19, %v4338_v58  ;;  %v2429_v1 = vxor.u32 2147483648, %v4340_v6  ;;  %v8458_v56 = vand.u32 2147483647, %v8457_v36  ;;  %v4346_v23 = vpop.eup %4345  ;;  %v8479_v19 = vld [vmem:[#allocation59_spill] sm:$0xff] }
 0x33d   :  { %v2623_v10 = vsub.s32 4, %v8461_v50  ;;  %v2011_v34 = vsel %vm2009_vm11, %v4336_v14, %v2010_v27  ;;  %v2426_v46 = vxor.u32 2147483648, %v4342_v3  ;;  %v2527_v17 = vand.u32 3, %v2526_v29 }
 0x33e   :  { %vm7600_vm7 = vcmp.le.f32.partialorder %v8458_v56, 0.7853982  ;;  %v2015_v8 = vsel %vm2008_vm6, %v2011_v34, %v2014_v2  ;;  %v2430_v38 = vsel %vm2428_vm5, %v2429_v1, %v4342_v3  ;;  %vm865_vm3 = vcmp.eq.s32.totalorder %v7560_v16, 0 }
 0x33f   :  { %v2625_v52 = vsel %vm7600_vm7, %v8457_v36, %v8462_v63  ;;  %v869_v30 = vxor.u32 2147483648, %v4344_v33  ;;  %v2016_v35 = vsel %vm2005_vm15, nan, %v2015_v8  ;;  %v2427_v22 = vsel %vm2425_vm4, %v4340_v6, %v2426_v46 }
 0x340   :  { %v866_v9 = vxor.u32 2147483648, %v4346_v23  ;;  %vm868_vm9 = vcmp.eq.s32.totalorder %v7560_v16, 2  ;;  %4107 = vmatprep.mubr.f32.mxu1 %v2016_v35  ;;  %v2431_v26 = vsel %vm2424_vm1, %v2427_v22, %v2430_v38  ;;  %vm2525_vm2 = vweird.f32 %v8443_v45 }
 0x341   :  { %v870_v14 = vsel %vm868_vm9, %v869_v30, %v4346_v23  ;;  %vm8463_vm11 = vcmp.lt.s32.totalorder %v8457_v36, 0  ;;  %4355 = vcosq.f32 %v2625_v52  ;;  %4108 = vmatmul.mubr.f32.vlgmr.msra.gmra.mxu1 %v7479_v15  ;;  %vm2528_vm6 = vcmp.lt.s32.totalorder %v2527_v17, 2  ;;  %v8467_v15 = vld [vmem:[#allocation53_spill] sm:$0xff] }
 0x342   :  { %v2624_v62 = vsel %vm8463_vm11, %v2623_v10, %v8461_v50  ;;  %v867_v7 = vsel %vm865_vm3, %v4344_v33, %v866_v9  ;;  %v967_v21 = vand.u32 3, %v966_v41  ;;  %4357 = vsinq.f32 %v2625_v52  ;;  %4110 = vmatprep.mubr.f32.mxu1 %v2224_v31  ;;  %v4348_v27 = vpop.eup %4347 }
 0x343   :  { %vm1707_vm15 = vcmp.lt.s32.totalorder %v6818_v28, 0  ;;  %v871_v43 = vsel %vm864_vm12, %v867_v7, %v870_v14  ;;  %vm965_vm0 = vweird.f32 %v8451_v37  ;;  %v2626_v29 = vsel %vm7600_vm7, 0, %v2624_v62  ;;  %v4350_v3 = vpop.eup %4349 }
 0x344   :  { %v8464_v58 = vand.u32 2147483647, %v5603_v5  ;;  %v1063_v6 = vsub.s32 4, %v8467_v15  ;;  %v2432_v31 = vsel %vm2421_vm13, nan, %v2431_v26  ;;  %v872_v16 = vsel %vm861_vm10, nan, %v871_v43 }
 0x345   :  { %vm2529_vm8 = vcmp.eq.s32.totalorder %v2527_v17, 0  ;;  %4090 = vmatmul.mubr.f32.gmra.mxu0 %v872_v16  ;;  %vm2532_vm1 = vcmp.eq.s32.totalorder %v2527_v17, 2  ;;  %v2533_v2 = vxor.u32 2147483648, %v4348_v27  ;;  %vm8468_vm4 = vcmp.lt.s32.totalorder %v5603_v5, 0  ;;  %4111 = vmatmul.mubr.f32.gmra.mxu1 %v2328_v18 }
 0x346   :  { %vm7633_vm14 = vcmp.le.f32.partialorder %v8464_v58, 0.7853982  ;;  %v1064_v1 = vsel %vm8468_vm4, %v1063_v6, %v8467_v15  ;;  %v4352_v47 = vpop.eup %4351  ;;  %v2530_v56 = vxor.u32 2147483648, %v4350_v3  ;;  %v2630_v42 = vadd.s32 3, %v2626_v29  ;;  %4113 = vmatprep.mubr.f32.mxu1 %v2432_v31  ;;  %v8475_v29 = vld [vmem:[#allocation52_spill] sm:$0xff] }
 0x347   :  { %v1065_v41 = vsel %vm7633_vm14, %v5603_v5, %v6312_v54  ;;  %v2727_v50 = vsub.s32 4, %v8469_v4  ;;  %v4354_v10 = vpop.eup %4353  ;;  %v2534_v33 = vsel %vm2532_vm1, %v2533_v2, %v4350_v3  ;;  %vm969_vm13 = vcmp.eq.s32.totalorder %v967_v21, 0  ;;  %v8483_v2 = vld [vmem:[#allocation48_spill] sm:$0xff] }
 0x348   :  { %4359 = vcosq.f32 %v1065_v41  ;;  %vm972_vm5 = vcmp.eq.s32.totalorder %v967_v21, 2  ;;  %v973_v54 = vxor.u32 2147483648, %v4352_v47  ;;  %v2531_v34 = vsel %vm2529_vm8, %v4348_v27, %v2530_v56  ;;  %v8480_v27 = vld [vmem:[#allocation73_spill] sm:$0xff] }
 0x349   :  { %4361 = vsinq.f32 %v1065_v41  ;;  %v970_v46 = vxor.u32 2147483648, %v4354_v10  ;;  %v1066_v63 = vsel %vm7633_vm14, 0, %v1064_v1  ;;  %v8470_v52 = vand.u32 2147483647, %v5491_v49 }
 0x34a   :  { %v2535_v23 = vsel %vm2528_vm6, %v2531_v34, %v2534_v33  ;;  %v974_v8 = vsel %vm972_vm5, %v973_v54, %v4354_v10  ;;  %vm8473_vm12 = vcmp.lt.s32.totalorder %v5491_v49, 0  ;;  %vm968_vm7 = vcmp.lt.s32.totalorder %v967_v21, 2 }
 0x34b   :  { %vm7655_vm10 = vcmp.le.f32.partialorder %v8470_v52, 0.7853982  ;;  %v2728_v38 = vsel %vm8473_vm12, %v2727_v50, %v8469_v4  ;;  %v2536_v35 = vsel %vm2525_vm2, nan, %v2535_v23  ;;  %v971_v22 = vsel %vm969_vm13, %v4352_v47, %v970_v46 }
 0x34c   :  { %v2729_v30 = vsel %vm7655_vm10, %v5491_v49, %v6305_v20  ;;  %v2631_v9 = vand.u32 3, %v2630_v42  ;;  %4114 = vmatmul.mubr.f32.gmra.mxu1 %v2536_v35  ;;  %v975_v26 = vsel %vm968_vm7, %v971_v22, %v974_v8  ;;  %v1070_v17 = vadd.s32 3, %v1066_v63  ;;  %v8487_v42 = vld [vmem:[#allocation72_spill] sm:$0xff] }
 0x34d   :  { %v2730_v14 = vsel %vm7655_vm10, 0, %v2728_v38  ;;  %4363 = vcosq.f32 %v2729_v30  ;;  %v8474_v62 = vxor.u32 2147483648, %v7234_v57  ;;  %v3553_v20 = vand.u32 2147483647, %v7340_v11 }
 0x34e   :  { %v3555_v45 = vcvt.s32.f32 %v7273_v40  ;;  %v976_v21 = vsel %vm965_vm0, nan, %v975_v26  ;;  %v7686_v43 = vmul.f32 %v1891_v0, %v1889_v51  ;;  %4365 = vsinq.f32 %v2729_v30  ;;  %v4356_v6 = vpop.eup %4355  ;;  %v8489_v30 = vld [vmem:[#allocation66_spill] sm:$0xff]  ;;  %v8490_v26 = vld [vmem:[#allocation57_spill] sm:$0xff] }
 0x34f   :  { %v7676_v7 = vsel %vm1707_vm15, %v8474_v62, %v7234_v57  ;;  %4092 = vmatprep.mubr.f32.mxu0 %v976_v21  ;;  %v8476_v58 = vand.u32 2147483647, %v8475_v29  ;;  %v1167_v15 = vsub.s32 4, %v8479_v19  ;;  %vm2629_vm9 = vweird.f32 %v8457_v36  ;;  %v4358_v51 = vpop.eup %4357  ;;  %v8495_v21 = vld [vmem:[#allocation77_spill] sm:$0xff] }
 0x350   :  { %v2734_v37 = vadd.s32 3, %v2730_v14  ;;  %v2831_v0 = vsub.s32 4, %v8481_v59  ;;  %vm2632_vm2 = vcmp.lt.s32.totalorder %v2631_v9, 2  ;;  %vm2636_vm11 = vcmp.eq.s32.totalorder %v2631_v9, 2 }
 0x351   :  { %vm7690_vm3 = vcmp.le.f32.partialorder %v8476_v58, 0.7853982  ;;  %v2637_v31 = vxor.u32 2147483648, %v4356_v6  ;;  %v1071_v16 = vand.u32 3, %v1070_v17  ;;  %v2634_v41 = vxor.u32 2147483648, %v4358_v51 }
 0x352   :  { %v1169_v24 = vsel %vm7690_vm3, %v8475_v29, %v8480_v27  ;;  %vm8482_vm6 = vcmp.lt.s32.totalorder %v8475_v29, 0  ;;  %v8484_v1 = vand.u32 2147483647, %v8483_v2  ;;  %vm2633_vm14 = vcmp.eq.s32.totalorder %v2631_v9, 0  ;;  %v8496_v27 = vld [vmem:[#allocation54_spill] sm:$0xff] }
 0x353   :  { %v1168_v3 = vsel %vm8482_vm6, %v1167_v15, %v8479_v19  ;;  %4367 = vcosq.f32 %v1169_v24  ;;  %v2638_v56 = vsel %vm2636_vm11, %v2637_v31, %v4358_v51  ;;  %v2635_v10 = vsel %vm2633_vm14, %v4356_v6, %v2634_v41  ;;  %v8500_v51 = vld [vmem:[#allocation63_spill] sm:$0xff] }
 0x354   :  { %vm7706_vm0 = vcmp.le.f32.partialorder %v8484_v1, 0.7853982  ;;  %4369 = vsinq.f32 %v1169_v24  ;;  %v2735_v33 = vand.u32 3, %v2734_v37  ;;  %vm8488_vm8 = vcmp.lt.s32.totalorder %v8483_v2, 0 }
 0x355   :  { %v2833_v4 = vsel %vm7706_vm0, %v8483_v2, %v8487_v42  ;;  %v4360_v50 = vpop.eup %4359  ;;  %v2832_v54 = vsel %vm8488_vm8, %v2831_v0, %v8481_v59  ;;  %v2639_v46 = vsel %vm2632_vm2, %v2635_v10, %v2638_v56  ;;  %v1170_v52 = vsel %vm7690_vm3, 0, %v1168_v3 }
 0x356   :  { %4371 = vcosq.f32 %v2833_v4  ;;  %v4362_v34 = vpop.eup %4361  ;;  %v1077_v63 = vxor.u32 2147483648, %v4360_v50  ;;  %v2640_v18 = vsel %vm2629_vm9, nan, %v2639_v46  ;;  %vm1069_vm1 = vweird.f32 %v5603_v5 }
 0x357   :  { %4373 = vsinq.f32 %v2833_v4  ;;  %v1074_v23 = vxor.u32 2147483648, %v4362_v34  ;;  %vm1076_vm4 = vcmp.eq.s32.totalorder %v1071_v16, 2  ;;  %4116 = vmatprep.mubr.f32.mxu1 %v2640_v18  ;;  %vm1073_vm13 = vcmp.eq.s32.totalorder %v1071_v16, 0  ;;  %v8503_v4 = vld [vmem:[#allocation64_spill] sm:$0xff]  ;;  %v8508_v18 = vld [vmem:[#allocation81_spill] sm:$0xff] }
 0x358   :  { %v1078_v8 = vsel %vm1076_vm4, %v1077_v63, %v4362_v34  ;;  %v2834_v38 = vsel %vm7706_vm0, 0, %v2832_v54  ;;  %v1271_v35 = vsub.s32 4, %v8489_v30  ;;  %vm1072_vm5 = vcmp.lt.s32.totalorder %v1071_v16, 2  ;;  %v8501_v16 = vld [vmem:[#allocation74_spill] sm:$0xff] }
 0x359   :  { %v1075_v22 = vsel %vm1073_vm13, %v4360_v50, %v1074_v23  ;;  %vm2733_vm10 = vweird.f32 %v5491_v49  ;;  %v1174_v9 = vadd.s32 3, %v1170_v52  ;;  %v8491_v36 = vand.u32 2147483647, %v8490_v26  ;;  %v8507_v63 = vld [vmem:[#allocation70_spill] sm:$0xff] }
 0x35a   :  { %v1079_v14 = vsel %vm1072_vm5, %v1075_v22, %v1078_v8  ;;  %vm2736_vm7 = vcmp.lt.s32.totalorder %v2735_v33, 2  ;;  %vm8494_vm3 = vcmp.lt.s32.totalorder %v8490_v26, 0  ;;  %v4364_v57 = vpop.eup %4363  ;;  %v2838_v15 = vadd.s32 3, %v2834_v38 }
 0x35b   :  { %vm7729_vm12 = vcmp.le.f32.partialorder %v8491_v36, 0.7853982  ;;  %v1272_v62 = vsel %vm8494_vm3, %v1271_v35, %v8489_v30  ;;  %v1080_v19 = vsel %vm1069_vm1, nan, %v1079_v14  ;;  %vm2737_vm9 = vcmp.eq.s32.totalorder %v2735_v33, 0  ;;  %v4366_v0 = vpop.eup %4365 }
 0x35c   :  { %v1273_v58 = vsel %vm7729_vm12, %v8490_v26, %v8495_v21  ;;  %v1274_v6 = vsel %vm7729_vm12, 0, %v1272_v62  ;;  %4093 = vmatmul.mubr.f32.gmra.mxu0 %v1080_v19  ;;  %vm2740_vm2 = vcmp.eq.s32.totalorder %v2735_v33, 2  ;;  %v2741_v37 = vxor.u32 2147483648, %v4364_v57 }
 0x35d   :  { %4375 = vcosq.f32 %v1273_v58  ;;  %v8497_v24 = vand.u32 2147483647, %v8496_v27  ;;  %vm1173_vm6 = vweird.f32 %v8475_v29  ;;  %v1175_v5 = vand.u32 3, %v1174_v9 }
 0x35e   :  { %4377 = vsinq.f32 %v1273_v58  ;;  %v2935_v31 = vsub.s32 4, %v8500_v51  ;;  %v2738_v3 = vxor.u32 2147483648, %v4366_v0  ;;  %v2742_v1 = vsel %vm2740_vm2, %v2741_v37, %v4366_v0  ;;  %v8510_v0 = vld [vmem:[#allocation60_spill] sm:$0xff] }
 0x35f   :  { %vm7746_vm11 = vcmp.le.f32.partialorder %v8497_v24, 0.7853982  ;;  %v1278_v47 = vadd.s32 3, %v1274_v6  ;;  %vm2837_vm0 = vweird.f32 %v8483_v2  ;;  %v2839_v56 = vand.u32 3, %v2838_v15  ;;  %v8517_v2 = vld [vmem:[#allocation68_spill] sm:$0xff] }
 0x360   :  { %v2937_v41 = vsel %vm7746_vm11, %v8496_v27, %v8501_v16  ;;  %vm8502_vm14 = vcmp.lt.s32.totalorder %v8496_v27, 0  ;;  %v8504_v50 = vand.u32 2147483647, %v8503_v4  ;;  %v4368_v54 = vpop.eup %4367  ;;  %v2739_v34 = vsel %vm2737_vm9, %v4364_v57, %v2738_v3  ;;  %v8514_v16 = vld [vmem:[#allocation69_spill] sm:$0xff]  ;;  %v8515_v3 = vld [vmem:[#allocation79_spill] sm:$0xff] }
 0x361   :  { %4379 = vcosq.f32 %v2937_v41  ;;  %v2936_v42 = vsel %vm8502_vm14, %v2935_v31, %v8500_v51  ;;  %v1375_v52 = vsub.s32 4, %v8507_v63  ;;  %v4370_v8 = vpop.eup %4369  ;;  %v2743_v38 = vsel %vm2736_vm7, %v2739_v34, %v2742_v1  ;;  %v8521_v34 = vld [vmem:[#allocation75_spill] sm:$0xff] }
 0x362   :  { %4381 = vsinq.f32 %v2937_v41  ;;  %vm7762_vm8 = vcmp.le.f32.partialorder %v8504_v50, 0.7853982  ;;  %v2938_v46 = vsel %vm7746_vm11, 0, %v2936_v42  ;;  %vm1177_vm1 = vcmp.eq.s32.totalorder %v1175_v5, 0  ;;  %v8525_v51 = vld [vmem:[#allocation67_spill] sm:$0xff] }
 0x363   :  { %v1377_v23 = vsel %vm7762_vm8, %v8503_v4, %v8508_v18  ;;  %vm1180_vm4 = vcmp.eq.s32.totalorder %v1175_v5, 2  ;;  %v1181_v30 = vxor.u32 2147483648, %v4368_v54  ;;  %v4372_v35 = vpop.eup %4371  ;;  %v2744_v22 = vsel %vm2733_vm10, nan, %v2743_v38 }
 0x364   :  { %v1178_v9 = vxor.u32 2147483648, %v4370_v8  ;;  %v1279_v36 = vand.u32 3, %v1278_v47  ;;  %v2942_v17 = vadd.s32 3, %v2938_v46  ;;  %v4374_v14 = vpop.eup %4373  ;;  %4117 = vmatmul.mubr.f32.gmra.mxu1 %v2744_v22  ;;  %v2845_v21 = vxor.u32 2147483648, %v4372_v35 }
 0x365   :  { %v1182_v62 = vsel %vm1180_vm4, %v1181_v30, %v4370_v8  ;;  %vm8509_vm13 = vcmp.lt.s32.totalorder %v8503_v4, 0  ;;  %4383 = vcosq.f32 %v1377_v23  ;;  %vm1176_vm5 = vcmp.lt.s32.totalorder %v1175_v5, 2 }
 0x366   :  { %v1376_v58 = vsel %vm8509_vm13, %v1375_v52, %v8507_v63  ;;  %v1179_v33 = vsel %vm1177_vm1, %v4368_v54, %v1178_v9  ;;  %v2842_v57 = vxor.u32 2147483648, %v4374_v14  ;;  %vm2844_vm12 = vcmp.eq.s32.totalorder %v2839_v56, 2 }
 0x367   :  { %v1183_v19 = vsel %vm1176_vm5, %v1179_v33, %v1182_v62  ;;  %vm2841_vm7 = vcmp.eq.s32.totalorder %v2839_v56, 0  ;;  %v2846_v49 = vsel %vm2844_vm12, %v2845_v21, %v4374_v14  ;;  %4385 = vsinq.f32 %v1377_v23  ;;  %v8522_v23 = vld [vmem:[#allocation87_spill] sm:$0xff] }
 0x368   :  { %v1184_v15 = vsel %vm1173_vm6, nan, %v1183_v19  ;;  %vm2840_vm10 = vcmp.lt.s32.totalorder %v2839_v56, 2  ;;  %v2843_v6 = vsel %vm2841_vm7, %v4372_v35, %v2842_v57  ;;  %vm1277_vm3 = vweird.f32 %v8490_v26 }
 0x369   :  { %v1378_v37 = vsel %vm7762_vm8, 0, %v1376_v58  ;;  %4095 = vmatprep.mubr.f32.mxu0 %v1184_v15  ;;  %v2847_v24 = vsel %vm2840_vm10, %v2843_v6, %v2846_v49  ;;  %vm1280_vm9 = vcmp.lt.s32.totalorder %v1279_v36, 2  ;;  %v2943_v59 = vand.u32 3, %v2942_v17  ;;  %v8524_v6 = vld [vmem:[#allocation71_spill] sm:$0xff] }
 0x36a   :  { %v8511_v5 = vand.u32 2147483647, %v8510_v0  ;;  %v4376_v31 = vpop.eup %4375  ;;  %v2848_v29 = vsel %vm2837_vm0, nan, %v2847_v24  ;;  %vm1281_vm11 = vcmp.eq.s32.totalorder %v1279_v36, 0  ;;  %v3039_v41 = vsub.s32 4, %v8514_v16 }
 0x36b   :  { %4119 = vmatprep.mubr.f32.mxu1 %v2848_v29  ;;  %vm1284_vm6 = vcmp.eq.s32.totalorder %v1279_v36, 2  ;;  %v1285_v47 = vxor.u32 2147483648, %v4376_v31  ;;  %v1382_v56 = vadd.s32 3, %v1378_v37  ;;  %v4378_v42 = vpop.eup %4377  ;;  %vm8516_vm14 = vcmp.lt.s32.totalorder %v8510_v0, 0 }
 0x36c   :  { %vm7787_vm2 = vcmp.le.f32.partialorder %v8511_v5, 0.7853982  ;;  %v3040_v50 = vsel %vm8516_vm14, %v3039_v41, %v8514_v16  ;;  %v8518_v10 = vand.u32 2147483647, %v8517_v2  ;;  %v1479_v46 = vsub.s32 4, %v8521_v34 }
 0x36d   :  { %v3041_v1 = vsel %vm7787_vm2, %v8510_v0, %v8515_v3  ;;  %v1282_v52 = vxor.u32 2147483648, %v4378_v42  ;;  %v1286_v18 = vsel %vm1284_vm6, %v1285_v47, %v4378_v42  ;;  %vm2944_vm8 = vcmp.lt.s32.totalorder %v2943_v59, 2  ;;  %v8546_v47 = vld [vmem:[#allocation86_spill] sm:$0xff] }
 0x36e   :  { %4387 = vcosq.f32 %v3041_v1  ;;  %vm7803_vm0 = vcmp.le.f32.partialorder %v8518_v10, 0.7853982  ;;  %v4380_v63 = vpop.eup %4379  ;;  %vm2945_vm1 = vcmp.eq.s32.totalorder %v2943_v59, 0  ;;  %v3042_v35 = vsel %vm7787_vm2, 0, %v3040_v50  ;;  %v8534_v10 = vld [vmem:[#allocation78_spill] sm:$0xff] }
 0x36f   :  { %4389 = vsinq.f32 %v3041_v1  ;;  %v1481_v8 = vsel %vm7803_vm0, %v8517_v2, %v8522_v23  ;;  %v4382_v38 = vpop.eup %4381  ;;  %v2949_v30 = vxor.u32 2147483648, %v4380_v63  ;;  %vm8523_vm4 = vcmp.lt.s32.totalorder %v8517_v2, 0 }
 0x370   :  { %v1480_v22 = vsel %vm8523_vm4, %v1479_v46, %v8521_v34  ;;  %v1283_v9 = vsel %vm1281_vm11, %v4376_v31, %v1282_v52  ;;  %v2946_v17 = vxor.u32 2147483648, %v4382_v38  ;;  %vm2948_vm13 = vcmp.eq.s32.totalorder %v2943_v59, 2 }
 0x371   :  { %v3046_v14 = vadd.s32 3, %v3042_v35  ;;  %v1287_v62 = vsel %vm1280_vm9, %v1283_v9, %v1286_v18  ;;  %v2950_v21 = vsel %vm2948_vm13, %v2949_v30, %v4382_v38  ;;  %v1383_v58 = vand.u32 3, %v1382_v56  ;;  %v8539_v9 = vld [vmem:[#allocation76_spill] sm:$0xff] }
 0x372   :  { %4391 = vcosq.f32 %v1481_v8  ;;  %v1288_v33 = vsel %vm1277_vm3, nan, %v1287_v62  ;;  %v2947_v57 = vsel %vm2945_vm1, %v4380_v63, %v2946_v17  ;;  %v1482_v19 = vsel %vm7803_vm0, 0, %v1480_v22  ;;  %v4384_v49 = vpop.eup %4383 }
 0x373   :  { %4393 = vsinq.f32 %v1481_v8  ;;  %v7827_v15 = vmul.f32 %v3555_v45, %v3553_v20  ;;  %4096 = vmatmul.mubr.f32.gmra.mxu0 %v1288_v33  ;;  %vm2941_vm5 = vweird.f32 %v8496_v27  ;;  %v2951_v36 = vsel %vm2944_vm8, %v2947_v57, %v2950_v21  ;;  %v8529_v45 = vld [vmem:[#allocation82_spill] sm:$0xff] }
 0x374   :  { %v3143_v26 = vsub.s32 4, %v8524_v6  ;;  %v2952_v37 = vsel %vm2941_vm5, nan, %v2951_v36  ;;  %v1389_v24 = vxor.u32 2147483648, %v4384_v49  ;;  %v3047_v5 = vand.u32 3, %v3046_v14  ;;  %v4386_v11 = vpop.eup %4385 }
 0x375   :  { %v8526_v31 = vand.u32 2147483647, %v8525_v51  ;;  %v1893_v40 = vxor.u32 2147483648, %v7686_v43  ;;  %4120 = vmatmul.mubr.f32.gmra.mxu1 %v2952_v37  ;;  %vm1388_vm7 = vcmp.eq.s32.totalorder %v1383_v58, 2  ;;  %v1486_v20 = vadd.s32 3, %v1482_v19 }
 0x376   :  { %v1386_v59 = vxor.u32 2147483648, %v4386_v11  ;;  %v1390_v16 = vsel %vm1388_vm7, %v1389_v24, %v4386_v11  ;;  %vm8530_vm10 = vcmp.lt.s32.totalorder %v8525_v51, 0  ;;  %vm1381_vm3 = vweird.f32 %v8503_v4  ;;  %v8544_v24 = vld [vmem:[#allocation83_spill] sm:$0xff] }
 0x377   :  { %vm7834_vm12 = vcmp.le.f32.partialorder %v8526_v31, 0.7853982  ;;  %v3144_v41 = vsel %vm8530_vm10, %v3143_v26, %v8524_v6  ;;  %vm1385_vm9 = vcmp.eq.s32.totalorder %v1383_v58, 0  ;;  %vm3045_vm2 = vweird.f32 %v8510_v0 }
 0x378   :  { %v3145_v27 = vsel %vm7834_vm12, %v8525_v51, %v8529_v45  ;;  %vm1384_vm11 = vcmp.lt.s32.totalorder %v1383_v58, 2  ;;  %v1387_v3 = vsel %vm1385_vm9, %v4384_v49, %v1386_v59  ;;  %vm3048_vm6 = vcmp.lt.s32.totalorder %v3047_v5, 2 }
 0x379   :  { %4395 = vcosq.f32 %v3145_v27  ;;  %v8531_v1 = vand.u32 2147483647, %v6349_v39  ;;  %v1391_v42 = vsel %vm1384_vm11, %v1387_v3, %v1390_v16  ;;  %v3146_v50 = vsel %vm7834_vm12, 0, %v3144_v41 }
 0x37a   :  { %4397 = vsinq.f32 %v3145_v27  ;;  %v1583_v4 = vsub.s32 4, %v8534_v10  ;;  %v1392_v46 = vsel %vm1381_vm3, nan, %v1391_v42  ;;  %v1487_v52 = vand.u32 3, %v1486_v20 }
 0x37b   :  { %vm7850_vm14 = vcmp.le.f32.partialorder %v8531_v1, 0.7853982  ;;  %v4388_v56 = vpop.eup %4387  ;;  %4098 = vmatprep.mubr.f32.mxu0 %v1392_v46  ;;  %vm3052_vm0 = vcmp.eq.s32.totalorder %v3047_v5, 2  ;;  %vm1485_vm8 = vweird.f32 %v8517_v2  ;;  %vm8535_vm1 = vcmp.lt.s32.totalorder %v6349_v39, 0 }
 0x37c   :  { %v1585_v54 = vsel %vm7850_vm14, %v6349_v39, %v7168_v60  ;;  %v4390_v34 = vpop.eup %4389  ;;  %v3053_v63 = vxor.u32 2147483648, %v4388_v56  ;;  %v1584_v23 = vsel %vm8535_vm1, %v1583_v4, %v8534_v10  ;;  %vm3049_vm4 = vcmp.eq.s32.totalorder %v3047_v5, 0 }
 0x37d   :  { %4399 = vcosq.f32 %v1585_v54  ;;  %v3050_v18 = vxor.u32 2147483648, %v4390_v34  ;;  %v3150_v38 = vadd.s32 3, %v3146_v50  ;;  %v8536_v60 = vand.u32 2147483647, %v6346_v48 }
 0x37e   :  { %4401 = vsinq.f32 %v1585_v54  ;;  %v3054_v8 = vsel %vm3052_vm0, %v3053_v63, %v4390_v34  ;;  %v1586_v22 = vsel %vm7850_vm14, 0, %v1584_v23  ;;  %v3247_v17 = vsub.s32 4, %v8539_v9  ;;  %v8550_v54 = vld [vmem:[#allocation80_spill] sm:$0xff] }
 0x37f   :  { %vm7867_vm13 = vcmp.le.f32.partialorder %v8536_v60, 0.7853982  ;;  %v3051_v35 = vsel %vm3049_vm4, %v4388_v56, %v3050_v18  ;;  %v4392_v62 = vpop.eup %4391  ;;  %vm1489_vm5 = vcmp.eq.s32.totalorder %v1487_v52, 0  ;;  %v1590_v58 = vadd.s32 3, %v1586_v22 }
 0x380   :  { %v3249_v14 = vsel %vm7867_vm13, %v6346_v48, %v7153_v61  ;;  %v3055_v21 = vsel %vm3048_vm6, %v3051_v35, %v3054_v8  ;;  %v4394_v33 = vpop.eup %4393  ;;  %v1493_v19 = vxor.u32 2147483648, %v4392_v62  ;;  %vm8540_vm12 = vcmp.lt.s32.totalorder %v6346_v48, 0 }
 0x381   :  { %4403 = vcosq.f32 %v3249_v14  ;;  %v3056_v57 = vsel %vm3045_vm2, nan, %v3055_v21  ;;  %v3248_v49 = vsel %vm8540_vm12, %v3247_v17, %v8539_v9  ;;  %v1490_v36 = vxor.u32 2147483648, %v4394_v33  ;;  %v8555_v17 = vld [vmem:[#allocation88_spill] sm:$0xff] }
 0x382   :  { %4405 = vsinq.f32 %v3249_v14  ;;  %4122 = vmatprep.mubr.f32.mxu1 %v3056_v57  ;;  %vm1492_vm7 = vcmp.eq.s32.totalorder %v1487_v52, 2  ;;  %v3250_v61 = vsel %vm7867_vm13, 0, %v3248_v49  ;;  %v8541_v6 = vand.u32 2147483647, %v6646_v32 }
 0x383   :  { %v1494_v0 = vsel %vm1492_vm7, %v1493_v19, %v4394_v33  ;;  %v3151_v37 = vand.u32 3, %v3150_v38  ;;  %v1687_v5 = vsub.s32 4, %v8544_v24  ;;  %vm1488_vm3 = vcmp.lt.s32.totalorder %v1487_v52, 2 }
 0x384   :  { %vm7888_vm10 = vcmp.le.f32.partialorder %v8541_v6, 0.7853982  ;;  %v1491_v29 = vsel %vm1489_vm5, %v4392_v62, %v1490_v36  ;;  %vm3149_vm9 = vweird.f32 %v8525_v51  ;;  %v3254_v11 = vadd.s32 3, %v3250_v61 }
 0x385   :  { %v1689_v31 = vsel %vm7888_vm10, %v6646_v32, %v7187_v25  ;;  %v1495_v45 = vsel %vm1488_vm3, %v1491_v29, %v1494_v0  ;;  %v1591_v27 = vand.u32 3, %v1590_v58  ;;  %vm8545_vm2 = vcmp.lt.s32.totalorder %v6646_v32, 0 }
 0x386   :  { %v4396_v20 = vpop.eup %4395  ;;  %v1688_v59 = vsel %vm8545_vm2, %v1687_v5, %v8544_v24  ;;  %4407 = vcosq.f32 %v1689_v31  ;;  %v1496_v41 = vsel %vm1485_vm8, nan, %v1495_v45  ;;  %vm1589_vm11 = vweird.f32 %v6349_v39 }
 0x387   :  { %v4398_v16 = vpop.eup %4397  ;;  %v3157_v3 = vxor.u32 2147483648, %v4396_v20  ;;  %4409 = vsinq.f32 %v1689_v31  ;;  %4099 = vmatmul.mubr.f32.gmra.mxu0 %v1496_v41  ;;  %vm3152_vm6 = vcmp.lt.s32.totalorder %v3151_v37, 2  ;;  %vm3156_vm14 = vcmp.eq.s32.totalorder %v3151_v37, 2 }
 0x388   :  { %v3154_v25 = vxor.u32 2147483648, %v4398_v16  ;;  %v1690_v1 = vsel %vm7888_vm10, 0, %v1688_v59  ;;  %vm1811_vm0 = vcmp.lt.s32.totalorder %v8546_v47, 0  ;;  %vm3153_vm1 = vcmp.eq.s32.totalorder %v3151_v37, 0 }
 0x389   :  { %v3158_v56 = vsel %vm3156_vm14, %v3157_v3, %v4398_v16  ;;  %v3255_v42 = vand.u32 3, %v3254_v11  ;;  %v8547_v50 = vand.u32 2147483647, %v6523_v55  ;;  %vm1596_vm8 = vcmp.eq.s32.totalorder %v1591_v27, 2 }
 0x38a   :  { %v4400_v10 = vpop.eup %4399  ;;  %v3155_v4 = vsel %vm3153_vm1, %v4396_v20, %v3154_v25  ;;  %v3351_v34 = vsub.s32 4, %v8550_v54  ;;  %v1694_v23 = vadd.s32 3, %v1690_v1  ;;  %vm8551_vm13 = vcmp.lt.s32.totalorder %v6523_v55, 0 }
 0x38b   :  { %vm7910_vm4 = vcmp.le.f32.partialorder %v8547_v50, 0.7853982  ;;  %v4402_v63 = vpop.eup %4401  ;;  %v3159_v52 = vsel %vm3152_vm6, %v3155_v4, %v3158_v56  ;;  %v1597_v18 = vxor.u32 2147483648, %v4400_v10  ;;  %vm1592_vm5 = vcmp.lt.s32.totalorder %v1591_v27, 2 }
 0x38c   :  { %v3353_v46 = vsel %vm7910_vm4, %v6523_v55, %v7178_v44  ;;  %v3160_v8 = vsel %vm3149_vm9, nan, %v3159_v52  ;;  %v1594_v38 = vxor.u32 2147483648, %v4402_v63  ;;  %v3352_v60 = vsel %vm8551_vm13, %v3351_v34, %v8550_v54 }
 0x38d   :  { %4411 = vcosq.f32 %v3353_v46  ;;  %4123 = vmatmul.mubr.f32.gmra.mxu1 %v3160_v8  ;;  %vm1593_vm12 = vcmp.eq.s32.totalorder %v1591_v27, 0  ;;  %v1598_v30 = vsel %vm1596_vm8, %v1597_v18, %v4402_v63  ;;  %vm3260_vm7 = vcmp.eq.s32.totalorder %v3255_v42, 2 }
 0x38e   :  { %4413 = vsinq.f32 %v3353_v46  ;;  %v4404_v44 = vpop.eup %4403  ;;  %v1595_v35 = vsel %vm1593_vm12, %v4400_v10, %v1594_v38  ;;  %v3354_v22 = vsel %vm7910_vm4, 0, %v3352_v60  ;;  %v8552_v9 = vand.u32 2147483647, %v6818_v28  ;;  %v8564_v10 = vld [vmem:[#allocation84_spill] sm:$0xff] }
 0x38f   :  { %v1791_v14 = vsub.s32 4, %v8555_v17  ;;  %v4406_v62 = vpop.eup %4405  ;;  %v1599_v21 = vsel %vm1592_vm5, %v1595_v35, %v1598_v30  ;;  %v3261_v58 = vxor.u32 2147483648, %v4404_v44  ;;  %v1695_v33 = vand.u32 3, %v1694_v23 }
 0x390   :  { %vm7928_vm10 = vcmp.le.f32.partialorder %v8552_v9, 0.7853982  ;;  %v1600_v19 = vsel %vm1589_vm11, nan, %v1599_v21  ;;  %v3258_v49 = vxor.u32 2147483648, %v4406_v62  ;;  %vm3257_vm3 = vcmp.eq.s32.totalorder %v3255_v42, 0 }
 0x391   :  { %v1793_v57 = vsel %vm7928_vm10, %v6818_v28, %v7676_v7  ;;  %v1792_v36 = vsel %vm1707_vm15, %v1791_v14, %v8555_v17  ;;  %4101 = vmatprep.mubr.f32.mxu0 %v1600_v19  ;;  %v3262_v61 = vsel %vm3260_vm7, %v3261_v58, %v4406_v62  ;;  %v3358_v6 = vadd.s32 3, %v3354_v22 }
 0x392   :  { %4415 = vcosq.f32 %v1793_v57  ;;  %v3557_v26 = vxor.u32 2147483648, %v7827_v15  ;;  %v1894_v39 = vsel %vm1811_vm0, %v1893_v40, %v7686_v43  ;;  %vm3256_vm9 = vcmp.lt.s32.totalorder %v3255_v42, 2  ;;  %v8559_v43 = vld [vmem:[#allocation85_spill] sm:$0xff] }
 0x393   :  { %4417 = vsinq.f32 %v1793_v57  ;;  %v3259_v7 = vsel %vm3257_vm3, %v4404_v44, %v3258_v49  ;;  %v4408_v0 = vpop.eup %4407  ;;  %vm3253_vm15 = vweird.f32 %v6346_v48  ;;  %vm1696_vm2 = vcmp.lt.s32.totalorder %v1695_v33, 2 }
 0x394   :  { %v3263_v37 = vsel %vm3256_vm9, %v3259_v7, %v3262_v61  ;;  %v1794_v24 = vsel %vm7928_vm10, 0, %v1792_v36  ;;  %v4410_v5 = vpop.eup %4409  ;;  %v1701_v29 = vxor.u32 2147483648, %v4408_v0  ;;  %v8556_v11 = vand.u32 2147483647, %v6695_v12 }
 0x395   :  { %v3264_v31 = vsel %vm3253_vm15, nan, %v3263_v37  ;;  %v3455_v40 = vsub.s32 4, %v8559_v43  ;;  %v1698_v45 = vxor.u32 2147483648, %v4410_v5  ;;  %vm1700_vm6 = vcmp.eq.s32.totalorder %v1695_v33, 2 }
 0x396   :  { %vm7954_vm11 = vcmp.le.f32.partialorder %v8556_v11, 0.7853982  ;;  %4125 = vmatprep.mubr.f32.mxu1 %v3264_v31  ;;  %v3359_v48 = vand.u32 3, %v3358_v6  ;;  %vm1697_vm14 = vcmp.eq.s32.totalorder %v1695_v33, 0  ;;  %v1702_v59 = vsel %vm1700_vm6, %v1701_v29, %v4410_v5 }
 0x397   :  { %v3457_v27 = vsel %vm7954_vm11, %v6695_v12, %v7221_v13  ;;  %v1798_v16 = vadd.s32 3, %v1794_v24  ;;  %v8560_v41 = vand.u32 2147483647, %v8546_v47  ;;  %v1699_v25 = vsel %vm1697_vm14, %v4408_v0, %v1698_v45 }
 0x398   :  { %vm8563_vm4 = vcmp.lt.s32.totalorder %v6695_v12, 0  ;;  %4419 = vcosq.f32 %v3457_v27  ;;  %v1895_v56 = vsub.s32 4, %v7156_v53  ;;  %vm1693_vm8 = vweird.f32 %v6646_v32 }
 0x399   :  { %vm7965_vm1 = vcmp.le.f32.partialorder %v8560_v41, 0.7853982  ;;  %v3456_v1 = vsel %vm8563_vm4, %v3455_v40, %v8559_v43  ;;  %v1703_v13 = vsel %vm1696_vm2, %v1699_v25, %v1702_v59  ;;  %4421 = vsinq.f32 %v3457_v27 }
 0x39a   :  { %v4412_v42 = vpop.eup %4411  ;;  %v1897_v50 = vsel %vm7965_vm1, %v8546_v47, %v1894_v39  ;;  %vm3475_vm13 = vcmp.lt.s32.totalorder %v8564_v10, 0  ;;  %v1704_v4 = vsel %vm1693_vm8, nan, %v1703_v13  ;;  %vm3364_vm5 = vcmp.eq.s32.totalorder %v3359_v48, 2 }
 0x39b   :  { %v4414_v2 = vpop.eup %4413  ;;  %v3365_v54 = vxor.u32 2147483648, %v4412_v42  ;;  %4102 = vmatmul.mubr.f32.gmra.mxu0 %v1704_v4  ;;  %v3458_v46 = vsel %vm7954_vm11, 0, %v3456_v1  ;;  %v1896_v32 = vsel %vm1811_vm0, %v1895_v56, %v7156_v53  ;;  %4423 = vcosq.f32 %v1897_v50 }
 0x39c   :  { %v3362_v34 = vxor.u32 2147483648, %v4414_v2  ;;  %vm3361_vm12 = vcmp.eq.s32.totalorder %v3359_v48, 0  ;;  %v1799_v52 = vand.u32 3, %v1798_v16  ;;  %4425 = vsinq.f32 %v1897_v50 }
 0x39d   :  { %v3366_v63 = vsel %vm3364_vm5, %v3365_v54, %v4414_v2  ;;  %v3558_v18 = vsel %vm3475_vm13, %v3557_v26, %v7827_v15  ;;  %vm3360_vm7 = vcmp.lt.s32.totalorder %v3359_v48, 2  ;;  %vm3357_vm10 = vweird.f32 %v6523_v55  ;;  %v8568_v15 = vld [vmem:[#allocation7_spill] sm:$0xff] }
 0x39e   :  { %v3363_v23 = vsel %vm3361_vm12, %v4412_v42, %v3362_v34  ;;  %v3462_v60 = vadd.s32 3, %v3458_v46  ;;  %v1898_v30 = vsel %vm7965_vm1, 0, %v1896_v32  ;;  %v8565_v22 = vand.u32 2147483647, %v8564_v10 }
 0x39f   :  { %v4416_v8 = vpop.eup %4415  ;;  %v3367_v38 = vsel %vm3360_vm7, %v3363_v23, %v3366_v63  ;;  %v3559_v51 = vsub.s32 4, %v8568_v15  ;;  %vm1804_vm3 = vcmp.eq.s32.totalorder %v1799_v52, 2  ;;  %vm1797_vm9 = vweird.f32 %v6818_v28 }
 0x3a0   :  { %v4418_v53 = vpop.eup %4417  ;;  %v3368_v44 = vsel %vm3357_vm10, nan, %v3367_v38  ;;  %v1805_v35 = vxor.u32 2147483648, %v4416_v8  ;;  %vm7992_vm0 = vcmp.le.f32.partialorder %v8565_v22, 0.7853982  ;;  %vm1801_vm15 = vcmp.eq.s32.totalorder %v1799_v52, 0 }
 0x3a1   :  { %4126 = vmatmul.mubr.f32.gmra.mxu1 %v3368_v44  ;;  %v1802_v17 = vxor.u32 2147483648, %v4418_v53  ;;  %v3561_v55 = vsel %vm7992_vm0, %v8564_v10, %v3558_v18  ;;  %vm1800_vm2 = vcmp.lt.s32.totalorder %v1799_v52, 2  ;;  %v1902_v21 = vadd.s32 3, %v1898_v30 }
 0x3a2   :  { %v1806_v14 = vsel %vm1804_vm3, %v1805_v35, %v4418_v53  ;;  %4427 = vcosq.f32 %v3561_v55  ;;  %v3463_v33 = vand.u32 3, %v3462_v60  ;;  %v3560_v57 = vsel %vm3475_vm13, %v3559_v51, %v8568_v15 }
 0x3a3   :  { %v1803_v62 = vsel %vm1801_vm15, %v4416_v8, %v1802_v17  ;;  %4429 = vsinq.f32 %v3561_v55  ;;  %v1903_v6 = vand.u32 3, %v1902_v21  ;;  %v3562_v28 = vsel %vm7992_vm0, 0, %v3560_v57 }
 0x3a4   :  { %v1807_v58 = vsel %vm1800_vm2, %v1803_v62, %v1806_v14  ;;  %vm3468_vm11 = vcmp.eq.s32.totalorder %v3463_v33, 2  ;;  %vm3465_vm6 = vcmp.eq.s32.totalorder %v3463_v33, 0  ;;  %vm3464_vm14 = vcmp.lt.s32.totalorder %v3463_v33, 2 }
 0x3a5   :  { %v1808_v19 = vsel %vm1797_vm9, nan, %v1807_v58  ;;  %v4420_v49 = vpop.eup %4419  ;;  %v3566_v5 = vadd.s32 3, %v3562_v28  ;;  %vm3461_vm1 = vweird.f32 %v6695_v12  ;;  %vm1908_vm4 = vcmp.eq.s32.totalorder %v1903_v6, 2 }
 0x3a6   :  { %4104 = vmatprep.mubr.f32.mxu0 %v1808_v19  ;;  %v4422_v36 = vpop.eup %4421  ;;  %v3469_v61 = vxor.u32 2147483648, %v4420_v49  ;;  %vm1905_vm8 = vcmp.eq.s32.totalorder %v1903_v6, 0  ;;  %vm1904_vm13 = vcmp.lt.s32.totalorder %v1903_v6, 2  ;;  %vm1901_vm5 = vweird.f32 %v8546_v47  ;;  %v8012_v47 = vld [vmem:[%s8052_s3] ss:$0 sm:$0xff]  ;;  %s4464_s3 = smov [#allocation2]  }
 0x3a7   :  { %v3466_v26 = vxor.u32 2147483648, %v4422_v36  ;;  %v3567_v45 = vand.u32 3, %v3566_v5  ;;  %vm3565_vm0 = vweird.f32 %v8564_v10  ;;  %s3862_s15 = sshll.u32 %s4464_s3, 4  ;;  %s3863_s15 = int_to_ptr.vmem [resolvable:$true] %s3862_s15 }
 0x3a8   :  { %v4424_v39 = vpop.eup %4423  ;;  %v3470_v7 = vsel %vm3468_vm11, %v3469_v61, %v4422_v36  ;;  %s4435_s16 = scalar_lea.vmem %s3863_s15, 4096  ;;  %p4440_p1 = scmp.lt.s32.totalorder %s3863_s15, %s3863_s15 }
 0x3a9   :  { %v4426_v0 = vpop.eup %4425  ;;  %v3467_v37 = vsel %vm3465_vm6, %v4420_v49, %v3466_v26  ;;  %v1909_v24 = vxor.u32 2147483648, %v4424_v39  ;;  %vm3572_vm12 = vcmp.eq.s32.totalorder %v3567_v45, 2  ;;  %vm3569_vm7 = vcmp.eq.s32.totalorder %v3567_v45, 0  ;;  %p4436_p0 = scmp.ne.s32.totalorder %s3863_s15, %s4435_s16  ;;  %p4441_p2 = scmp.lt.s32.totalorder %s4435_s16, %s4435_s16 }
 0x3aa   :  { %v3471_v31 = vsel %vm3464_vm14, %v3467_v37, %v3470_v7  ;;  %v1906_v29 = vxor.u32 2147483648, %v4426_v0  ;;  %vm3568_vm10 = vcmp.lt.s32.totalorder %v3567_v45, 2 }
 0x3ab   :  { %v3472_v11 = vsel %vm3461_vm1, nan, %v3471_v31  ;;  %v1910_v20 = vsel %vm1908_vm4, %v1909_v24, %v4426_v0  ;;  %p4442_p3 = por %p4441_p2, %p4440_p1 }
 0x3ac   :  { %4128 = vmatprep.mubr.f32.mxu1 %v3472_v11  ;;  %v1907_v43 = vsel %vm1905_vm8, %v4424_v39, %v1906_v29 }
 0x3ad   :  { %v1911_v40 = vsel %vm1904_vm13, %v1907_v43, %v1910_v20  ;;  %p4443_p4 = pnand %p4442_p3, %p4436_p0 }
 0x3ae   :  { %v1912_v48 = vsel %vm1901_vm5, nan, %v1911_v40 }
 0x3af   :  { %v4428_v27 = vpop.eup %4427  ;;  %4105 = vmatmul.mubr.f32.gmra.mxu0 %v1912_v48 }
 0x3b0   :  { %v4430_v59 = vpop.eup %4429  ;;  %v3573_v16 = vxor.u32 2147483648, %v4428_v27 }
 0x3b1   :  { %v3570_v41 = vxor.u32 2147483648, %v4430_v59 }
 0x3b2   :  { %v3574_v12 = vsel %vm3572_vm12, %v3573_v16, %v4430_v59 }
 0x3b3   :  { %v3571_v3 = vsel %vm3569_vm7, %v4428_v27, %v3570_v41 }
 0x3b4   :  { %v3575_v25 = vsel %vm3568_vm10, %v3571_v3, %v3574_v12 }
 0x3b5   :  { %v3576_v1 = vsel %vm3565_vm0, nan, %v3575_v25 }
 0x3b6   :  { %4129 = vmatmul.mubr.f32.gmra.mxu1 %v3576_v1 }
 0x3e4   :  { %v4085_v56 = vpop.f32.mrf.mxu0 }
 0x3e5   :  { %v3672_v42 = vadd.f32 %v4085_v56, %v8012_v47 }
 0x3e6   :  { %v3666_v13 = vpop.f32.mrf.mxu0 }
 0x3e7   :  { %3826 = vst [vmem:[#allocation2 + $0x8] sm:$0xff] %v3672_v42  ;;  %v3667_v50 = vadd.f32 %v8012_v47, %v3666_v13 }
 0x3e9   :  { %v4088_v2 = vpop.f32.mrf.mxu0  ;;  %3825 = vst [vmem:[#allocation2] sm:$0xff] %v3667_v50 }
 0x3ea   :  { %v3682_v4 = vadd.f32 %v4088_v2, %v8012_v47 }
 0x3eb   :  { %v3676_v10 = vpop.f32.mrf.mxu0 }
 0x3ec   :  { %3828 = vst [vmem:[#allocation2 + $0x18] sm:$0xff] %v3682_v4  ;;  %v3677_v54 = vadd.f32 %v8012_v47, %v3676_v10 }
 0x3ee   :  { %3827 = vst [vmem:[#allocation2 + $0x10] sm:$0xff] %v3677_v54 }
 0x401   :  { %v4109_v34 = vpop.f32.mrf.mxu1 }
 0x402   :  { %v3752_v46 = vadd.f32 %v4109_v34, %v8012_v47 }
 0x403   :  { %v3746_v32 = vpop.f32.mrf.mxu1 }
 0x404   :  { %3842 = vst [vmem:[#allocation2 + $0x88] sm:$0xff] %v3752_v46  ;;  %v3747_v63 = vadd.f32 %v8012_v47, %v3746_v32 }
 0x405   :  { %v4091_v52 = vpop.f32.mrf.mxu0  ;;  %v4112_v18 = vpop.f32.mrf.mxu1 }
 0x406   :  { %v3692_v23 = vadd.f32 %v4091_v52, %v8012_v47  ;;  %3841 = vst [vmem:[#allocation2 + $0x80] sm:$0xff] %v3747_v63  ;;  %v3762_v8 = vadd.f32 %v4112_v18, %v8012_v47 }
 0x407   :  { %v3686_v38 = vpop.f32.mrf.mxu0  ;;  %v3756_v60 = vpop.f32.mrf.mxu1 }
 0x408   :  { %3830 = vst [vmem:[#allocation2 + $0x28] sm:$0xff] %v3692_v23  ;;  %v3687_v30 = vadd.f32 %v8012_v47, %v3686_v38  ;;  %3844 = vst [vmem:[#allocation2 + $0x98] sm:$0xff] %v3762_v8  ;;  %v3757_v53 = vadd.f32 %v8012_v47, %v3756_v60 }
 0x40a   :  { %3829 = vst [vmem:[#allocation2 + $0x20] sm:$0xff] %v3687_v30  ;;  %3843 = vst [vmem:[#allocation2 + $0x90] sm:$0xff] %v3757_v53 }
 0x40c   :  { %v4115_v44 = vpop.f32.mrf.mxu1 }
 0x40d   :  { %v3772_v35 = vadd.f32 %v4115_v44, %v8012_v47 }
 0x40e   :  { %v3766_v22 = vpop.f32.mrf.mxu1 }
 0x40f   :  { %3846 = vst [vmem:[#allocation2 + $0xa8] sm:$0xff] %v3772_v35  ;;  %v3767_v9 = vadd.f32 %v8012_v47, %v3766_v22 }
 0x411   :  { %3845 = vst [vmem:[#allocation2 + $0xa0] sm:$0xff] %v3767_v9 }
 0x41c   :  { %v4094_v15 = vpop.f32.mrf.mxu0 }
 0x41d   :  { %v3702_v51 = vadd.f32 %v4094_v15, %v8012_v47 }
 0x41e   :  { %v3696_v17 = vpop.f32.mrf.mxu0 }
 0x41f   :  { %3832 = vst [vmem:[#allocation2 + $0x38] sm:$0xff] %v3702_v51  ;;  %v3697_v55 = vadd.f32 %v8012_v47, %v3696_v17 }
 0x421   :  { %3831 = vst [vmem:[#allocation2 + $0x30] sm:$0xff] %v3697_v55 }
 0x424   :  { %v4118_v14 = vpop.f32.mrf.mxu1 }
 0x425   :  { %v3782_v62 = vadd.f32 %v4118_v14, %v8012_v47 }
 0x426   :  { %v3776_v21 = vpop.f32.mrf.mxu1 }
 0x427   :  { %3848 = vst [vmem:[#allocation2 + $0xb8] sm:$0xff] %v3782_v62  ;;  %v3777_v58 = vadd.f32 %v8012_v47, %v3776_v21 }
 0x429   :  { %3847 = vst [vmem:[#allocation2 + $0xb0] sm:$0xff] %v3777_v58 }
 0x433   :  { %v4097_v33 = vpop.f32.mrf.mxu0 }
 0x434   :  { %v3712_v57 = vadd.f32 %v4097_v33, %v8012_v47 }
 0x435   :  { %v4121_v19 = vpop.f32.mrf.mxu1  ;;  %v3706_v49 = vpop.f32.mrf.mxu0 }
 0x436   :  { %3834 = vst [vmem:[#allocation2 + $0x48] sm:$0xff] %v3712_v57  ;;  %v3792_v36 = vadd.f32 %v4121_v19, %v8012_v47  ;;  %v3707_v61 = vadd.f32 %v8012_v47, %v3706_v49 }
 0x437   :  { %v3786_v6 = vpop.f32.mrf.mxu1 }
 0x438   :  { %3850 = vst [vmem:[#allocation2 + $0xc8] sm:$0xff] %v3792_v36  ;;  %3833 = vst [vmem:[#allocation2 + $0x40] sm:$0xff] %v3707_v61  ;;  %v3787_v28 = vadd.f32 %v8012_v47, %v3786_v6 }
 0x43a   :  { %3849 = vst [vmem:[#allocation2 + $0xc0] sm:$0xff] %v3787_v28 }
 0x447   :  { %v4100_v26 = vpop.f32.mrf.mxu0 }
 0x448   :  { %v3722_v39 = vadd.f32 %v4100_v26, %v8012_v47 }
 0x449   :  { %v3716_v7 = vpop.f32.mrf.mxu0 }
 0x44a   :  { %3836 = vst [vmem:[#allocation2 + $0x58] sm:$0xff] %v3722_v39  ;;  %v3717_v0 = vadd.f32 %v8012_v47, %v3716_v7 }
 0x44c   :  { %3835 = vst [vmem:[#allocation2 + $0x50] sm:$0xff] %v3717_v0 }
 0x44d   :  { %v4124_v37 = vpop.f32.mrf.mxu1 }
 0x44e   :  { %v3802_v24 = vadd.f32 %v4124_v37, %v8012_v47 }
 0x44f   :  { %v3796_v5 = vpop.f32.mrf.mxu1 }
 0x450   :  { %3852 = vst [vmem:[#allocation2 + $0xd8] sm:$0xff] %v3802_v24  ;;  %v3797_v31 = vadd.f32 %v8012_v47, %v3796_v5 }
 0x452   :  { %3851 = vst [vmem:[#allocation2 + $0xd0] sm:$0xff] %v3797_v31 }
 0x45b   :  { %v4103_v29 = vpop.f32.mrf.mxu0 }
 0x45c   :  { %v3732_v11 = vadd.f32 %v4103_v29, %v8012_v47 }
 0x45d   :  { %v3726_v20 = vpop.f32.mrf.mxu0 }
 0x45e   :  { %3838 = vst [vmem:[#allocation2 + $0x68] sm:$0xff] %v3732_v11  ;;  %v3727_v43 = vadd.f32 %v8012_v47, %v3726_v20 }
 0x460   :  { %3837 = vst [vmem:[#allocation2 + $0x60] sm:$0xff] %v3727_v43 }
 0x461   :  { %v4127_v40 = vpop.f32.mrf.mxu1 }
 0x462   :  { %v3812_v45 = vadd.f32 %v4127_v40, %v8012_v47 }
 0x463   :  { %v3806_v48 = vpop.f32.mrf.mxu1 }
 0x464   :  { %3854 = vst [vmem:[#allocation2 + $0xe8] sm:$0xff] %v3812_v45  ;;  %v3807_v27 = vadd.f32 %v8012_v47, %v3806_v48 }
 0x466   :  { %3853 = vst [vmem:[#allocation2 + $0xe0] sm:$0xff] %v3807_v27 }
 0x46f   :  { %v4106_v59 = vpop.f32.mrf.mxu0 }
 0x470   :  { %v3742_v16 = vadd.f32 %v4106_v59, %v8012_v47 }
 0x471   :  { %v3736_v41 = vpop.f32.mrf.mxu0 }
 0x472   :  { %3840 = vst [vmem:[#allocation2 + $0x78] sm:$0xff] %v3742_v16  ;;  %v3737_v12 = vadd.f32 %v8012_v47, %v3736_v41 }
 0x474   :  { %3839 = vst [vmem:[#allocation2 + $0x70] sm:$0xff] %v3737_v12 }
 0x476   :  { %v4130_v3 = vpop.f32.mrf.mxu1 }
 0x477   :  { %v3822_v25 = vadd.f32 %v4130_v3, %v8012_v47 }
 0x478   :  { %v3816_v1 = vpop.f32.mrf.mxu1 }
 0x479   :  { %3856 = vst [vmem:[#allocation2 + $0xf8] sm:$0xff] %v3822_v25  ;;  %v3817_v56 = vadd.f32 %v8012_v47, %v3816_v1 }
 0x47b   :  { %3855 = vst [vmem:[#allocation2 + $0xf0] sm:$0xff] %v3817_v56 }
 0x47c   :  { %4446 = shalt.err (!%p4443_p4)
}
 0x47d   :  { %s4465_s17 = smov 128   ;;  %s4466_s18 = smov 8  }
 0x47e   :  { %3868 = dma.vmem_to_hbm [thread:$0]  %s3863_s15, 4096, %s8053_s4, [#allocation3], %s4465_s17, %s4465_s17, %s4466_s18  }
 0x47f   :  { %4455 = dma.done.wait [#allocation3], 4096  }
 0x480   :  { %4456 = vsyncadd [#allocation3], 4294963200 }
 0x481   :  { %3872 = vsyncpa [#allocation3], 1 }

</bundles_post_ra>
